<compile_context>
chip_gen: v7x
topology: tpu7x:2x2x1
jax: 0.10.0
libtpu: 0.0.40
codegen_flags: <defaults>
</compile_context>

<pallas_src>
import numpy as np
import jax
import jax.numpy as jnp
from jax.experimental import pallas as pl
from jax.experimental.pallas import tpu as pltpu

F32 = jnp.float32
_LANE = 128        # per-depth node padding (lane axis)
_BATCH_PAD = 128   # padded batch axis of the lane-dense kernel output


# ----------------------------- in-kernel helpers -----------------------------

def _recip(x):
    # reciprocal on the EUP slot instead of VALU divides  [perf feedback]
    return pl.reciprocal(x, approx=True)


def _softmax(x, axis):
    m = jnp.max(x, axis=axis, keepdims=True)
    e = jnp.exp(x - m)
    return e * _recip(jnp.sum(e, axis=axis, keepdims=True))


def _emission_blocks(B2, x1h, C, G, S, D):
    # B2: (C*G, M) softmaxed emission table; x1h: (M, D*S) one-hot symbol per padded node.
    # One MXU matmul gives B[:, x[n], :] for every node; split into per-depth blocks.
    Bx = jnp.dot(B2, x1h, preferred_element_type=jnp.float32)          # (C*G, D*S)
    return [Bx[:, d * S:(d + 1) * S].reshape(C, G, S) for d in range(D)]


def _apply_A(A, vec, posm_l, contract_axis):
    """Per-child transition contraction, blended over the L child positions.

    A      : (L, C, C, G)  A[k, i, j, g]
    vec    : (C, G, S)     per-child vectors, nodes on the 128-lane axis
    posm_l : (L, S)        one-hot child-position masks for this level
    contract_axis == 1 -> out[i, g, s] = sum_j A[k, i, j, g] * vec[j, g, s]
    contract_axis == 0 -> out[j, g, s] = sum_i A[k, i, j, g] * vec[i, g, s]
    """
    L = A.shape[0]
    out = None
    for k in range(L):                                  # L is tiny & static -> unrolled
        Ak = A[k]                                       # (C, C, G)
        if contract_axis == 1:
            c = jnp.sum(Ak[:, :, :, None] * vec[None, :, :, :], axis=1)
        else:
            c = jnp.sum(Ak[:, :, :, None] * vec[:, None, :, :], axis=0)
        c = c * posm_l[k][None, None, :]
        out = c if out is None else out + c
    return out


def _pair_dot(vals, mat):
    # (C, G, S) x (S, S') -> (C, G, S'); one MXU matmul (lane gather / scatter-sum).
    C, G, S = vals.shape
    r = jnp.dot(vals.reshape(C * G, S), mat, preferred_element_type=jnp.float32)
    return r.reshape(C, G, mat.shape[1])


def _batch_reduce(ll_blocks, nvalid, bmap_ref, G, BP):
    acc = jnp.zeros((G, BP), jnp.float32)
    for d in range(len(ll_blocks)):
        lld = jnp.where(nvalid[d][None, :] != 0.0, ll_blocks[d], 0.0)
        acc = acc + jnp.dot(lld, bmap_ref[d], preferred_element_type=jnp.float32)
    return acc


# ------------------------------- fused kernels --------------------------------

def _bu_kernel(lamA_ref, lamB_ref, lamPi_ref, lamSP_ref,
               x1h_ref, mparT_ref, posm_ref, pmask_ref, nvalid_ref, bmap_ref,
               out_ref):
    L, C, _, G = lamA_ref.shape
    D, S = nvalid_ref.shape
    n_levels = D - 1
    BP = bmap_ref.shape[2]

    # parameter softmaxes (all fused here; no separate launches / transposes)
    A = _softmax(lamA_ref[...], axis=1)                 # (L, C, C, G), softmax over i
    SP = _softmax(lamSP_ref[...], axis=0)               # (L, G)
    A_sp = A * SP[:, None, None, :]                     # fold switching-parent weights into A
    B2 = _softmax(lamB_ref[...], axis=1)                # (C*G, M), softmax over symbols
    Pi = _softmax(lamPi_ref[...], axis=0)               # (C, G)

    Bx = _emission_blocks(B2, x1h_ref[...], C, G, S, D)
    posm = posm_ref[...]
    pmask = pmask_ref[...]
    nvalid = nvalid_ref[...]

    # init every node with the leaf rule; internal nodes are overwritten below
    # (their init value is never read before being overwritten).
    beta, ll = [], []
    for d in range(D):
        b0 = Pi[:, :, None] * Bx[d]
        nu = jnp.sum(b0, axis=0)                         # (G, S)
        beta.append(b0 * _recip(nu)[None])
        ll.append(jnp.log(nu))

    # upward recursion, deepest level first; every level has the same padded shape
    for l in range(n_levels - 1, -1, -1):
        msg = _apply_A(A_sp, beta[l + 1], posm[l], contract_axis=1)   # per child (C,G,S)
        t_beta_pa = _pair_dot(msg, mparT_ref[l])                      # scatter-sum -> parents
        b_un = t_beta_pa * Bx[l]
        nu = jnp.sum(b_un, axis=0)
        b_new = b_un * _recip(nu)[None]
        pm = pmask[l][None, :] != 0.0
        beta[l] = jnp.where(pm[None], b_new, beta[l])
        ll[l] = jnp.where(pm, jnp.log(nu), ll[l])

    out_ref[...] = _batch_reduce(ll, nvalid, bmap_ref, G, BP)         # lane-dense (G, 128)


def _td_kernel(lamA_ref, lamB_ref, lamPi_ref,
               x1h_ref, mpar_ref, mparT_ref, posm_ref, pmask_ref, lmask_ref,
               nvalid_ref, bmap_ref, out_ref):
    L, C, _, G = lamA_ref.shape
    D, S = nvalid_ref.shape
    n_levels = D - 1
    BP = bmap_ref.shape[2]

    A = _softmax(lamA_ref[...], axis=1)                  # (L, C, C, G)
    B2 = _softmax(lamB_ref[...], axis=1)                 # (C*G, M)
    Pi = _softmax(lamPi_ref[...], axis=0)                # (C, G)

    Bx = _emission_blocks(B2, x1h_ref[...], C, G, S, D)
    posm = posm_ref[...]
    pmask = pmask_ref[...]
    lmask = lmask_ref[...]
    nvalid = nvalid_ref[...]

    # downward pass: priors per depth block (roots get Pi, padded lanes stay 0)
    prior = [None] * D
    prior[0] = Pi[:, :, None] * pmask[0][None, None, :]
    for l in range(n_levels):
        prior_pa_ch = _pair_dot(prior[l], mpar_ref[l])                 # gather parent prior/child
        prior[l + 1] = _apply_A(A, prior_pa_ch, posm[l], contract_axis=1)

    # beta = prior * emission; only leaves are normalized at init (as in the reference)
    beta, ll = [], []
    for d in range(D):
        b = prior[d] * Bx[d]
        nu = jnp.sum(b, axis=0)
        lm = lmask[d][None, :] != 0.0
        beta.append(jnp.where(lm[None], b * _recip(nu)[None], b))
        ll.append(jnp.where(lm, jnp.log(nu), jnp.zeros_like(nu)))

    # upward recursion
    for l in range(n_levels - 1, -1, -1):
        cvalid = nvalid[l + 1][None, None, :] != 0.0
        ratio = beta[l + 1] * _recip(prior[l + 1])
        buv = _apply_A(A, ratio, posm[l], contract_axis=0)             # per child (C,G,S)
        buv = jnp.where(cvalid, buv, 1.0)                              # padded lanes -> neutral
        # multiplicative scatter to parents: prod over children == exp(scatter-sum of logs)
        prod_ch = jnp.exp(_pair_dot(jnp.log(buv), mparT_ref[l]))
        prev = beta[l]
        # matches the reference exactly: prev_beta * (beta scatter-mul'd by the children)
        b_un = prev * prev * prod_ch
        nu = jnp.sum(b_un, axis=0)
        b_new = b_un * _recip(nu)[None]
        pm = pmask[l][None, :] != 0.0
        beta[l] = jnp.where(pm[None], b_new, prev)
        ll[l] = jnp.where(pm, jnp.log(nu), ll[l])

    out_ref[...] = _batch_reduce(ll, nvalid, bmap_ref, G, BP)


# --------------------------- pallas_call plumbing -----------------------------

def _whole_spec(shape):
    nd = len(shape)
    return pl.BlockSpec(tuple(int(s) for s in shape), lambda i, _nd=nd: (0,) * _nd)


def _fused_call(kernel, args, out_shape):
    return pl.pallas_call(
        kernel,
        grid=(1,),
        in_specs=[_whole_spec(a.shape) for a in args],
        out_specs=_whole_spec(out_shape.shape),
        out_shape=out_shape,
        compiler_params=pltpu.CompilerParams(
            dimension_semantics=("arbitrary",)),
    )(*args)


# ------------------------ static topology preprocessing -----------------------

def prepare_tree(tree, L, M):
    """Turn the (static NumPy) tree topology into dense, padded, lane-aligned
    operands: one-hot symbol table, per-level parent<->child one-hot matrices,
    position masks, parent/leaf/validity masks and a batch one-hot matrix."""
    N = int(tree['dim'])
    levels = [(np.asarray(pa).astype(np.int64), np.asarray(ch).astype(np.int64))
              for (pa, ch) in tree['levels']]
    n_levels = len(levels)
    assert n_levels >= 1
    D = n_levels + 1
    x = np.asarray(tree['x']).astype(np.int64)
    pos = np.asarray(tree['pos']).astype(np.int64)
    batch = np.asarray(tree['batch']).astype(np.int64)
    leaves = np.asarray(tree['leaves']).astype(np.int64)
    n_batch = int(tree['n_batch'])
    assert n_batch <= _BATCH_PAD and int(x.max()) < M and int(pos.max()) < L

    depth = np.zeros(N, dtype=np.int64)
    for l, (_, ch) in enumerate(levels):
        depth[ch] = l + 1
    counts = np.bincount(depth, minlength=D)
    S = int(np.ceil(max(int(counts.max()), 1) / _LANE) * _LANE)

    rank = np.zeros(N, dtype=np.int64)
    seen = np.zeros(D, dtype=np.int64)
    for n in range(N):
        rank[n] = seen[depth[n]]
        seen[depth[n]] += 1

    x_pad = np.zeros(D * S, dtype=np.int64)                  # padded slots -> symbol 0
    x_pad[depth * S + rank] = x
    x1h = np.zeros((M, D * S), dtype=np.float32)
    x1h[x_pad, np.arange(D * S)] = 1.0

    nvalid = np.zeros((D, S), np.float32); nvalid[depth, rank] = 1.0
    lmask = np.zeros((D, S), np.float32); lmask[depth[leaves], rank[leaves]] = 1.0
    bmap = np.zeros((D, S, _BATCH_PAD), np.float32); bmap[depth, rank, batch] = 1.0

    mpar = np.zeros((n_levels, S, S), np.float32)            # parent-lane -> child-lane
    mparT = np.zeros((n_levels, S, S), np.float32)           # child-lane  -> parent-lane
    posm = np.zeros((n_levels, L, S), np.float32)
    pmask = np.zeros((n_levels, S), np.float32)
    for l, (pa, ch) in enumerate(levels):
        assert np.all(depth[pa] == l) and np.all(depth[ch] == l + 1)
        p_loc, c_loc = rank[pa], rank[ch]
        mpar[l, p_loc, c_loc] = 1.0
        mparT[l, c_loc, p_loc] = 1.0
        posm[l, pos[ch], c_loc] = 1.0
        pmask[l, rank[np.unique(pa)]] = 1.0

    return {
        'x1h': jnp.asarray(x1h), 'mpar': jnp.asarray(mpar), 'mparT': jnp.asarray(mparT),
        'posm': jnp.asarray(posm), 'pmask': jnp.asarray(pmask), 'lmask': jnp.asarray(lmask),
        'nvalid': jnp.asarray(nvalid), 'bmap': jnp.asarray(bmap),
        'n_batch': n_batch,
    }


# --------------------------- forward passes (bu / td) --------------------------

def reversed_upward_downward(prep, lam_A, lam_B, lam_Pi, lam_SP):
    C, _, L, G = lam_A.shape
    Mm = lam_B.shape[1]
    lamA_r = jnp.transpose(lam_A, (2, 0, 1, 3))                       # (L, C, C, G)
    lamB_r = jnp.transpose(lam_B, (0, 2, 1)).reshape(C * G, Mm)       # (C*G, M)
    BP = prep['bmap'].shape[2]
    out = _fused_call(
        _bu_kernel,
        [lamA_r, lamB_r, lam_Pi, lam_SP, prep['x1h'], prep['mparT'],
         prep['posm'], prep['pmask'], prep['nvalid'], prep['bmap']],
        jax.ShapeDtypeStruct((G, BP), F32))
    return out[:, :prep['n_batch']].T


def upward_downward(prep, lam_A, lam_B, lam_Pi):
    C, _, L, G = lam_A.shape
    Mm = lam_B.shape[1]
    lamA_r = jnp.transpose(lam_A, (2, 0, 1, 3))
    lamB_r = jnp.transpose(lam_B, (0, 2, 1)).reshape(C * G, Mm)
    BP = prep['bmap'].shape[2]
    out = _fused_call(
        _td_kernel,
        [lamA_r, lamB_r, lam_Pi, prep['x1h'], prep['mpar'], prep['mparT'],
         prep['posm'], prep['pmask'], prep['lmask'], prep['nvalid'], prep['bmap']],
        jax.ShapeDtypeStruct((G, BP), F32))
    return out[:, :prep['n_batch']].T


# --------------------------------- the module ----------------------------------

class HiddenTreeMarkovModel:
    def __init__(self, mode, n_gen, C, L, M, key):
        self.mode, self.n_gen, self.C, self.L, self.M = mode, n_gen, C, L, M
        k = jax.random.split(key, 5)
        u = lambda kk, shape: jax.random.uniform(kk, shape, F32)      # ~ nn.init.uniform_
        if mode == 'bu':
            self.A = u(k[0], (C, C, L, n_gen))
            self.B = u(k[1], (C, M, n_gen))
            self.Pi = u(k[2], (C, n_gen))
            self.SP = u(k[3], (L, n_gen))
        elif mode == 'td':
            self.A = u(k[0], (C, C, L, n_gen))
            self.B = u(k[1], (C, M, n_gen))
            self.Pi = u(k[2], (C, n_gen))
        elif mode == 'hybrid':
            self.A = u(k[0], (C, C, L, n_gen))
            self.B = u(k[1], (C, M, n_gen))
            self.SP = u(k[2], (L, n_gen))
            self.Pi_bu = u(k[3], (C, n_gen))
            self.Pi_td = u(k[4], (C, n_gen))
        else:
            raise ValueError(mode)

    def __call__(self, tree):
        prep = prepare_tree(tree, self.L, self.M)
        if self.mode == 'bu':
            return reversed_upward_downward(prep, self.A, self.B, self.Pi, self.SP)
        elif self.mode == 'td':
            return upward_downward(prep, self.A, self.B, self.Pi)
        else:  # hybrid
            return (reversed_upward_downward(prep, self.A, self.B, self.Pi_bu, self.SP)
                    + upward_downward(prep, jnp.transpose(self.A, (1, 0, 2, 3)),
                                      self.B, self.Pi_td))


# ------------------------------------ main --------------------------------------

if __name__ == "__main__":
    C, M, L, n_gen = 8, 16, 3, 8

    # Two small trees (batch=2), 11 nodes total:
    #   tree 0: 0 -> (1, 2); 1 -> (3, 4)           (leaves: 2, 3, 4)
    #   tree 1: 5 -> (6, 7, 8); 6 -> (9, 10)       (leaves: 7, 8, 9, 10)
    tree = {
        'dim': 11,
        'x': np.array([3, 1, 7, 2, 5, 0, 9, 4, 11, 6, 13], dtype=np.int32),
        'leaves': np.array([2, 3, 4, 7, 8, 9, 10], dtype=np.int32),
        'pos': np.array([0, 0, 1, 0, 1, 0, 0, 1, 2, 0, 1], dtype=np.int32),
        'batch': np.array([0, 0, 0, 0, 0, 1, 1, 1, 1, 1, 1], dtype=np.int32),
        'levels': [
            (np.array([0, 0, 5, 5, 5], dtype=np.int32),
             np.array([1, 2, 6, 7, 8], dtype=np.int32)),
            (np.array([1, 1, 6, 6], dtype=np.int32),
             np.array([3, 4, 9, 10], dtype=np.int32)),
        ],
        'n_batch': 2,
    }

    key = jax.random.PRNGKey(0)
    k_bu, k_td, k_hy = jax.random.split(key, 3)

    out_bu = jax.block_until_ready(
        HiddenTreeMarkovModel('bu', n_gen, C, L, M, k_bu)(tree))
    out_td = jax.block_until_ready(
        HiddenTreeMarkovModel('td', n_gen, C, L, M, k_td)(tree))
    out_hy = jax.block_until_ready(
        HiddenTreeMarkovModel('hybrid', n_gen, C, L, M, k_hy)(tree))

    for o in (out_bu, out_td, out_hy):
        assert o.shape == (2, n_gen)
        assert bool(jnp.all(jnp.isfinite(o)))

    print("KERNEL_OK")
</pallas_src>

<mosaic_0001>
module attributes {stable_mosaic.version = 11 : i64} {
  func.func @_bu_kernel(%arg0: i32, %arg1: memref<3x8x8x8xf32, #tpu.memory_space<vmem>>, %arg2: memref<64x16xf32, #tpu.memory_space<vmem>>, %arg3: memref<8x8xf32, #tpu.memory_space<vmem>>, %arg4: memref<3x8xf32, #tpu.memory_space<vmem>>, %arg5: memref<16x384xf32, #tpu.memory_space<vmem>>, %arg6: memref<2x128x128xf32, #tpu.memory_space<vmem>>, %arg7: memref<2x3x128xf32, #tpu.memory_space<vmem>>, %arg8: memref<2x128xf32, #tpu.memory_space<vmem>>, %arg9: memref<3x128xf32, #tpu.memory_space<vmem>>, %arg10: memref<3x128x128xf32, #tpu.memory_space<vmem>>, %arg11: memref<8x128xf32, #tpu.memory_space<vmem>>) attributes {dimension_semantics = [#tpu.dimension_semantics<arbitrary>], iteration_bounds = array<i64: 1>, scalar_prefetch = 0 : i64, scratch_operands = 0 : i64, tpu.core_type = #tpu.core_type<tc>, window_params = [{pipeline_mode = #tpu.pipeline_mode<synchronous>, transform_indices = @transform_0, window_bounds = array<i64: 3, 8, 8, 8>}, {pipeline_mode = #tpu.pipeline_mode<synchronous>, transform_indices = @transform_1, window_bounds = array<i64: 64, 16>}, {pipeline_mode = #tpu.pipeline_mode<synchronous>, transform_indices = @transform_2, window_bounds = array<i64: 8, 8>}, {pipeline_mode = #tpu.pipeline_mode<synchronous>, transform_indices = @transform_3, window_bounds = array<i64: 3, 8>}, {pipeline_mode = #tpu.pipeline_mode<synchronous>, transform_indices = @transform_4, window_bounds = array<i64: 16, 384>}, {pipeline_mode = #tpu.pipeline_mode<synchronous>, transform_indices = @transform_5, window_bounds = array<i64: 2, 128, 128>}, {pipeline_mode = #tpu.pipeline_mode<synchronous>, transform_indices = @transform_6, window_bounds = array<i64: 2, 3, 128>}, {pipeline_mode = #tpu.pipeline_mode<synchronous>, transform_indices = @transform_7, window_bounds = array<i64: 2, 128>}, {pipeline_mode = #tpu.pipeline_mode<synchronous>, transform_indices = @transform_8, window_bounds = array<i64: 3, 128>}, {pipeline_mode = #tpu.pipeline_mode<synchronous>, transform_indices = @transform_9, window_bounds = array<i64: 3, 128, 128>}, {pipeline_mode = #tpu.pipeline_mode<synchronous>, transform_indices = @transform_10, window_bounds = array<i64: 8, 128>}]} {
    %c0 = arith.constant 0 : index
    %c0_0 = arith.constant 0 : index
    %c0_1 = arith.constant 0 : index
    %c0_2 = arith.constant 0 : index
    %0 = vector.load %arg1[%c0, %c0_0, %c0_1, %c0_2] : memref<3x8x8x8xf32, #tpu.memory_space<vmem>>, vector<3x8x8x8xf32>
    %cst = arith.constant dense<0xFF800000> : vector<3x8x8xf32>
    %1 = vector.multi_reduction <maximumf>, %0, %cst [1] : vector<3x8x8x8xf32> to vector<3x8x8xf32>
    %2 = vector.shape_cast %1 : vector<3x8x8xf32> to vector<3x1x8x8xf32>
    %3 = vector.broadcast %2 : vector<3x1x8x8xf32> to vector<3x8x8x8xf32>
    %4 = arith.subf %0, %3 : vector<3x8x8x8xf32>
    %5 = math.exp %4 : vector<3x8x8x8xf32>
    %cst_3 = arith.constant dense<0.000000e+00> : vector<3x8x8xf32>
    %6 = vector.multi_reduction <add>, %5, %cst_3 [1] : vector<3x8x8x8xf32> to vector<3x8x8xf32>
    %7 = vector.shape_cast %6 : vector<3x8x8xf32> to vector<3x1x8x8xf32>
    %8 = tpu.reciprocal %7 {approx = true} : vector<3x1x8x8xf32> -> vector<3x1x8x8xf32>
    %9 = vector.broadcast %8 : vector<3x1x8x8xf32> to vector<3x8x8x8xf32>
    %10 = arith.mulf %5, %9 : vector<3x8x8x8xf32>
    %c0_4 = arith.constant 0 : index
    %c0_5 = arith.constant 0 : index
    %11 = vector.load %arg4[%c0_4, %c0_5] : memref<3x8xf32, #tpu.memory_space<vmem>>, vector<3x8xf32>
    %cst_6 = arith.constant dense<0xFF800000> : vector<8xf32>
    %12 = vector.multi_reduction <maximumf>, %11, %cst_6 [0] : vector<3x8xf32> to vector<8xf32>
    %13 = vector.shape_cast %12 : vector<8xf32> to vector<1x8xf32>
    %14 = vector.broadcast %13 : vector<1x8xf32> to vector<3x8xf32>
    %15 = arith.subf %11, %14 : vector<3x8xf32>
    %16 = math.exp %15 : vector<3x8xf32>
    %cst_7 = arith.constant dense<0.000000e+00> : vector<8xf32>
    %17 = vector.multi_reduction <add>, %16, %cst_7 [0] : vector<3x8xf32> to vector<8xf32>
    %18 = vector.shape_cast %17 : vector<8xf32> to vector<1x8xf32>
    %19 = tpu.reciprocal %18 {approx = true} : vector<1x8xf32> -> vector<1x8xf32>
    %20 = vector.broadcast %19 : vector<1x8xf32> to vector<3x8xf32>
    %21 = arith.mulf %16, %20 : vector<3x8xf32>
    %22 = vector.shape_cast %21 : vector<3x8xf32> to vector<3x1x1x8xf32>
    %23 = vector.broadcast %22 : vector<3x1x1x8xf32> to vector<3x8x8x8xf32>
    %24 = arith.mulf %10, %23 : vector<3x8x8x8xf32>
    %c0_8 = arith.constant 0 : index
    %c0_9 = arith.constant 0 : index
    %25 = vector.load %arg2[%c0_8, %c0_9] : memref<64x16xf32, #tpu.memory_space<vmem>>, vector<64x16xf32>
    %cst_10 = arith.constant dense<0xFF800000> : vector<64xf32>
    %26 = vector.multi_reduction <maximumf>, %25, %cst_10 [1] : vector<64x16xf32> to vector<64xf32>
    %27 = vector.shape_cast %26 : vector<64xf32> to vector<64x1xf32>
    %28 = vector.broadcast %27 : vector<64x1xf32> to vector<64x16xf32>
    %29 = arith.subf %25, %28 : vector<64x16xf32>
    %30 = math.exp %29 : vector<64x16xf32>
    %cst_11 = arith.constant dense<0.000000e+00> : vector<64xf32>
    %31 = vector.multi_reduction <add>, %30, %cst_11 [1] : vector<64x16xf32> to vector<64xf32>
    %32 = vector.shape_cast %31 : vector<64xf32> to vector<64x1xf32>
    %33 = tpu.reciprocal %32 {approx = true} : vector<64x1xf32> -> vector<64x1xf32>
    %34 = vector.broadcast %33 : vector<64x1xf32> to vector<64x16xf32>
    %35 = arith.mulf %30, %34 : vector<64x16xf32>
    %c0_12 = arith.constant 0 : index
    %c0_13 = arith.constant 0 : index
    %36 = vector.load %arg3[%c0_12, %c0_13] : memref<8x8xf32, #tpu.memory_space<vmem>>, vector<8x8xf32>
    %cst_14 = arith.constant dense<0xFF800000> : vector<8xf32>
    %37 = vector.multi_reduction <maximumf>, %36, %cst_14 [0] : vector<8x8xf32> to vector<8xf32>
    %38 = vector.shape_cast %37 : vector<8xf32> to vector<1x8xf32>
    %39 = vector.broadcast %38 : vector<1x8xf32> to vector<8x8xf32>
    %40 = arith.subf %36, %39 : vector<8x8xf32>
    %41 = math.exp %40 : vector<8x8xf32>
    %cst_15 = arith.constant dense<0.000000e+00> : vector<8xf32>
    %42 = vector.multi_reduction <add>, %41, %cst_15 [0] : vector<8x8xf32> to vector<8xf32>
    %43 = vector.shape_cast %42 : vector<8xf32> to vector<1x8xf32>
    %44 = tpu.reciprocal %43 {approx = true} : vector<1x8xf32> -> vector<1x8xf32>
    %45 = vector.broadcast %44 : vector<1x8xf32> to vector<8x8xf32>
    %46 = arith.mulf %41, %45 : vector<8x8xf32>
    %c0_16 = arith.constant 0 : index
    %c0_17 = arith.constant 0 : index
    %47 = vector.load %arg5[%c0_16, %c0_17] : memref<16x384xf32, #tpu.memory_space<vmem>>, vector<16x384xf32>
    %cst_18 = arith.constant dense<0.000000e+00> : vector<64x384xf32>
    %48 = tpu.matmul %35, %47, %cst_18 {dimension_numbers = #tpu.dot_dimension_numbers<[1], [0], [0], [1], [0, 0, 1, 1], [], []>} : vector<64x16xf32>, vector<16x384xf32>, vector<64x384xf32> -> vector<64x384xf32>
    %49 = vector.extract_strided_slice %48 {offsets = [0, 0], sizes = [64, 128], strides = [1, 1]} : vector<64x384xf32> to vector<64x128xf32>
    %50 = vector.shape_cast %49 : vector<64x128xf32> to vector<8x8x128xf32>
    %51 = vector.extract_strided_slice %48 {offsets = [0, 128], sizes = [64, 128], strides = [1, 1]} : vector<64x384xf32> to vector<64x128xf32>
    %52 = vector.shape_cast %51 : vector<64x128xf32> to vector<8x8x128xf32>
    %53 = vector.extract_strided_slice %48 {offsets = [0, 256], sizes = [64, 128], strides = [1, 1]} : vector<64x384xf32> to vector<64x128xf32>
    %54 = vector.shape_cast %53 : vector<64x128xf32> to vector<8x8x128xf32>
    %c0_19 = arith.constant 0 : index
    %c0_20 = arith.constant 0 : index
    %c0_21 = arith.constant 0 : index
    %55 = vector.load %arg7[%c0_19, %c0_20, %c0_21] : memref<2x3x128xf32, #tpu.memory_space<vmem>>, vector<2x3x128xf32>
    %c0_22 = arith.constant 0 : index
    %c0_23 = arith.constant 0 : index
    %56 = vector.load %arg8[%c0_22, %c0_23] : memref<2x128xf32, #tpu.memory_space<vmem>>, vector<2x128xf32>
    %c0_24 = arith.constant 0 : index
    %c0_25 = arith.constant 0 : index
    %57 = vector.load %arg9[%c0_24, %c0_25] : memref<3x128xf32, #tpu.memory_space<vmem>>, vector<3x128xf32>
    %58 = vector.shape_cast %46 : vector<8x8xf32> to vector<8x8x1xf32>
    %59 = vector.broadcast %58 : vector<8x8x1xf32> to vector<8x8x128xf32>
    %60 = arith.mulf %59, %50 : vector<8x8x128xf32>
    %cst_26 = arith.constant dense<0.000000e+00> : vector<8x128xf32>
    %61 = vector.multi_reduction <add>, %60, %cst_26 [0] : vector<8x8x128xf32> to vector<8x128xf32>
    %62 = math.log %61 : vector<8x128xf32>
    %63 = vector.shape_cast %46 : vector<8x8xf32> to vector<8x8x1xf32>
    %64 = vector.broadcast %63 : vector<8x8x1xf32> to vector<8x8x128xf32>
    %65 = arith.mulf %64, %52 : vector<8x8x128xf32>
    %cst_27 = arith.constant dense<0.000000e+00> : vector<8x128xf32>
    %66 = vector.multi_reduction <add>, %65, %cst_27 [0] : vector<8x8x128xf32> to vector<8x128xf32>
    %67 = tpu.reciprocal %66 {approx = true} : vector<8x128xf32> -> vector<8x128xf32>
    %68 = vector.shape_cast %67 : vector<8x128xf32> to vector<1x8x128xf32>
    %69 = vector.broadcast %68 : vector<1x8x128xf32> to vector<8x8x128xf32>
    %70 = arith.mulf %65, %69 : vector<8x8x128xf32>
    %71 = math.log %66 : vector<8x128xf32>
    %72 = vector.shape_cast %46 : vector<8x8xf32> to vector<8x8x1xf32>
    %73 = vector.broadcast %72 : vector<8x8x1xf32> to vector<8x8x128xf32>
    %74 = arith.mulf %73, %54 : vector<8x8x128xf32>
    %cst_28 = arith.constant dense<0.000000e+00> : vector<8x128xf32>
    %75 = vector.multi_reduction <add>, %74, %cst_28 [0] : vector<8x8x128xf32> to vector<8x128xf32>
    %76 = tpu.reciprocal %75 {approx = true} : vector<8x128xf32> -> vector<8x128xf32>
    %77 = vector.shape_cast %76 : vector<8x128xf32> to vector<1x8x128xf32>
    %78 = vector.broadcast %77 : vector<1x8x128xf32> to vector<8x8x128xf32>
    %79 = arith.mulf %74, %78 : vector<8x8x128xf32>
    %80 = math.log %75 : vector<8x128xf32>
    %81 = vector.extract_strided_slice %55 {offsets = [1, 0, 0], sizes = [1, 3, 128], strides = [1, 1, 1]} : vector<2x3x128xf32> to vector<1x3x128xf32>
    %82 = vector.shape_cast %81 : vector<1x3x128xf32> to vector<3x128xf32>
    %83 = vector.extract_strided_slice %24 {offsets = [0, 0, 0, 0], sizes = [1, 8, 8, 8], strides = [1, 1, 1, 1]} : vector<3x8x8x8xf32> to vector<1x8x8x8xf32>
    %84 = vector.shape_cast %83 : vector<1x8x8x8xf32> to vector<8x8x8xf32>
    %85 = vector.shape_cast %84 : vector<8x8x8xf32> to vector<8x8x8x1xf32>
    %86 = vector.shape_cast %79 : vector<8x8x128xf32> to vector<1x8x8x128xf32>
    %87 = vector.broadcast %85 : vector<8x8x8x1xf32> to vector<8x8x8x128xf32>
    %88 = vector.broadcast %86 : vector<1x8x8x128xf32> to vector<8x8x8x128xf32>
    %89 = arith.mulf %87, %88 : vector<8x8x8x128xf32>
    %cst_29 = arith.constant dense<0.000000e+00> : vector<8x8x128xf32>
    %90 = vector.multi_reduction <add>, %89, %cst_29 [1] : vector<8x8x8x128xf32> to vector<8x8x128xf32>
    %91 = vector.extract_strided_slice %82 {offsets = [0, 0], sizes = [1, 128], strides = [1, 1]} : vector<3x128xf32> to vector<1x128xf32>
    %92 = vector.shape_cast %91 : vector<1x128xf32> to vector<128xf32>
    %93 = vector.shape_cast %92 : vector<128xf32> to vector<1x1x128xf32>
    %94 = vector.broadcast %93 : vector<1x1x128xf32> to vector<8x8x128xf32>
    %95 = arith.mulf %90, %94 : vector<8x8x128xf32>
    %96 = vector.extract_strided_slice %24 {offsets = [1, 0, 0, 0], sizes = [1, 8, 8, 8], strides = [1, 1, 1, 1]} : vector<3x8x8x8xf32> to vector<1x8x8x8xf32>
    %97 = vector.shape_cast %96 : vector<1x8x8x8xf32> to vector<8x8x8xf32>
    %98 = vector.shape_cast %97 : vector<8x8x8xf32> to vector<8x8x8x1xf32>
    %99 = vector.shape_cast %79 : vector<8x8x128xf32> to vector<1x8x8x128xf32>
    %100 = vector.broadcast %98 : vector<8x8x8x1xf32> to vector<8x8x8x128xf32>
    %101 = vector.broadcast %99 : vector<1x8x8x128xf32> to vector<8x8x8x128xf32>
    %102 = arith.mulf %100, %101 : vector<8x8x8x128xf32>
    %cst_30 = arith.constant dense<0.000000e+00> : vector<8x8x128xf32>
    %103 = vector.multi_reduction <add>, %102, %cst_30 [1] : vector<8x8x8x128xf32> to vector<8x8x128xf32>
    %104 = vector.extract_strided_slice %82 {offsets = [1, 0], sizes = [1, 128], strides = [1, 1]} : vector<3x128xf32> to vector<1x128xf32>
    %105 = vector.shape_cast %104 : vector<1x128xf32> to vector<128xf32>
    %106 = vector.shape_cast %105 : vector<128xf32> to vector<1x1x128xf32>
    %107 = vector.broadcast %106 : vector<1x1x128xf32> to vector<8x8x128xf32>
    %108 = arith.mulf %103, %107 : vector<8x8x128xf32>
    %109 = arith.addf %95, %108 : vector<8x8x128xf32>
    %110 = vector.extract_strided_slice %24 {offsets = [2, 0, 0, 0], sizes = [1, 8, 8, 8], strides = [1, 1, 1, 1]} : vector<3x8x8x8xf32> to vector<1x8x8x8xf32>
    %111 = vector.shape_cast %110 : vector<1x8x8x8xf32> to vector<8x8x8xf32>
    %112 = vector.shape_cast %111 : vector<8x8x8xf32> to vector<8x8x8x1xf32>
    %113 = vector.shape_cast %79 : vector<8x8x128xf32> to vector<1x8x8x128xf32>
    %114 = vector.broadcast %112 : vector<8x8x8x1xf32> to vector<8x8x8x128xf32>
    %115 = vector.broadcast %113 : vector<1x8x8x128xf32> to vector<8x8x8x128xf32>
    %116 = arith.mulf %114, %115 : vector<8x8x8x128xf32>
    %cst_31 = arith.constant dense<0.000000e+00> : vector<8x8x128xf32>
    %117 = vector.multi_reduction <add>, %116, %cst_31 [1] : vector<8x8x8x128xf32> to vector<8x8x128xf32>
    %118 = vector.extract_strided_slice %82 {offsets = [2, 0], sizes = [1, 128], strides = [1, 1]} : vector<3x128xf32> to vector<1x128xf32>
    %119 = vector.shape_cast %118 : vector<1x128xf32> to vector<128xf32>
    %120 = vector.shape_cast %119 : vector<128xf32> to vector<1x1x128xf32>
    %121 = vector.broadcast %120 : vector<1x1x128xf32> to vector<8x8x128xf32>
    %122 = arith.mulf %117, %121 : vector<8x8x128xf32>
    %123 = arith.addf %109, %122 : vector<8x8x128xf32>
    %c1 = arith.constant 1 : index
    %c0_32 = arith.constant 0 : index
    %c0_33 = arith.constant 0 : index
    %124 = vector.load %arg6[%c1, %c0_32, %c0_33] : memref<2x128x128xf32, #tpu.memory_space<vmem>>, vector<1x128x128xf32>
    %125 = vector.shape_cast %124 : vector<1x128x128xf32> to vector<128x128xf32>
    %126 = vector.shape_cast %123 : vector<8x8x128xf32> to vector<64x128xf32>
    %cst_34 = arith.constant dense<0.000000e+00> : vector<64x128xf32>
    %127 = tpu.matmul %126, %125, %cst_34 {dimension_numbers = #tpu.dot_dimension_numbers<[1], [0], [0], [1], [0, 0, 1, 1], [], []>} : vector<64x128xf32>, vector<128x128xf32>, vector<64x128xf32> -> vector<64x128xf32>
    %128 = vector.shape_cast %127 : vector<64x128xf32> to vector<8x8x128xf32>
    %129 = arith.mulf %128, %52 : vector<8x8x128xf32>
    %cst_35 = arith.constant dense<0.000000e+00> : vector<8x128xf32>
    %130 = vector.multi_reduction <add>, %129, %cst_35 [0] : vector<8x8x128xf32> to vector<8x128xf32>
    %131 = tpu.reciprocal %130 {approx = true} : vector<8x128xf32> -> vector<8x128xf32>
    %132 = vector.shape_cast %131 : vector<8x128xf32> to vector<1x8x128xf32>
    %133 = vector.broadcast %132 : vector<1x8x128xf32> to vector<8x8x128xf32>
    %134 = arith.mulf %129, %133 : vector<8x8x128xf32>
    %135 = vector.extract_strided_slice %56 {offsets = [1, 0], sizes = [1, 128], strides = [1, 1]} : vector<2x128xf32> to vector<1x128xf32>
    %136 = vector.shape_cast %135 : vector<1x128xf32> to vector<128xf32>
    %137 = vector.shape_cast %136 : vector<128xf32> to vector<1x128xf32>
    %cst_36 = arith.constant 0.000000e+00 : f32
    %138 = vector.broadcast %cst_36 : f32 to vector<1x128xf32>
    %139 = arith.cmpf one, %137, %138 : vector<1x128xf32>
    %140 = vector.shape_cast %139 : vector<1x128xi1> to vector<1x1x128xi1>
    %141 = vector.shape_cast %140 : vector<1x1x128xi1> to vector<1x1x128xi1>
    %142 = vector.broadcast %141 : vector<1x1x128xi1> to vector<8x8x128xi1>
    %143 = arith.select %142, %134, %70 : vector<8x8x128xi1>, vector<8x8x128xf32>
    %144 = math.log %130 : vector<8x128xf32>
    %145 = vector.shape_cast %139 : vector<1x128xi1> to vector<1x128xi1>
    %146 = vector.broadcast %145 : vector<1x128xi1> to vector<8x128xi1>
    %147 = arith.select %146, %144, %71 : vector<8x128xi1>, vector<8x128xf32>
    %148 = vector.extract_strided_slice %55 {offsets = [0, 0, 0], sizes = [1, 3, 128], strides = [1, 1, 1]} : vector<2x3x128xf32> to vector<1x3x128xf32>
    %149 = vector.shape_cast %148 : vector<1x3x128xf32> to vector<3x128xf32>
    %150 = vector.extract_strided_slice %24 {offsets = [0, 0, 0, 0], sizes = [1, 8, 8, 8], strides = [1, 1, 1, 1]} : vector<3x8x8x8xf32> to vector<1x8x8x8xf32>
    %151 = vector.shape_cast %150 : vector<1x8x8x8xf32> to vector<8x8x8xf32>
    %152 = vector.shape_cast %151 : vector<8x8x8xf32> to vector<8x8x8x1xf32>
    %153 = vector.shape_cast %143 : vector<8x8x128xf32> to vector<1x8x8x128xf32>
    %154 = vector.broadcast %152 : vector<8x8x8x1xf32> to vector<8x8x8x128xf32>
    %155 = vector.broadcast %153 : vector<1x8x8x128xf32> to vector<8x8x8x128xf32>
    %156 = arith.mulf %154, %155 : vector<8x8x8x128xf32>
    %cst_37 = arith.constant dense<0.000000e+00> : vector<8x8x128xf32>
    %157 = vector.multi_reduction <add>, %156, %cst_37 [1] : vector<8x8x8x128xf32> to vector<8x8x128xf32>
    %158 = vector.extract_strided_slice %149 {offsets = [0, 0], sizes = [1, 128], strides = [1, 1]} : vector<3x128xf32> to vector<1x128xf32>
    %159 = vector.shape_cast %158 : vector<1x128xf32> to vector<128xf32>
    %160 = vector.shape_cast %159 : vector<128xf32> to vector<1x1x128xf32>
    %161 = vector.broadcast %160 : vector<1x1x128xf32> to vector<8x8x128xf32>
    %162 = arith.mulf %157, %161 : vector<8x8x128xf32>
    %163 = vector.extract_strided_slice %24 {offsets = [1, 0, 0, 0], sizes = [1, 8, 8, 8], strides = [1, 1, 1, 1]} : vector<3x8x8x8xf32> to vector<1x8x8x8xf32>
    %164 = vector.shape_cast %163 : vector<1x8x8x8xf32> to vector<8x8x8xf32>
    %165 = vector.shape_cast %164 : vector<8x8x8xf32> to vector<8x8x8x1xf32>
    %166 = vector.shape_cast %143 : vector<8x8x128xf32> to vector<1x8x8x128xf32>
    %167 = vector.broadcast %165 : vector<8x8x8x1xf32> to vector<8x8x8x128xf32>
    %168 = vector.broadcast %166 : vector<1x8x8x128xf32> to vector<8x8x8x128xf32>
    %169 = arith.mulf %167, %168 : vector<8x8x8x128xf32>
    %cst_38 = arith.constant dense<0.000000e+00> : vector<8x8x128xf32>
    %170 = vector.multi_reduction <add>, %169, %cst_38 [1] : vector<8x8x8x128xf32> to vector<8x8x128xf32>
    %171 = vector.extract_strided_slice %149 {offsets = [1, 0], sizes = [1, 128], strides = [1, 1]} : vector<3x128xf32> to vector<1x128xf32>
    %172 = vector.shape_cast %171 : vector<1x128xf32> to vector<128xf32>
    %173 = vector.shape_cast %172 : vector<128xf32> to vector<1x1x128xf32>
    %174 = vector.broadcast %173 : vector<1x1x128xf32> to vector<8x8x128xf32>
    %175 = arith.mulf %170, %174 : vector<8x8x128xf32>
    %176 = arith.addf %162, %175 : vector<8x8x128xf32>
    %177 = vector.extract_strided_slice %24 {offsets = [2, 0, 0, 0], sizes = [1, 8, 8, 8], strides = [1, 1, 1, 1]} : vector<3x8x8x8xf32> to vector<1x8x8x8xf32>
    %178 = vector.shape_cast %177 : vector<1x8x8x8xf32> to vector<8x8x8xf32>
    %179 = vector.shape_cast %178 : vector<8x8x8xf32> to vector<8x8x8x1xf32>
    %180 = vector.shape_cast %143 : vector<8x8x128xf32> to vector<1x8x8x128xf32>
    %181 = vector.broadcast %179 : vector<8x8x8x1xf32> to vector<8x8x8x128xf32>
    %182 = vector.broadcast %180 : vector<1x8x8x128xf32> to vector<8x8x8x128xf32>
    %183 = arith.mulf %181, %182 : vector<8x8x8x128xf32>
    %cst_39 = arith.constant dense<0.000000e+00> : vector<8x8x128xf32>
    %184 = vector.multi_reduction <add>, %183, %cst_39 [1] : vector<8x8x8x128xf32> to vector<8x8x128xf32>
    %185 = vector.extract_strided_slice %149 {offsets = [2, 0], sizes = [1, 128], strides = [1, 1]} : vector<3x128xf32> to vector<1x128xf32>
    %186 = vector.shape_cast %185 : vector<1x128xf32> to vector<128xf32>
    %187 = vector.shape_cast %186 : vector<128xf32> to vector<1x1x128xf32>
    %188 = vector.broadcast %187 : vector<1x1x128xf32> to vector<8x8x128xf32>
    %189 = arith.mulf %184, %188 : vector<8x8x128xf32>
    %190 = arith.addf %176, %189 : vector<8x8x128xf32>
    %c0_40 = arith.constant 0 : index
    %c0_41 = arith.constant 0 : index
    %c0_42 = arith.constant 0 : index
    %191 = vector.load %arg6[%c0_40, %c0_41, %c0_42] : memref<2x128x128xf32, #tpu.memory_space<vmem>>, vector<1x128x128xf32>
    %192 = vector.shape_cast %191 : vector<1x128x128xf32> to vector<128x128xf32>
    %193 = vector.shape_cast %190 : vector<8x8x128xf32> to vector<64x128xf32>
    %cst_43 = arith.constant dense<0.000000e+00> : vector<64x128xf32>
    %194 = tpu.matmul %193, %192, %cst_43 {dimension_numbers = #tpu.dot_dimension_numbers<[1], [0], [0], [1], [0, 0, 1, 1], [], []>} : vector<64x128xf32>, vector<128x128xf32>, vector<64x128xf32> -> vector<64x128xf32>
    %195 = vector.shape_cast %194 : vector<64x128xf32> to vector<8x8x128xf32>
    %196 = arith.mulf %195, %50 : vector<8x8x128xf32>
    %cst_44 = arith.constant dense<0.000000e+00> : vector<8x128xf32>
    %197 = vector.multi_reduction <add>, %196, %cst_44 [0] : vector<8x8x128xf32> to vector<8x128xf32>
    %198 = vector.extract_strided_slice %56 {offsets = [0, 0], sizes = [1, 128], strides = [1, 1]} : vector<2x128xf32> to vector<1x128xf32>
    %199 = vector.shape_cast %198 : vector<1x128xf32> to vector<128xf32>
    %200 = vector.shape_cast %199 : vector<128xf32> to vector<1x128xf32>
    %cst_45 = arith.constant 0.000000e+00 : f32
    %201 = vector.broadcast %cst_45 : f32 to vector<1x128xf32>
    %202 = arith.cmpf one, %200, %201 : vector<1x128xf32>
    %203 = math.log %197 : vector<8x128xf32>
    %204 = vector.shape_cast %202 : vector<1x128xi1> to vector<1x128xi1>
    %205 = vector.broadcast %204 : vector<1x128xi1> to vector<8x128xi1>
    %206 = arith.select %205, %203, %62 : vector<8x128xi1>, vector<8x128xf32>
    %cst_46 = arith.constant 0.000000e+00 : f32
    %207 = vector.broadcast %cst_46 : f32 to vector<8x128xf32>
    %208 = vector.extract_strided_slice %57 {offsets = [0, 0], sizes = [1, 128], strides = [1, 1]} : vector<3x128xf32> to vector<1x128xf32>
    %209 = vector.shape_cast %208 : vector<1x128xf32> to vector<128xf32>
    %210 = vector.shape_cast %209 : vector<128xf32> to vector<1x128xf32>
    %cst_47 = arith.constant 0.000000e+00 : f32
    %211 = vector.broadcast %cst_47 : f32 to vector<1x128xf32>
    %212 = arith.cmpf one, %210, %211 : vector<1x128xf32>
    %cst_48 = arith.constant 0.000000e+00 : f32
    %213 = vector.shape_cast %212 : vector<1x128xi1> to vector<1x128xi1>
    %214 = vector.broadcast %213 : vector<1x128xi1> to vector<8x128xi1>
    %215 = vector.broadcast %cst_48 : f32 to vector<8x128xf32>
    %216 = arith.select %214, %206, %215 : vector<8x128xi1>, vector<8x128xf32>
    %c0_49 = arith.constant 0 : index
    %c0_50 = arith.constant 0 : index
    %c0_51 = arith.constant 0 : index
    %217 = vector.load %arg10[%c0_49, %c0_50, %c0_51] : memref<3x128x128xf32, #tpu.memory_space<vmem>>, vector<1x128x128xf32>
    %218 = vector.shape_cast %217 : vector<1x128x128xf32> to vector<128x128xf32>
    %cst_52 = arith.constant dense<0.000000e+00> : vector<8x128xf32>
    %219 = tpu.matmul %216, %218, %cst_52 {dimension_numbers = #tpu.dot_dimension_numbers<[1], [0], [0], [1], [0, 0, 1, 1], [], []>} : vector<8x128xf32>, vector<128x128xf32>, vector<8x128xf32> -> vector<8x128xf32>
    %220 = arith.addf %207, %219 : vector<8x128xf32>
    %221 = vector.extract_strided_slice %57 {offsets = [1, 0], sizes = [1, 128], strides = [1, 1]} : vector<3x128xf32> to vector<1x128xf32>
    %222 = vector.shape_cast %221 : vector<1x128xf32> to vector<128xf32>
    %223 = vector.shape_cast %222 : vector<128xf32> to vector<1x128xf32>
    %cst_53 = arith.constant 0.000000e+00 : f32
    %224 = vector.broadcast %cst_53 : f32 to vector<1x128xf32>
    %225 = arith.cmpf one, %223, %224 : vector<1x128xf32>
    %cst_54 = arith.constant 0.000000e+00 : f32
    %226 = vector.shape_cast %225 : vector<1x128xi1> to vector<1x128xi1>
    %227 = vector.broadcast %226 : vector<1x128xi1> to vector<8x128xi1>
    %228 = vector.broadcast %cst_54 : f32 to vector<8x128xf32>
    %229 = arith.select %227, %147, %228 : vector<8x128xi1>, vector<8x128xf32>
    %c1_55 = arith.constant 1 : index
    %c0_56 = arith.constant 0 : index
    %c0_57 = arith.constant 0 : index
    %230 = vector.load %arg10[%c1_55, %c0_56, %c0_57] : memref<3x128x128xf32, #tpu.memory_space<vmem>>, vector<1x128x128xf32>
    %231 = vector.shape_cast %230 : vector<1x128x128xf32> to vector<128x128xf32>
    %cst_58 = arith.constant dense<0.000000e+00> : vector<8x128xf32>
    %232 = tpu.matmul %229, %231, %cst_58 {dimension_numbers = #tpu.dot_dimension_numbers<[1], [0], [0], [1], [0, 0, 1, 1], [], []>} : vector<8x128xf32>, vector<128x128xf32>, vector<8x128xf32> -> vector<8x128xf32>
    %233 = arith.addf %220, %232 : vector<8x128xf32>
    %234 = vector.extract_strided_slice %57 {offsets = [2, 0], sizes = [1, 128], strides = [1, 1]} : vector<3x128xf32> to vector<1x128xf32>
    %235 = vector.shape_cast %234 : vector<1x128xf32> to vector<128xf32>
    %236 = vector.shape_cast %235 : vector<128xf32> to vector<1x128xf32>
    %cst_59 = arith.constant 0.000000e+00 : f32
    %237 = vector.broadcast %cst_59 : f32 to vector<1x128xf32>
    %238 = arith.cmpf one, %236, %237 : vector<1x128xf32>
    %cst_60 = arith.constant 0.000000e+00 : f32
    %239 = vector.shape_cast %238 : vector<1x128xi1> to vector<1x128xi1>
    %240 = vector.broadcast %239 : vector<1x128xi1> to vector<8x128xi1>
    %241 = vector.broadcast %cst_60 : f32 to vector<8x128xf32>
    %242 = arith.select %240, %80, %241 : vector<8x128xi1>, vector<8x128xf32>
    %c2 = arith.constant 2 : index
    %c0_61 = arith.constant 0 : index
    %c0_62 = arith.constant 0 : index
    %243 = vector.load %arg10[%c2, %c0_61, %c0_62] : memref<3x128x128xf32, #tpu.memory_space<vmem>>, vector<1x128x128xf32>
    %244 = vector.shape_cast %243 : vector<1x128x128xf32> to vector<128x128xf32>
    %cst_63 = arith.constant dense<0.000000e+00> : vector<8x128xf32>
    %245 = tpu.matmul %242, %244, %cst_63 {dimension_numbers = #tpu.dot_dimension_numbers<[1], [0], [0], [1], [0, 0, 1, 1], [], []>} : vector<8x128xf32>, vector<128x128xf32>, vector<8x128xf32> -> vector<8x128xf32>
    %246 = arith.addf %233, %245 : vector<8x128xf32>
    %c0_64 = arith.constant 0 : index
    %c0_65 = arith.constant 0 : index
    %247 = vector.load %arg11[%c0_64, %c0_65] : memref<8x128xf32, #tpu.memory_space<vmem>>, vector<8x128xf32>
    tpu.vector_store %arg11[%c0_64, %c0_65], %246 {strides = array<i32>} : memref<8x128xf32, #tpu.memory_space<vmem>>, vector<8x128xf32>,
    return
  }
  func.func @transform_0(%arg0: i32) -> (i32, i32, i32, i32) {
    %c0_i32 = arith.constant 0 : i32
    %c0_i32_0 = arith.constant 0 : i32
    %c0_i32_1 = arith.constant 0 : i32
    %c0_i32_2 = arith.constant 0 : i32
    %c0_i32_3 = arith.constant 0 : i32
    return %c0_i32, %c0_i32_0, %c0_i32_1, %c0_i32_2 : i32, i32, i32, i32
  }
  func.func @transform_1(%arg0: i32) -> (i32, i32) {
    %c0_i32 = arith.constant 0 : i32
    %c0_i32_0 = arith.constant 0 : i32
    %c0_i32_1 = arith.constant 0 : i32
    return %c0_i32, %c0_i32_0 : i32, i32
  }
  func.func @transform_2(%arg0: i32) -> (i32, i32) {
    %c0_i32 = arith.constant 0 : i32
    %c0_i32_0 = arith.constant 0 : i32
    %c0_i32_1 = arith.constant 0 : i32
    return %c0_i32, %c0_i32_0 : i32, i32
  }
  func.func @transform_3(%arg0: i32) -> (i32, i32) {
    %c0_i32 = arith.constant 0 : i32
    %c0_i32_0 = arith.constant 0 : i32
    %c0_i32_1 = arith.constant 0 : i32
    return %c0_i32, %c0_i32_0 : i32, i32
  }
  func.func @transform_4(%arg0: i32) -> (i32, i32) {
    %c0_i32 = arith.constant 0 : i32
    %c0_i32_0 = arith.constant 0 : i32
    %c0_i32_1 = arith.constant 0 : i32
    return %c0_i32, %c0_i32_0 : i32, i32
  }
  func.func @transform_5(%arg0: i32) -> (i32, i32, i32) {
    %c0_i32 = arith.constant 0 : i32
    %c0_i32_0 = arith.constant 0 : i32
    %c0_i32_1 = arith.constant 0 : i32
    %c0_i32_2 = arith.constant 0 : i32
    return %c0_i32, %c0_i32_0, %c0_i32_1 : i32, i32, i32
  }
  func.func @transform_6(%arg0: i32) -> (i32, i32, i32) {
    %c0_i32 = arith.constant 0 : i32
    %c0_i32_0 = arith.constant 0 : i32
    %c0_i32_1 = arith.constant 0 : i32
    %c0_i32_2 = arith.constant 0 : i32
    return %c0_i32, %c0_i32_0, %c0_i32_1 : i32, i32, i32
  }
  func.func @transform_7(%arg0: i32) -> (i32, i32) {
    %c0_i32 = arith.constant 0 : i32
    %c0_i32_0 = arith.constant 0 : i32
    %c0_i32_1 = arith.constant 0 : i32
    return %c0_i32, %c0_i32_0 : i32, i32
  }
  func.func @transform_8(%arg0: i32) -> (i32, i32) {
    %c0_i32 = arith.constant 0 : i32
    %c0_i32_0 = arith.constant 0 : i32
    %c0_i32_1 = arith.constant 0 : i32
    return %c0_i32, %c0_i32_0 : i32, i32
  }
  func.func @transform_9(%arg0: i32) -> (i32, i32, i32) {
    %c0_i32 = arith.constant 0 : i32
    %c0_i32_0 = arith.constant 0 : i32
    %c0_i32_1 = arith.constant 0 : i32
    %c0_i32_2 = arith.constant 0 : i32
    return %c0_i32, %c0_i32_0, %c0_i32_1 : i32, i32, i32
  }
  func.func @transform_10(%arg0: i32) -> (i32, i32) {
    %c0_i32 = arith.constant 0 : i32
    %c0_i32_0 = arith.constant 0 : i32
    %c0_i32_1 = arith.constant 0 : i32
    return %c0_i32, %c0_i32_0 : i32, i32
  }
}

</mosaic_0001>

<bundles_post_ra>
// kernel: tpu_custom_call.1
= control target key start
LH: loop header
LB: loop body
LE: loop exit
PB: predicated region body
PF: predicated region fallthrough
CT: control target
= control target key end

     0   :  { %15 = vsyncpa [#allocation3], 0  ;;  %s6995_s0 = inlined_call_operand.hbm [shape: f32[3,8,8,8], index: 0, kind: input, shape index: {}]   ;;  %s6996_s1 = inlined_call_operand.vmem [shape: f32[64,16], index: 1, kind: input, shape index: {}]   ;;  %s6997_s2 = inlined_call_operand.vmem [shape: f32[8,8], index: 2, kind: input, shape index: {}]   ;;  %s6998_s3 = inlined_call_operand.vmem [shape: f32[3,8], index: 3, kind: input, shape index: {}]   ;;  %s6999_s4 = inlined_call_operand.vmem [shape: f32[16,384], index: 4, kind: input, shape index: {}]   ;;  %s7000_s5 = inlined_call_operand.hbm [shape: f32[2,128,128], index: 5, kind: input, shape index: {}]   ;;  %s7001_s6 = inlined_call_operand.vmem [shape: f32[2,3,128], index: 6, kind: input, shape index: {}]   ;;  %s7002_s7 = inlined_call_operand.vmem [shape: f32[2,128], index: 7, kind: input, shape index: {}]   ;;  %s7003_s8 = inlined_call_operand.vmem [shape: f32[3,128], index: 8, kind: input, shape index: {}]   ;;  %s7004_s9 = inlined_call_operand.hbm [shape: f32[3,128,128], index: 9, kind: input, shape index: {}]   ;;  %s7005_s10 = inlined_call_operand.hbm [shape: f32[8,128], index: 10, kind: output, shape index: {}]  }
   0x1   :  { %16 = vsyncpa [#allocation6], 0 }
   0x2   :  { %17 = vsyncpa [#allocation4], 0  ;;  %s4343_s13 = smov [#allocation5]   ;;  %s4344_s15 = smov [#allocation2]  }
   0x3   :  { %s43_s14 = sshll.u32 %s4343_s13, 4  ;;  %s23_s16 = sshll.u32 %s4344_s15, 4  ;;  %s44_s14 = int_to_ptr.vmem [resolvable:$true] %s43_s14  ;;  %s4409_s16 = int_to_ptr.vmem [resolvable:$true] %s23_s16 }
   0x4   :  { %s4249_s19 = scalar_lea.hbm %s7000_s5, 4096 }
   0x5   :  { %p4250_p0 = scmp.ne.s32.totalorder %s7000_s5, %s4249_s19  ;;  %p4253_p1 = scmp.lt.u32.totalorder %s4249_s19, %s7000_s5 }
   0x7   :  { %p4255_p2 = pnand %p4253_p1, %p4250_p0 }
   0x9   :  { %4258 = shalt.err (!%p4255_p2)
}
   0xa   :  { %s4259_s24 = scalar_lea.vmem %s44_s14, 4096  ;;  %p4264_p4 = scmp.lt.s32.totalorder %s44_s14, %s44_s14 }
   0xb   :  { %p4260_p3 = scmp.ne.s32.totalorder %s44_s14, %s4259_s24  ;;  %p4265_p5 = scmp.lt.s32.totalorder %s4259_s24, %s4259_s24 }
   0xd   :  { %p4266_p6 = por %p4265_p5, %p4264_p4 }
   0xf   :  { %p4267_p7 = pnand %p4266_p6, %p4260_p3 }
  0x11   :  { %4270 = shalt.err (!%p4267_p7)
}
  0x12   :  { %s4345_s25 = smov 128   ;;  %s4346_s26 = smov 8  }
  0x13   :  { %49 = dma.hbm_to_vmem [thread:$0]  %s7000_s5, 4096, %s44_s14, [#allocation6], %s4345_s25, %s4345_s25, %s4346_s26  }
  0x14   :  { %s4271_s11 = scalar_lea.hbm %s6995_s0, 3072 }
  0x15   :  { %p4272_p8 = scmp.ne.s32.totalorder %s6995_s0, %s4271_s11  ;;  %p4275_p9 = scmp.lt.u32.totalorder %s4271_s11, %s6995_s0 }
  0x17   :  { %p4277_p10 = pnand %p4275_p9, %p4272_p8 }
  0x19   :  { %4280 = shalt.err (!%p4277_p10)
}
  0x1a   :  { %s4281_s18 = scalar_lea.vmem %s4409_s16, 3072  ;;  %p4286_p12 = scmp.lt.s32.totalorder %s4409_s16, %s4409_s16 }
  0x1b   :  { %p4282_p11 = scmp.ne.s32.totalorder %s4409_s16, %s4281_s18  ;;  %p4287_p13 = scmp.lt.s32.totalorder %s4281_s18, %s4281_s18 }
  0x1d   :  { %p4288_p0 = por %p4287_p13, %p4286_p12 }
  0x1f   :  { %p4289_p1 = pnand %p4288_p0, %p4282_p11 }
  0x21   :  { %4292 = shalt.err (!%p4289_p1)
}
  0x22   :  { %29 = dma.hbm_to_vmem [thread:$0]  %s6995_s0, 3072, %s4409_s16, [#allocation3], %s4345_s25, %s4345_s25, %s4346_s26  }
  0x23   :  { %s4347_s19 = smov [#allocation7]   ;;  %s4293_s23 = scalar_lea.hbm %s7004_s9, 6144 }
  0x24   :  { %s61_s20 = sshll.u32 %s4347_s19, 4  ;;  %p4294_p2 = scmp.ne.s32.totalorder %s7004_s9, %s4293_s23  ;;  %s62_s20 = int_to_ptr.vmem [resolvable:$true] %s61_s20 }
  0x25   :  { %p4297_p3 = scmp.lt.u32.totalorder %s4293_s23, %s7004_s9 }
  0x27   :  { %p4299_p4 = pnand %p4297_p3, %p4294_p2 }
  0x29   :  { %4302 = shalt.err (!%p4299_p4)
}
  0x2a   :  { %s4303_s30 = scalar_lea.vmem %s62_s20, 6144  ;;  %p4308_p6 = scmp.lt.s32.totalorder %s62_s20, %s62_s20 }
  0x2b   :  { %p4304_p5 = scmp.ne.s32.totalorder %s62_s20, %s4303_s30  ;;  %p4309_p7 = scmp.lt.s32.totalorder %s4303_s30, %s4303_s30 }
  0x2d   :  { %p4310_p8 = por %p4309_p7, %p4308_p6 }
  0x2f   :  { %p4311_p9 = pnand %p4310_p8, %p4304_p5 }
  0x31   :  { %4314 = shalt.err (!%p4311_p9)
}
  0x32   :  { %67 = dma.hbm_to_vmem [thread:$0]  %s7004_s9, 6144, %s62_s20, [#allocation6], %s4345_s25, %s4345_s25, %s4346_s26  }
  0x33   :  { %4337 = dma.done.wait [#allocation3], 3072  }
  0x34   :  { %4338 = vsyncadd [#allocation3], 4294964224 }
  0x35   :  { %4339 = dma.done.wait [#allocation6], 10240  }
  0x36   :  { %4340 = vsyncadd [#allocation6], 4294957056  ;;  %vm383_vm0 = vcmask 130048   ;;  %v4464_v0 = vld [vmem:[%s6996_s1 + $0x10] sm:$0xff]  ;;  %v4469_v1 = vld [vmem:[%s6996_s1 + $0x18] sm:$0xff]  ;;  %vm101_vm1 = vcmask 64512  }
  0x37   :  { %v4474_v2 = vld [vmem:[%s6996_s1 + $0x28] sm:$0xff]  ;;  %v390_v3 = vsel %vm383_vm0, %v4464_v0, -inf  ;;  %v4481_v4 = vld [vmem:[%s6996_s1] sm:$0xff]  ;;  %v393_v6 = vsel %vm383_vm0, %v4469_v1, -inf  ;;  %vm292_vm2 = vcmask 59392   ;;  %v4514_v16 = vld [vmem:[#allocation2 + $0x10] sm:$0xff] }
  0x38   :  { %v4486_v5 = vld [vmem:[%s6996_s1 + $0x8] sm:$0xff]  ;;  %391 = vmax.xlane.f32.xlu1 %v390_v3  ;;  %v399_v7 = vsel %vm383_vm0, %v4474_v2, -inf  ;;  %v384_v8 = vsel %vm383_vm0, %v4481_v4, -inf  ;;  %v4497_v9 = vld [vmem:[%s6996_s1 + $0x20] sm:$0xff]  ;;  %v4516_v18 = vld [vmem:[#allocation2 + $0x18] sm:$0xff]  ;;  %v104_v25 = vsel %vm101_vm1, %v4514_v16, -inf }
  0x39   :  { %v4502_v10 = vld [vmem:[%s6997_s2] sm:$0xff]  ;;  %385 = vmax.xlane.f32.xlu0 %v384_v8  ;;  %v387_v11 = vsel %vm383_vm0, %v4486_v5, -inf  ;;  %v396_v12 = vsel %vm383_vm0, %v4497_v9, -inf  ;;  %v4512_v15 = vld [vmem:[#allocation2 + $0x8] sm:$0xff]  ;;  %v4526_v23 = vld [vmem:[#allocation2 + $0x30] sm:$0xff]  ;;  %v106_v26 = vsel %vm101_vm1, %v4516_v18, -inf }
  0x3a   :  { %v473_v13 = vsel %vm101_vm1, %v4502_v10, -inf  ;;  %v4510_v14 = vld [vmem:[#allocation2] sm:$0xff]  ;;  %v4520_v20 = vld [vmem:[#allocation2 + $0x28] sm:$0xff]  ;;  %v103_v22 = vsel %vm101_vm1, %v4512_v15, -inf  ;;  %v4528_v24 = vld [vmem:[#allocation2 + $0x38] sm:$0xff]  ;;  %v112_v32 = vsel %vm101_vm1, %v4526_v23, -inf }
  0x3b   :  { %v474_v17 = vrot.slane %v473_v13, 4  ;;  %v4518_v19 = vld [vmem:[#allocation2 + $0x20] sm:$0xff]  ;;  %v102_v21 = vsel %vm101_vm1, %v4510_v14, -inf  ;;  %v110_v28 = vsel %vm101_vm1, %v4520_v20, -inf  ;;  %v107_v31 = vmax.f32 %v103_v22, %v106_v26  ;;  %v4547_v35 = vld [vmem:[#allocation2 + $0x48] sm:$0xff]  ;;  %v4553_v38 = vld [vmem:[#allocation2 + $0x50] sm:$0xff] }
  0x3c   :  { %v108_v27 = vsel %vm101_vm1, %v4518_v19, -inf  ;;  %394 = vmax.xlane.f32.xlu1 %v393_v6  ;;  %v105_v30 = vmax.f32 %v102_v21, %v104_v25  ;;  %v4543_v33 = vld [vmem:[%s6998_s3] sm:$0x7]  ;;  %v114_v36 = vsel %vm101_vm1, %v4528_v24, -inf  ;;  %v4555_v39 = vld [vmem:[#allocation2 + $0x58] sm:$0xff]  ;;  %v4566_v47 = vld [vmem:[#allocation2 + $0x68] sm:$0xff] }
  0x3d   :  { %v475_v29 = vmax.f32 %v473_v13, %v474_v17  ;;  %v4545_v34 = vld [vmem:[#allocation2 + $0x40] sm:$0xff]  ;;  %388 = vmax.xlane.f32.xlu0 %v387_v11  ;;  %v293_v37 = vsel %vm292_vm2, %v4543_v33, -inf  ;;  %v4564_v42 = vld [vmem:[%s6996_s1 + $0x38] sm:$0xff]  ;;  %v111_v45 = vmax.f32 %v107_v31, %v110_v28  ;;  %v4571_v48 = vld [vmem:[%s6996_s1 + $0x30] sm:$0xff]  ;;  %v118_v50 = vsel %vm101_vm1, %v4547_v35, -inf }
  0x3e   :  { %v4557_v40 = vld [vmem:[#allocation2 + $0x60] sm:$0xff]  ;;  %v117_v41 = vsel %vm101_vm1, %v4545_v34, -inf  ;;  %v109_v44 = vmax.f32 %v105_v30, %v108_v27  ;;  %v294_v46 = vrot.slane %v293_v37, 4  ;;  %v4573_v49 = vld [vmem:[#allocation2 + $0x70] sm:$0xff]  ;;  %v119_v51 = vsel %vm101_vm1, %v4553_v38, -inf  ;;  %v4583_v58 = vld [vmem:[#allocation2 + $0x78] sm:$0xff] }
  0x3f   :  { %v476_v43 = vrot.slane %v475_v29, 2  ;;  %v121_v52 = vsel %vm101_vm1, %v4555_v39, -inf  ;;  %v123_v53 = vsel %vm101_vm1, %v4557_v40, -inf  ;;  %v115_v56 = vmax.f32 %v111_v45, %v114_v36  ;;  %v4593_v8 = vld [vmem:[#allocation2 + $0x80] sm:$0xff]  ;;  %v4597_v21 = vld [vmem:[#allocation2 + $0x88] sm:$0xff] }
  0x40   :  { %400 = vmax.xlane.f32.xlu1 %v399_v7  ;;  %v113_v55 = vmax.f32 %v109_v44, %v112_v32  ;;  %v295_v57 = vmax.f32 %v293_v37, %v294_v46  ;;  %v405_v59 = vsel %vm383_vm0, %v4564_v42, -inf  ;;  %v120_v60 = vmax.f32 %v117_v41, %v119_v51 }
  0x41   :  { %v477_v54 = vmax.f32 %v475_v29, %v476_v43  ;;  %397 = vmax.xlane.f32.xlu0 %v396_v12  ;;  %v122_v61 = vmax.f32 %v118_v50, %v121_v52  ;;  %v125_v62 = vsel %vm101_vm1, %v4566_v47, -inf  ;;  %v402_v63 = vsel %vm383_vm0, %v4571_v48, -inf  ;;  %v4612_v43 = vld [vmem:[#allocation2 + $0x90] sm:$0xff]  ;;  %v4616_v52 = vld [vmem:[#allocation2 + $0xa0] sm:$0xff] }
  0x42   :  { %v116_v6 = vmax.f32 %v113_v55, %v115_v56  ;;  %v127_v7 = vsel %vm101_vm1, %v4573_v49, -inf  ;;  %v296_v11 = vrot.slane %v295_v57, 2  ;;  %v124_v13 = vmax.f32 %v120_v60, %v123_v53 }
  0x43   :  { %v478_v3 = vrot.slane %v477_v54, 1  ;;  %v126_v17 = vmax.f32 %v122_v61, %v125_v62  ;;  %v129_v12 = vsel %vm101_vm1, %v4583_v58, -inf  ;;  %v132_v31 = vsel %vm101_vm1, %v4593_v8, -inf }
  0x44   :  { %406 = vmax.xlane.f32.xlu1 %v405_v59  ;;  %v147_v25 = vsub.f32 %v4510_v14, %v116_v6  ;;  %v148_v26 = vsub.f32 %v4512_v15, %v116_v6  ;;  %v149_v27 = vsub.f32 %v4514_v16, %v116_v6  ;;  %v150_v28 = vsub.f32 %v4516_v18, %v116_v6 }
  0x45   :  { %v479_v22 = vmax.f32 %v477_v54, %v478_v3  ;;  %403 = vmax.xlane.f32.xlu0 %v402_v63  ;;  %v151_v29 = vsub.f32 %v4518_v19, %v116_v6  ;;  %v152_v30 = vsub.f32 %v4520_v20, %v116_v6  ;;  %v133_v14 = vsel %vm101_vm1, %v4597_v21, -inf  ;;  %v4614_v19 = vld [vmem:[#allocation2 + $0x98] sm:$0xff] }
  0x46   :  { %v171_v36 = vmul.f32 1.442695, %v147_v25  ;;  %v173_v37 = vmul.f32 1.442695, %v148_v26  ;;  %v153_v15 = vsub.f32 %v4526_v23, %v116_v6  ;;  %v154_v16 = vsub.f32 %v4528_v24, %v116_v6  ;;  %v4618_v23 = vld [vmem:[#allocation2 + $0xa8] sm:$0xff]  ;;  %v4638_v25 = vld [vmem:[#allocation2 + $0xb8] sm:$0xff] }
  0x47   :  { %v480_v32 = vsub.f32 %v4502_v10, %v479_v22  ;;  %v175_v41 = vmul.f32 1.442695, %v149_v27  ;;  %v297_v18 = vmax.f32 %v295_v57, %v296_v11  ;;  %v177_v44 = vmul.f32 1.442695, %v150_v28  ;;  %v4636_v22 = vld [vmem:[#allocation2 + $0xb0] sm:$0xff] }
  0x48   :  { %4139 = vpow2.f32 %v171_v36  ;;  %v179_v45 = vmul.f32 1.442695, %v151_v29  ;;  %v181_v10 = vmul.f32 1.442695, %v152_v30  ;;  %v128_v50 = vmax.f32 %v124_v13, %v127_v7 }
  0x49   :  { %v481_v20 = vmul.f32 1.442695, %v480_v32  ;;  %4141 = vpow2.f32 %v173_v37  ;;  %v298_v46 = vrot.slane %v297_v18, 1  ;;  %v130_v51 = vmax.f32 %v126_v17, %v129_v12 }
  0x4a   :  { %v134_v24 = vsel %vm101_vm1, %v4612_v43, -inf  ;;  %v136_v53 = vsel %vm101_vm1, %v4614_v19, -inf  ;;  %v183_v54 = vmul.f32 1.442695, %v153_v15  ;;  %v185_v55 = vmul.f32 1.442695, %v154_v16 }
  0x4b   :  { %4143 = vpow2.f32 %v481_v20  ;;  %v299_v56 = vmax.f32 %v297_v18, %v298_v46  ;;  %v131_v57 = vmax.f32 %v128_v50, %v130_v51  ;;  %v135_v59 = vmax.f32 %v132_v31, %v134_v24 }
  0x4c   :  { %4145 = vpow2.f32 %v175_v41  ;;  %v137_v60 = vmax.f32 %v133_v14, %v136_v53  ;;  %v138_v62 = vsel %vm101_vm1, %v4616_v52, -inf  ;;  %v140_v63 = vsel %vm101_vm1, %v4618_v23, -inf }
  0x4d   :  { %4147 = vpow2.f32 %v177_v44  ;;  %v300_v61 = vsub.f32 %v4543_v33, %v299_v56  ;;  %v155_v3 = vsub.f32 %v4545_v34, %v131_v57  ;;  %v156_v6 = vsub.f32 %v4547_v35, %v131_v57 }
  0x4e   :  { %4149 = vpow2.f32 %v179_v45  ;;  %v157_v7 = vsub.f32 %v4553_v38, %v131_v57  ;;  %v158_v13 = vsub.f32 %v4555_v39, %v131_v57  ;;  %v159_v17 = vsub.f32 %v4557_v40, %v131_v57 }
  0x4f   :  { %4151 = vpow2.f32 %v181_v10  ;;  %v301_v11 = vmul.f32 1.442695, %v300_v61  ;;  %v160_v33 = vsub.f32 %v4566_v47, %v131_v57  ;;  %v161_v12 = vsub.f32 %v4573_v49, %v131_v57 }
  0x50   :  { %4153 = vpow2.f32 %v183_v54  ;;  %v139_v34 = vmax.f32 %v135_v59, %v138_v62  ;;  %v187_v35 = vmul.f32 1.442695, %v155_v3  ;;  %v189_v26 = vmul.f32 1.442695, %v156_v6 }
  0x51   :  { %4155 = vpow2.f32 %v185_v55  ;;  %v191_v38 = vmul.f32 1.442695, %v157_v7  ;;  %v162_v39 = vsub.f32 %v4583_v58, %v131_v57  ;;  %v193_v28 = vmul.f32 1.442695, %v158_v13 }
  0x52   :  { %4157 = vpow2.f32 %v301_v11  ;;  %v4640_v27 = vpop.eup %4139  ;;  %v195_v40 = vmul.f32 1.442695, %v159_v17  ;;  %v141_v29 = vmax.f32 %v137_v60, %v140_v63  ;;  %v197_v49 = vmul.f32 1.442695, %v160_v33 }
  0x53   :  { %v4643_v30 = vpop.eup %4141  ;;  %v219_v47 = vsel %vm101_vm1, %v4640_v27, 0.0  ;;  %4159 = vpow2.f32 %v187_v35  ;;  %v199_v31 = vmul.f32 1.442695, %v161_v12  ;;  %v142_v58 = vsel %vm101_vm1, %v4636_v22, -inf }
  0x54   :  { %v220_v36 = vsel %vm101_vm1, %v4643_v30, 0.0  ;;  %4161 = vpow2.f32 %v189_v26  ;;  %v144_v37 = vsel %vm101_vm1, %v4638_v25, -inf  ;;  %v143_v41 = vmax.f32 %v139_v34, %v142_v58 }
  0x55   :  { %v4647_v32 = vpop.eup %4143  ;;  %v221_v16 = vadd.f32 %v220_v36, %v219_v47  ;;  %4163 = vpow2.f32 %v191_v38  ;;  %v145_v45 = vmax.f32 %v141_v29, %v144_v37  ;;  %v201_v51 = vmul.f32 1.442695, %v162_v39 }
  0x56   :  { %v4655_v14 = vpop.eup %4145  ;;  %v483_v15 = vsel %vm101_vm1, %v4647_v32, 0.0  ;;  %4165 = vpow2.f32 %v193_v28  ;;  %v316_v60 = vlaneseq  ;;  %vm4351_vm3 = vmmov 0  }
  0x57   :  { %v4659_v18 = vpop.eup %4147  ;;  %v484_v20 = vrot.slane %v483_v15, 4  ;;  %v222_v44 = vsel %vm101_vm1, %v4655_v14, 0.0  ;;  %4167 = vpow2.f32 %v195_v40  ;;  %v4671_v55 = vmax.f32 %v143_v41, %v145_v45 }
  0x58   :  { %v4663_v10 = vpop.eup %4149  ;;  %v223_v46 = vadd.f32 %v222_v44, %v221_v16  ;;  %v224_v50 = vsel %vm101_vm1, %v4659_v18, 0.0  ;;  %4169 = vpow2.f32 %v197_v49 }
  0x59   :  { %v4667_v24 = vpop.eup %4151  ;;  %v485_v53 = vadd.f32 %v484_v20, %v483_v15  ;;  %v226_v54 = vsel %vm101_vm1, %v4663_v10, 0.0  ;;  %v163_v62 = vsub.f32 %v4593_v8, %v4671_v55  ;;  %4171 = vpow2.f32 %v199_v31 }
  0x5a   :  { %v4673_v56 = vpop.eup %4153  ;;  %v225_v57 = vadd.f32 %v224_v50, %v223_v46  ;;  %v228_v6 = vsel %vm101_vm1, %v4667_v24, 0.0  ;;  %v164_v7 = vsub.f32 %v4597_v21, %v4671_v55  ;;  %4173 = vpow2.f32 %v201_v51 }
  0x5b   :  { %v4675_v59 = vpop.eup %4155  ;;  %v486_v61 = vrot.slane %v485_v53, 2  ;;  %v230_v13 = vsel %vm101_vm1, %v4673_v56, 0.0  ;;  %v165_v34 = vsub.f32 %v4612_v43, %v4671_v55  ;;  %v166_v21 = vsub.f32 %v4614_v19, %v4671_v55 }
  0x5c   :  { %v4679_v63 = vpop.eup %4157  ;;  %v227_v3 = vadd.f32 %v226_v54, %v225_v57  ;;  %v232_v8 = vsel %vm101_vm1, %v4675_v59, 0.0  ;;  %v167_v39 = vsub.f32 %v4616_v52, %v4671_v55  ;;  %v203_v28 = vmul.f32 1.442695, %v163_v62 }
  0x5d   :  { %v487_v11 = vadd.f32 %v486_v61, %v485_v53  ;;  %v303_v17 = vsel %vm292_vm2, %v4679_v63, 0.0  ;;  %v4689_v33 = vpop.eup %4159  ;;  %v205_v49 = vmul.f32 1.442695, %v164_v7  ;;  %v168_v16 = vsub.f32 %v4618_v23, %v4671_v55 }
  0x5e   :  { %v304_v12 = vrot.slane %v303_v17, 4  ;;  %v4697_v35 = vpop.eup %4161  ;;  %v234_v38 = vsel %vm101_vm1, %v4689_v33, 0.0  ;;  %v229_v29 = vadd.f32 %v228_v6, %v227_v3  ;;  %4175 = vpow2.f32 %v203_v28 }
  0x5f   :  { %v488_v26 = vrot.slane %v487_v11, 1  ;;  %v4703_v40 = vpop.eup %4163  ;;  %v235_v43 = vsel %vm101_vm1, %v4697_v35, 0.0  ;;  %4177 = vpow2.f32 %v205_v49  ;;  %v169_v44 = vsub.f32 %v4636_v22, %v4671_v55 }
  0x60   :  { %v305_v47 = vadd.f32 %v304_v12, %v303_v17  ;;  %v4707_v31 = vpop.eup %4165  ;;  %v236_v36 = vadd.f32 %v235_v43, %v234_v38  ;;  %v237_v58 = vsel %vm101_vm1, %v4703_v40, 0.0  ;;  %v207_v45 = vmul.f32 1.442695, %v165_v34 }
  0x61   :  { %v489_v19 = vadd.f32 %v488_v26, %v487_v11  ;;  %v4711_v37 = vpop.eup %4167  ;;  %v239_v15 = vsel %vm101_vm1, %v4707_v31, 0.0  ;;  %v231_v46 = vadd.f32 %v230_v13, %v229_v29  ;;  %v209_v53 = vmul.f32 1.442695, %v166_v21 }
  0x62   :  { %v306_v52 = vrot.slane %v305_v47, 2  ;;  %v4717_v41 = vpop.eup %4169  ;;  %v238_v20 = vadd.f32 %v237_v58, %v236_v36  ;;  %v241_v51 = vsel %vm101_vm1, %v4711_v37, 0.0  ;;  %v170_v57 = vsub.f32 %v4638_v25, %v4671_v55 }
  0x63   :  { %4179 = vrcp.f32 %v489_v19  ;;  %v211_v23 = vmul.f32 1.442695, %v167_v39  ;;  %v4725_v61 = vpop.eup %4171  ;;  %v243_v3 = vsel %vm101_vm1, %v4717_v41, 0.0  ;;  %v213_v22 = vmul.f32 1.442695, %v168_v16 }
  0x64   :  { %v307_v50 = vadd.f32 %v306_v52, %v305_v47  ;;  %v240_v54 = vadd.f32 %v239_v15, %v238_v20  ;;  %4181 = vpow2.f32 %v207_v45  ;;  %v4729_v6 = vpop.eup %4173  ;;  %v215_v11 = vmul.f32 1.442695, %v169_v44 }
  0x65   :  { %4183 = vpow2.f32 %v209_v53  ;;  %v4731_v13 = vshrl.u32 %v316_v60, 7  ;;  %v233_v17 = vadd.f32 %v232_v8, %v231_v46  ;;  %v217_v55 = vmul.f32 1.442695, %v170_v57 }
  0x66   :  { %v308_v62 = vrot.slane %v307_v50, 1  ;;  %v242_v7 = vadd.f32 %v241_v51, %v240_v54  ;;  %4185 = vpow2.f32 %v211_v23  ;;  %v245_v34 = vsel %vm101_vm1, %v4725_v61, 0.0 }
  0x67   :  { %4187 = vpow2.f32 %v213_v22  ;;  %v4348_v26 = vmov 1966171168   ;;  %v4740_v28 = vsub.s32 0, %v4731_v13  ;;  %v4743_v60 = vsub.s32 1, %v4731_v13 }
  0x68   :  { %v309_v12 = vadd.f32 %v308_v62, %v307_v50  ;;  %v244_v25 = vadd.f32 %v243_v3, %v242_v7  ;;  %v4735_v21 = vpop.eup %4175  ;;  %v314_v38 = vunpack.c.l.s4 %v4348_v26  ;;  %v4753_v19 = vsub.s32 2, %v4731_v13 }
  0x69   :  { %v4737_v39 = vpop.eup %4177  ;;  %7237 = vst [vmem:[#allocation12_spill] sm:$0xff] %v4740_v28  ;;  %7238 = vst [vmem:[#allocation13_spill] sm:$0xff] %v4743_v60  ;;  %v249_v8 = vsel %vm101_vm1, %v4735_v21, 0.0  ;;  %v4756_v36 = vsub.s32 4, %v4731_v13  ;;  %v247_v58 = vsel %vm101_vm1, %v4729_v6, 0.0  ;;  %v4771_v46 = vsub.s32 3, %v4731_v13 }
  0x6a   :  { %4189 = vrcp.f32 %v309_v12  ;;  %v246_v47 = vadd.f32 %v245_v34, %v244_v25  ;;  %v250_v43 = vsel %vm101_vm1, %v4737_v39, 0.0  ;;  %7239 = vst [vmem:[#allocation14_spill] sm:$0xff] %v4753_v19  ;;  %v315_v15 = vunpack.c.0.s8 %v314_v38 }
  0x6b   :  { %4191 = vpow2.f32 %v215_v11  ;;  %v251_v16 = vadd.f32 %v250_v43, %v249_v8  ;;  %v4774_v50 = vsub.s32 6, %v4731_v13  ;;  %v4799_v38 = vsub.s32 5, %v4731_v13 }
  0x6c   :  { %4193 = vrcp.f32 %v233_v17  ;;  %v248_v51 = vadd.f32 %v247_v58, %v246_v47  ;;  %v318_v3 = vsub.s32 %v315_v15, %v4731_v13 }
  0x6d   :  { %v4180_v29 = vpop.eup %4179  ;;  %4195 = vpow2.f32 %v217_v55 }
  0x6e   :  { %v4750_v49 = vmul.f32 %v4180_v29, %v4647_v32  ;;  %v4760_v52 = vpop.eup %4181  ;;  %4197 = vrcp.f32 %v248_v51  ;;  %v4814_v51 = vsub.s32 7, %v4731_v13 }
  0x6f   :  { %v4762_v20 = vpop.eup %4183  ;;  %v252_v57 = vsel %vm101_vm1, %v4760_v52, 0.0 }
  0x70   :  { %v754_v44 = vrot.slane %v4750_v49, %v4743_v60  ;;  %v747_v32 = vrot.slane %v4750_v49, %v4740_v28  ;;  %v4768_v45 = vpop.eup %4185  ;;  %v761_v53 = vrot.slane %v4750_v49, %v4753_v19  ;;  %v775_v54 = vrot.slane %v4750_v49, %v4756_v36 }
  0x71   :  { %v254_v23 = vsel %vm101_vm1, %v4762_v20, 0.0  ;;  %v4784_v62 = vpop.eup %4187  ;;  %v253_v22 = vadd.f32 %v252_v57, %v251_v16  ;;  %v256_v11 = vsel %vm101_vm1, %v4768_v45, 0.0  ;;  %v768_v34 = vrot.slane %v4750_v49, %v4771_v46 }
  0x72   :  { %756 = vbcast.lane.b32.xlu1 %v754_v44, 256  ;;  %749 = vbcast.lane.b32.xlu0 %v747_v32, 256  ;;  %v789_v26 = vrot.slane %v4750_v49, %v4774_v50  ;;  %v258_v8 = vsel %vm101_vm1, %v4784_v62, 0.0  ;;  %v782_v32 = vrot.slane %v4750_v49, %v4799_v38  ;;  %v796_v13 = vrot.slane %v4750_v49, %v4814_v51 }
  0x73   :  { %v255_v25 = vadd.f32 %v254_v23, %v253_v22 }
  0x74   :  { %v4190_v7 = vpop.eup %4189 }
  0x75   :  { %v4789_v17 = vpop.eup %4191  ;;  %v311_v12 = vmul.f32 %v4190_v7, %v4679_v63  ;;  %v257_v47 = vadd.f32 %v256_v11, %v255_v25 }
  0x76   :  { %7240 = vst [vmem:[#allocation15_spill] sm:$0xff] %v4789_v17  ;;  %v4792_v55 = vpop.eup %4193  ;;  %763 = vbcast.lane.b32.xlu1 %v761_v53, 256  ;;  %777 = vbcast.lane.b32.xlu0 %v775_v54, 256  ;;  %v260_v43 = vsel %vm101_vm1, %v4789_v17, 0.0 }
  0x77   :  { %v4803_v29 = vpop.eup %4195  ;;  %v319_v63 = vrot.slane %v311_v12, %v318_v3  ;;  %v267_v58 = vmul.f32 %v4792_v55, %v4640_v27  ;;  %v268_v16 = vmul.f32 %v4792_v55, %v4643_v30  ;;  %v259_v44 = vadd.f32 %v258_v8, %v257_v47 }
  0x78   :  { %7241 = vst [vmem:[#allocation16_spill] sm:$0xff] %v4803_v29  ;;  %v262_v54 = vsel %vm101_vm1, %v4803_v29, 0.0  ;;  %v4829_v11 = vpop.eup %4197 }
  0x79   :  { %v327_v15 = vrot.slane %v319_v63, %v318_v3  ;;  %v320_v53 = vcombine.high %v319_v63, %v319_v63  ;;  %v261_v27 = vadd.f32 %v260_v43, %v259_v44  ;;  %v276_v47 = vmul.f32 %v4829_v11, %v4697_v35 }
  0x7a   :  { %770 = vbcast.lane.b32.xlu1 %v768_v34, 256  ;;  %791 = vbcast.lane.b32.xlu0 %v789_v26, 256  ;;  %v275_v26 = vmul.f32 %v4829_v11, %v4689_v33 }
  0x7b   :  { %v4819_v57 = vrot.slane %v327_v15, %v4740_v28  ;;  %v263_v22 = vadd.f32 %v262_v54, %v261_v27  ;;  %v334_v7 = vrot.slane %v320_v53, %v318_v3  ;;  %v335_v43 = vcombine.high %v327_v15, %v327_v15 }
  0x7d   :  { %v4822_v23 = vmul.f32 %v4819_v57, %v267_v58  ;;  %v4825_v30 = vmul.f32 %v4819_v57, %v268_v16  ;;  %4199 = vrcp.f32 %v263_v22  ;;  %v4840_v49 = vrot.slane %v334_v7, %v4740_v28 }
  0x7e   :  { %784 = vbcast.lane.b32.xlu1 %v782_v32, 256  ;;  %v4865_v53 = vrot.slane %v335_v43, %v4740_v28 }
  0x7f   :  { %v872_v12 = vrot.slane %v4822_v23, %v4740_v28  ;;  %v928_v25 = vrot.slane %v4825_v30, %v4740_v28  ;;  %v879_v34 = vrot.slane %v4822_v23, %v4743_v60  ;;  %v886_v3 = vrot.slane %v4822_v23, %v4753_v19 }
  0x80   :  { %v935_v8 = vrot.slane %v4825_v30, %v4743_v60  ;;  %v4847_v63 = vmul.f32 %v4840_v49, %v275_v26  ;;  %v942_v33 = vrot.slane %v4825_v30, %v4753_v19  ;;  %v4856_v16 = vmul.f32 %v4840_v49, %v276_v47 }
  0x81   :  { %874 = vbcast.lane.b32.xlu0 %v872_v12, 256  ;;  %v893_v26 = vrot.slane %v4822_v23, %v4771_v46 }
  0x82   :  { %798 = vbcast.lane.b32.xlu1 %v796_v13, 256  ;;  %v1459_v58 = vrot.slane %v4847_v63, %v4743_v60  ;;  %v1452_v32 = vrot.slane %v4847_v63, %v4740_v28  ;;  %v1515_v15 = vrot.slane %v4856_v16, %v4743_v60  ;;  %v1508_v54 = vrot.slane %v4856_v16, %v4740_v28 }
  0x85   :  { %930 = vbcast.lane.b32.xlu0 %v928_v25, 256 }
  0x86   :  { %881 = vbcast.lane.b32.xlu1 %v879_v34, 256  ;;  %v1522_v34 = vrot.slane %v4856_v16, %v4753_v19 }
  0x87   :  { %v4858_v44 = vpop.eup %4199 }
  0x88   :  { %v283_v35 = vmul.f32 %v4858_v44, %v4735_v21  ;;  %v284_v22 = vmul.f32 %v4858_v44, %v4737_v39  ;;  %v1466_v21 = vrot.slane %v4847_v63, %v4753_v19  ;;  %v269_v39 = vmul.f32 %v4792_v55, %v4655_v14 }
  0x89   :  { %888 = vbcast.lane.b32.xlu0 %v886_v3, 256 }
  0x8a   :  { %937 = vbcast.lane.b32.xlu1 %v935_v8, 256  ;;  %v4872_v27 = vmul.f32 %v4865_v53, %v283_v35  ;;  %v4881_v7 = vmul.f32 %v4865_v53, %v284_v22  ;;  %v4894_v3 = vmul.f32 %v4819_v57, %v269_v39  ;;  %v277_v8 = vmul.f32 %v4829_v11, %v4703_v40 }
  0x8b   :  { %v270_v40 = vmul.f32 %v4792_v55, %v4659_v18  ;;  %v278_v18 = vmul.f32 %v4829_v11, %v4707_v31 }
  0x8c   :  { %v2040_v13 = vrot.slane %v4872_v27, %v4740_v28  ;;  %v2047_v12 = vrot.slane %v4872_v27, %v4743_v60  ;;  %v2096_v25 = vrot.slane %v4881_v7, %v4740_v28  ;;  %v2103_v47 = vrot.slane %v4881_v7, %v4743_v60 }
  0x8d   :  { %944 = vbcast.lane.b32.xlu0 %v942_v33, 256  ;;  %v991_v14 = vrot.slane %v4894_v3, %v4743_v60  ;;  %v4903_v33 = vmul.f32 %v4840_v49, %v277_v8  ;;  %v984_v43 = vrot.slane %v4894_v3, %v4740_v28  ;;  %v2054_v35 = vrot.slane %v4872_v27, %v4753_v19 }
  0x8e   :  { %1461 = vbcast.lane.b32.xlu1 %v1459_v58, 256  ;;  %v1480_v8 = vrot.slane %v4847_v63, %v4756_v36 }
  0x8f   :  { %v1564_v58 = vrot.slane %v4903_v33, %v4740_v28 }
  0x91   :  { %1454 = vbcast.lane.b32.xlu0 %v1452_v32, 256  ;;  %v1473_v32 = vrot.slane %v4847_v63, %v4771_v46 }
  0x92   :  { %1517 = vbcast.lane.b32.xlu1 %v1515_v15, 256  ;;  %v4916_v15 = vmul.f32 %v4819_v57, %v270_v40  ;;  %v1578_v40 = vrot.slane %v4903_v33, %v4753_v19 }
  0x94   :  { %v1040_v22 = vrot.slane %v4916_v15, %v4740_v28 }
  0x95   :  { %1510 = vbcast.lane.b32.xlu0 %v1508_v54, 256  ;;  %v1571_v54 = vrot.slane %v4903_v33, %v4743_v60 }
  0x96   :  { %1468 = vbcast.lane.b32.xlu1 %v1466_v21, 256  ;;  %v949_v21 = vrot.slane %v4825_v30, %v4771_v46 }
  0x99   :  { %2042 = vbcast.lane.b32.xlu0 %v2040_v13, 256  ;;  %v1529_v13 = vrot.slane %v4856_v16, %v4771_v46 }
  0x9a   :  { %2049 = vbcast.lane.b32.xlu1 %v2047_v12, 256  ;;  %v4929_v12 = vmul.f32 %v4840_v49, %v278_v18 }
  0x9c   :  { %v1627_v39 = vrot.slane %v4929_v12, %v4743_v60  ;;  %v1620_v31 = vrot.slane %v4929_v12, %v4740_v28 }
  0x9d   :  { %2098 = vbcast.lane.b32.xlu0 %v2096_v25, 256  ;;  %v1047_v25 = vrot.slane %v4916_v15, %v4743_v60 }
  0x9e   :  { %1524 = vbcast.lane.b32.xlu1 %v1522_v34, 256  ;;  %v900_v34 = vrot.slane %v4822_v23, %v4756_v36 }
  0xa1   :  { %895 = vbcast.lane.b32.xlu0 %v893_v26, 256  ;;  %v2110_v26 = vrot.slane %v4881_v7, %v4753_v19 }
  0xa2   :  { %2105 = vbcast.lane.b32.xlu1 %v2103_v47, 256  ;;  %v285_v47 = vmul.f32 %v4858_v44, %v4760_v52 }
  0xa5   :  { %993 = vbcast.lane.b32.xlu0 %v991_v14, 256  ;;  %v998_v14 = vrot.slane %v4894_v3, %v4753_v19 }
  0xa6   :  { %986 = vbcast.lane.b32.xlu1 %v984_v43, 256  ;;  %v2061_v43 = vrot.slane %v4872_v27, %v4771_v46 }
  0xa9   :  { %1566 = vbcast.lane.b32.xlu0 %v1564_v58, 256  ;;  %v4950_v58 = vmul.f32 %v4865_v53, %v285_v47  ;;  %v907_v47 = vrot.slane %v4822_v23, %v4799_v38 }
  0xaa   :  { %1475 = vbcast.lane.b32.xlu1 %v1473_v32, 256 }
  0xab   :  { %v2159_v32 = vrot.slane %v4950_v58, %v4743_v60  ;;  %v2152_v52 = vrot.slane %v4950_v58, %v4740_v28 }
  0xad   :  { %2056 = vbcast.lane.b32.xlu0 %v2054_v35, 256  ;;  %v1054_v35 = vrot.slane %v4916_v15, %v4753_v19 }
  0xae   :  { %1573 = vbcast.lane.b32.xlu1 %v1571_v54, 256  ;;  %v286_v54 = vmul.f32 %v4858_v44, %v4762_v20 }
  0xb1   :  { %1042 = vbcast.lane.b32.xlu0 %v1040_v22, 256  ;;  %v956_v22 = vrot.slane %v4825_v30, %v4756_v36 }
  0xb2   :  { %951 = vbcast.lane.b32.xlu1 %v949_v21, 256 }
  0xb5   :  { %1531 = vbcast.lane.b32.xlu0 %v1529_v13, 256  ;;  %v1634_v13 = vrot.slane %v4929_v12, %v4753_v19 }
  0xb6   :  { %1049 = vbcast.lane.b32.xlu1 %v1047_v25, 256  ;;  %v4967_v25 = vmul.f32 %v4865_v53, %v286_v54  ;;  %v1487_v54 = vrot.slane %v4847_v63, %v4799_v38 }
  0xb8   :  { %v2208_v20 = vrot.slane %v4967_v25, %v4740_v28 }
  0xb9   :  { %1629 = vbcast.lane.b32.xlu0 %v1627_v39, 256  ;;  %v1536_v39 = vrot.slane %v4856_v16, %v4756_v36 }
  0xba   :  { %1622 = vbcast.lane.b32.xlu1 %v1620_v31, 256  ;;  %v271_v31 = vmul.f32 %v4792_v55, %v4663_v10 }
  0xbd   :  { %902 = vbcast.lane.b32.xlu0 %v900_v34, 256  ;;  %v2117_v34 = vrot.slane %v4881_v7, %v4771_v46 }
  0xbe   :  { %2112 = vbcast.lane.b32.xlu1 %v2110_v26, 256 }
  0xc1   :  { %1482 = vbcast.lane.b32.xlu0 %v1480_v8, 256 }
  0xc2   :  { %1000 = vbcast.lane.b32.xlu1 %v998_v14, 256  ;;  %v4980_v14 = vmul.f32 %v4819_v57, %v271_v31  ;;  %v1585_v31 = vrot.slane %v4903_v33, %v4771_v46 }
  0xc4   :  { %v1096_v10 = vrot.slane %v4980_v14, %v4740_v28 }
  0xc5   :  { %2063 = vbcast.lane.b32.xlu0 %v2061_v43, 256  ;;  %v392_v18 = vpop.xlane.xlu1 %391  ;;  %v2215_v43 = vrot.slane %v4967_v25, %v4743_v60 }
  0xc6   :  { %1580 = vbcast.lane.b32.xlu1 %v1578_v40, 256  ;;  %v386_v21 = vpop.xlane.xlu0 %385 }
  0xc9   :  { %2161 = vbcast.lane.b32.xlu0 %v2159_v32, 256  ;;  %v395_v26 = vpop.xlane.xlu1 %394 }
  0xca   :  { %2154 = vbcast.lane.b32.xlu1 %v2152_v52, 256  ;;  %v389_v8 = vpop.xlane.xlu0 %388  ;;  %v279_v52 = vmul.f32 %v4829_v11, %v4711_v37 }
  0xcd   :  { %1056 = vbcast.lane.b32.xlu0 %v1054_v35, 256  ;;  %v401_v40 = vpop.xlane.xlu1 %400  ;;  %v1005_v35 = vrot.slane %v4894_v3, %v4771_v46 }
  0xce   :  { %958 = vbcast.lane.b32.xlu1 %v956_v22, 256  ;;  %v398_v32 = vpop.xlane.xlu0 %397  ;;  %v4993_v22 = vmul.f32 %v4840_v49, %v279_v52 }
  0xd0   :  { %v1676_v37 = vrot.slane %v4993_v22, %v4740_v28 }
  0xd1   :  { %1636 = vbcast.lane.b32.xlu0 %v1634_v13, 256  ;;  %v407_v13 = vpop.xlane.xlu1 %406 }
  0xd2   :  { %1538 = vbcast.lane.b32.xlu1 %v1536_v39, 256  ;;  %v1103_v39 = vrot.slane %v4980_v14, %v4743_v60 }
  0xd5   :  { %2210 = vbcast.lane.b32.xlu0 %v2208_v20, 256  ;;  %v404_v20 = vpop.xlane.xlu0 %403 }
  0xd6   :  { %2119 = vbcast.lane.b32.xlu1 %v2117_v34, 256 }
  0xd9   :  { %909 = vbcast.lane.b32.xlu0 %v907_v47, 256 }
  0xda   :  { %2217 = vbcast.lane.b32.xlu1 %v2215_v43, 256  ;;  %v2068_v43 = vrot.slane %v4872_v27, %v4756_v36 }
  0xdd   :  { %1098 = vbcast.lane.b32.xlu0 %v1096_v10, 256  ;;  %v1683_v10 = vrot.slane %v4993_v22, %v4743_v60 }
  0xde   :  { %1007 = vbcast.lane.b32.xlu1 %v1005_v35, 256 }
  0xe1   :  { %1489 = vbcast.lane.b32.xlu0 %v1487_v54, 256 }
  0xe2   :  { %1105 = vbcast.lane.b32.xlu1 %v1103_v39, 256 }
  0xe4   :  { %v5001_v34 = vpop.permute.xlu1 %756  ;;  %v5003_v47 = vpop.permute.xlu0 %749 }
  0xe5   :  { %7242 = vst [vmem:[#allocation17_spill] sm:$0xff] %v5001_v34  ;;  %7243 = vst [vmem:[#allocation18_spill] sm:$0xff] %v5003_v47  ;;  %1678 = vbcast.lane.b32.xlu0 %v1676_v37, 256  ;;  %v408_v34 = vsub.f32 %v4481_v4, %v386_v21 }
  0xe6   :  { %1587 = vbcast.lane.b32.xlu1 %v1585_v31, 256  ;;  %v410_v31 = vsub.f32 %v4464_v0, %v392_v18  ;;  %v413_v0 = vsub.f32 %v4474_v2, %v401_v40 }
  0xe7   :  { %v416_v29 = vmul.f32 1.442695, %v408_v34 }
  0xe8   :  { %v5009_v52 = vpop.permute.xlu1 %763  ;;  %v5011_v35 = vpop.permute.xlu0 %777  ;;  %v420_v17 = vmul.f32 1.442695, %v410_v31 }
  0xe9   :  { %2070 = vbcast.lane.b32.xlu0 %v2068_v43, 256  ;;  %7244 = vst [vmem:[#allocation19_spill] sm:$0xff] %v5011_v35  ;;  %v409_v43 = vsub.f32 %v4486_v5, %v389_v8  ;;  %4201 = vpow2.f32 %v416_v29  ;;  %v412_v35 = vsub.f32 %v4497_v9, %v398_v32  ;;  %v426_v8 = vmul.f32 1.442695, %v413_v0 }
  0xea   :  { %1685 = vbcast.lane.b32.xlu1 %v1683_v10, 256  ;;  %4203 = vpow2.f32 %v420_v17 }
  0xeb   :  { %v418_v4 = vmul.f32 1.442695, %v409_v43  ;;  %v424_v21 = vmul.f32 1.442695, %v412_v35 }
  0xec   :  { %v5013_v54 = vpop.permute.xlu1 %770  ;;  %v5015_v39 = vpop.permute.xlu0 %791 }
  0xed   :  { %7245 = vst [vmem:[#allocation20_spill] sm:$0xff] %v5013_v54  ;;  %7246 = vst [vmem:[#allocation21_spill] sm:$0xff] %v5015_v39  ;;  %v411_v39 = vsub.f32 %v4469_v1, %v395_v26  ;;  %4205 = vpow2.f32 %v418_v4  ;;  %v415_v1 = vsub.f32 %v4564_v42, %v407_v13 }
  0xee   :  { %4207 = vpow2.f32 %v424_v21 }
  0xef   :  { %v430_v40 = vmul.f32 1.442695, %v415_v1 }
  0xf0   :  { %v5018_v37 = vpop.permute.xlu1 %784 }
  0xf1   :  { %7247 = vst [vmem:[#allocation22_spill] sm:$0xff] %v5018_v37  ;;  %v422_v37 = vmul.f32 1.442695, %v411_v39 }
  0xf3   :  { %v5020_v47 = vpop.permute.xlu0 %874  ;;  %v5036_v18 = vpop.eup %4201  ;;  %4209 = vpow2.f32 %v422_v37 }
  0xf4   :  { %7248 = vst [vmem:[#allocation23_spill] sm:$0xff] %v5020_v47  ;;  %v5025_v10 = vpop.permute.xlu1 %798  ;;  %v414_v47 = vsub.f32 %v4571_v48, %v404_v20  ;;  %v432_v48 = vsel %vm383_vm0, %v5036_v18, 0.0  ;;  %v5045_v26 = vpop.eup %4203 }
  0xf5   :  { %v438_v20 = vsel %vm383_vm0, %v5045_v26, 0.0 }
  0xf6   :  { %v428_v9 = vmul.f32 1.442695, %v414_v47 }
  0xf7   :  { %v5027_v54 = vpop.permute.xlu0 %930  ;;  %v5047_v32 = vpop.eup %4205 }
  0xf8   :  { %7249 = vst [vmem:[#allocation24_spill] sm:$0xff] %v5027_v54  ;;  %v5032_v5 = vpop.permute.xlu1 %881  ;;  %4211 = vpow2.f32 %v428_v9  ;;  %v5051_v34 = vpop.eup %4207  ;;  %v435_v47 = vsel %vm383_vm0, %v5047_v32, 0.0 }
  0xf9   :  { %7250 = vst [vmem:[#allocation25_spill] sm:$0xff] %v5032_v5  ;;  %4213 = vpow2.f32 %v426_v8  ;;  %v444_v39 = vsel %vm383_vm0, %v5051_v34, 0.0  ;;  %v7416_v5 = vld [vmem:[#allocation17_spill] sm:$0xff] }
  0xfa   :  { %4215 = vpow2.f32 %v430_v40 }
  0xfb   :  { %v5034_v29 = vpop.permute.xlu0 %888 }
  0xfc   :  { %7251 = vst [vmem:[#allocation26_spill] sm:$0xff] %v5034_v29  ;;  %v5039_v17 = vpop.permute.xlu1 %937 }
  0xfd   :  { %7252 = vst [vmem:[#allocation27_spill] sm:$0xff] %v5039_v17  ;;  %v5059_v35 = vpop.eup %4209 }
  0xfe   :  { %v441_v31 = vsel %vm383_vm0, %v5059_v35, 0.0 }
  0xff   :  { %v5043_v2 = vpop.permute.xlu0 %944 }
 0x100   :  { %7253 = vst [vmem:[#allocation28_spill] sm:$0xff] %v5043_v2  ;;  %v5053_v42 = vpop.permute.xlu1 %1461  ;;  %v7018_v2 = vmov 0.0  }
 0x101   :  { %7254 = vst [vmem:[#allocation29_spill] sm:$0xff] %v5053_v42  ;;  %586 = vmatprep.mubr.f32.mxu0 %v7018_v2  ;;  %v2166_v2 = vrot.slane %v4950_v58, %v4753_v19 }
 0x102   :  { %v5063_v37 = vpop.eup %4211 }
 0x103   :  { %v5055_v13 = vpop.permute.xlu0 %1454  ;;  %v5067_v43 = vpop.eup %4213  ;;  %v450_v0 = vsel %vm383_vm0, %v5063_v37, 0.0 }
 0x104   :  { %7255 = vst [vmem:[#allocation30_spill] sm:$0xff] %v5055_v13  ;;  %v5069_v4 = vpop.permute.xlu1 %1517  ;;  %v447_v9 = vsel %vm383_vm0, %v5067_v43, 0.0  ;;  %v5077_v8 = vpop.eup %4215 }
 0x105   :  { %7256 = vst [vmem:[#allocation31_spill] sm:$0xff] %v5069_v4  ;;  %v453_v40 = vsel %vm383_vm0, %v5077_v8, 0.0 }
 0x107   :  { %v5071_v21 = vpop.permute.xlu0 %1510 }
 0x108   :  { %433 = vadd.xlane.f32.xlu0 %v432_v48  ;;  %7257 = vst [vmem:[#allocation32_spill] sm:$0xff] %v5071_v21  ;;  %v5079_v1 = vpop.permute.xlu1 %1468  ;;  %v272_v21 = vmul.f32 %v4792_v55, %v4667_v24 }
 0x109   :  { %7258 = vst [vmem:[#allocation33_spill] sm:$0xff] %v5079_v1 }
 0x10a   :  { %v5117_v24 = vmul.f32 %v4819_v57, %v272_v21  ;;  %v1061_v21 = vrot.slane %v4916_v15, %v4771_v46 }
 0x10b   :  { %v5081_v48 = vpop.permute.xlu0 %2042 }
 0x10c   :  { %439 = vadd.xlane.f32.xlu0 %v438_v20  ;;  %7259 = vst [vmem:[#allocation34_spill] sm:$0xff] %v5081_v48  ;;  %v493_v20 = vld [vmem:[%s6999_s4 + $0x8] sm:$0xff]  ;;  %v5097_v4 = vpop.permute.xlu1 %2049 }
 0x10d   :  { %7260 = vst [vmem:[#allocation35_spill] sm:$0xff] %v5097_v4 }
 0x10e   :  { %436 = vadd.xlane.f32.xlu1 %v435_v47  ;;  %v496_v47 = vld [vmem:[%s6999_s4 + $0x20] sm:$0xff] }
 0x110   :  { %445 = vadd.xlane.f32.xlu0 %v444_v39  ;;  %v3980_v39 = vpack.c.bf16 %v496_v47, %v493_v20  ;;  %v5104_v20 = vpop.permute.xlu1 %1524 }
 0x111   :  { %7262 = vst [vmem:[#allocation37_spill] sm:$0xff] %v5104_v20  ;;  %v280_v20 = vmul.f32 %v4829_v11, %v4717_v41 }
 0x112   :  { %442 = vadd.xlane.f32.xlu1 %v441_v31  ;;  %v492_v31 = vld [vmem:[%s6999_s4] sm:$0xff]  ;;  %3981 = vmatprep.subr.bf16.mxu0 %v3980_v39  ;;  %v963_v39 = vrot.slane %v4825_v30, %v4799_v38 }
 0x114   :  { %451 = vadd.xlane.f32.xlu0 %v450_v0  ;;  %v495_v0 = vld [vmem:[%s6999_s4 + $0x18] sm:$0xff]  ;;  %v5125_v17 = vpop.permute.xlu1 %2105 }
 0x115   :  { %7264 = vst [vmem:[#allocation39_spill] sm:$0xff] %v5125_v17  ;;  %v1110_v17 = vrot.slane %v4980_v14, %v4753_v19 }
 0x116   :  { %448 = vadd.xlane.f32.xlu1 %v447_v9  ;;  %v3982_v9 = vpack.c.bf16 %v495_v0, %v492_v31  ;;  %v494_v31 = vld [vmem:[%s6999_s4 + $0x10] sm:$0xff]  ;;  %v497_v0 = vld [vmem:[%s6999_s4 + $0x28] sm:$0xff] }
 0x118   :  { %3983 = vmatpush1.bf16.msra.mxu0 %v3982_v9  ;;  %v3984_v9 = vpack.c.bf16 %v497_v0, %v494_v31  ;;  %v1543_v31 = vrot.slane %v4856_v16, %v4799_v38  ;;  %v5134_v0 = vmul.f32 %v4840_v49, %v280_v20  ;;  %v5138_v41 = vpop.permute.xlu1 %986  ;;  %v2124_v20 = vrot.slane %v4881_v7, %v4756_v36 }
 0x119   :  { %7266 = vst [vmem:[#allocation41_spill] sm:$0xff] %v5138_v41 }
 0x11a   :  { %454 = vadd.xlane.f32.xlu1 %v453_v40  ;;  %v5099_v40 = vpop.permute.xlu0 %2098  ;;  %3985 = vmatprep.subr.bf16.mxu1 %v3984_v9  ;;  %v1746_v48 = vrot.slane %v5134_v0, %v4753_v19 }
 0x11b   :  { %7261 = vst [vmem:[#allocation36_spill] sm:$0xff] %v5099_v40  ;;  %3987 = vmatpush3.bf16.msra.mxu1 %v3984_v9  ;;  %v1152_v40 = vrot.slane %v5117_v24, %v4740_v28 }
 0x11e   :  { %v5106_v47 = vpop.permute.xlu0 %895 }
 0x11f   :  { %7263 = vst [vmem:[#allocation38_spill] sm:$0xff] %v5106_v47 }
 0x122   :  { %v5127_v54 = vpop.permute.xlu0 %993 }
 0x123   :  { %7265 = vst [vmem:[#allocation40_spill] sm:$0xff] %v5127_v54 }
 0x126   :  { %v5140_v9 = vpop.permute.xlu0 %1566 }
 0x127   :  { %7267 = vst [vmem:[#allocation42_spill] sm:$0xff] %v5140_v9  ;;  %v1739_v9 = vrot.slane %v5134_v0, %v4743_v60 }
 0x12a   :  { %965 = vbcast.lane.b32.xlu0 %v963_v39, 256  ;;  %v1159_v39 = vrot.slane %v5117_v24, %v4743_v60  ;;  %v5150_v54 = vpop.permute.xlu0 %2056 }
 0x12b   :  { %2168 = vbcast.lane.b32.xlu1 %v2166_v2, 256  ;;  %v1732_v2 = vrot.slane %v5134_v0, %v4740_v28  ;;  %7269 = vst [vmem:[#allocation44_spill] sm:$0xff] %v5150_v54 }
 0x12e   :  { %1154 = vbcast.lane.b32.xlu0 %v1152_v40, 256  ;;  %v1641_v40 = vrot.slane %v4929_v12, %v4771_v46  ;;  %v5160_v41 = vpop.permute.xlu0 %1042 }
 0x12f   :  { %1063 = vbcast.lane.b32.xlu1 %v1061_v21, 256  ;;  %v5148_v21 = vpop.permute.xlu1 %1475  ;;  %7271 = vst [vmem:[#allocation46_spill] sm:$0xff] %v5160_v41  ;;  %v1690_v41 = vrot.slane %v4993_v22, %v4753_v19 }
 0x130   :  { %7268 = vst [vmem:[#allocation43_spill] sm:$0xff] %v5148_v21 }
 0x132   :  { %1545 = vbcast.lane.b32.xlu0 %v1543_v31, 256  ;;  %v914_v31 = vrot.slane %v4822_v23, %v4774_v50 }
 0x133   :  { %1161 = vbcast.lane.b32.xlu1 %v1159_v39, 256  ;;  %v2222_v39 = vrot.slane %v4967_v25, %v4753_v19 }
 0x136   :  { %1734 = vbcast.lane.b32.xlu0 %v1732_v2, 256  ;;  %v5158_v2 = vpop.permute.xlu1 %1573 }
 0x137   :  { %1643 = vbcast.lane.b32.xlu1 %v1641_v40, 256  ;;  %7270 = vst [vmem:[#allocation45_spill] sm:$0xff] %v5158_v2  ;;  %v1012_v40 = vrot.slane %v4894_v3, %v4756_v36  ;;  %v5172_v2 = vpop.permute.xlu0 %1531 }
 0x138   :  { %7273 = vst [vmem:[#allocation48_spill] sm:$0xff] %v5172_v2 }
 0x13a   :  { %2126 = vbcast.lane.b32.xlu0 %v2124_v20, 256  ;;  %v1592_v20 = vrot.slane %v4903_v33, %v4756_v36  ;;  %v5170_v54 = vpop.permute.xlu1 %951 }
 0x13b   :  { %1741 = vbcast.lane.b32.xlu1 %v1739_v9, 256  ;;  %v287_v9 = vmul.f32 %v4858_v44, %v4768_v45  ;;  %7272 = vst [vmem:[#allocation47_spill] sm:$0xff] %v5170_v54  ;;  %v5185_v54 = vpop.permute.xlu0 %1629 }
 0x13c   :  { %7275 = vst [vmem:[#allocation50_spill] sm:$0xff] %v5185_v54 }
 0x13e   :  { %916 = vbcast.lane.b32.xlu0 %v914_v31, 256  ;;  %v1494_v31 = vrot.slane %v4847_v63, %v4774_v50  ;;  %v5183_v45 = vpop.permute.xlu1 %1049 }
 0x13f   :  { %2224 = vbcast.lane.b32.xlu1 %v2222_v39, 256  ;;  %v2075_v39 = vrot.slane %v4872_v27, %v4799_v38  ;;  %7274 = vst [vmem:[#allocation49_spill] sm:$0xff] %v5183_v45  ;;  %v5195_v2 = vpop.permute.xlu0 %902 }
 0x140   :  { %7277 = vst [vmem:[#allocation52_spill] sm:$0xff] %v5195_v2  ;;  %v7414_v2 = vld [vmem:[#allocation18_spill] sm:$0xff] }
 0x142   :  { %1112 = vbcast.lane.b32.xlu0 %v1110_v17, 256  ;;  %v5179_v17 = vmul.f32 %v4865_v53, %v287_v9  ;;  %v970_v9 = vrot.slane %v4825_v30, %v4774_v50 }
 0x143   :  { %1014 = vbcast.lane.b32.xlu1 %v1012_v40, 256  ;;  %v5205_v45 = vpop.permute.xlu0 %1482 }
 0x144   :  { %v2264_v40 = vrot.slane %v5179_v17, %v4740_v28  ;;  %v2271_v54 = vrot.slane %v5179_v17, %v4743_v60  ;;  %7279 = vst [vmem:[#allocation54_spill] sm:$0xff] %v5205_v45 }
 0x146   :  { %1594 = vbcast.lane.b32.xlu0 %v1592_v20, 256  ;;  %v2173_v20 = vrot.slane %v4950_v58, %v4771_v46 }
 0x147   :  { %1496 = vbcast.lane.b32.xlu1 %v1494_v31, 256  ;;  %v5193_v31 = vpop.permute.xlu1 %1622 }
 0x148   :  { %7276 = vst [vmem:[#allocation51_spill] sm:$0xff] %v5193_v31  ;;  %v1648_v31 = vrot.slane %v4929_v12, %v4756_v36 }
 0x14a   :  { %2077 = vbcast.lane.b32.xlu0 %v2075_v39, 256  ;;  %v1166_v39 = vrot.slane %v5117_v24, %v4753_v19 }
 0x14b   :  { %1692 = vbcast.lane.b32.xlu1 %v1690_v41, 256  ;;  %v1068_v41 = vrot.slane %v4916_v15, %v4756_v36 }
 0x14e   :  { %2266 = vbcast.lane.b32.xlu0 %v2264_v40, 256  ;;  %v5203_v40 = vpop.permute.xlu1 %2112 }
 0x14f   :  { %2175 = vbcast.lane.b32.xlu1 %v2173_v20, 256  ;;  %7278 = vst [vmem:[#allocation53_spill] sm:$0xff] %v5203_v40  ;;  %v288_v20 = vmul.f32 %v4858_v44, %v4784_v62 }
 0x151   :  { %v5216_v4 = vmul.f32 %v4865_v53, %v288_v20 }
 0x152   :  { %972 = vbcast.lane.b32.xlu0 %v970_v9, 256  ;;  %v1550_v9 = vrot.slane %v4856_v16, %v4774_v50  ;;  %v5218_v40 = vpop.permute.xlu1 %1000 }
 0x153   :  { %2273 = vbcast.lane.b32.xlu1 %v2271_v54, 256  ;;  %v2131_v54 = vrot.slane %v4881_v7, %v4799_v38  ;;  %7280 = vst [vmem:[#allocation55_spill] sm:$0xff] %v5218_v40  ;;  %v2320_v62 = vrot.slane %v5216_v4, %v4740_v28  ;;  %v921_v40 = vrot.slane %v4822_v23, %v4814_v51 }
 0x154   :  { %v1019_v23 = vrot.slane %v4894_v3, %v4799_v38 }
 0x156   :  { %1168 = vbcast.lane.b32.xlu0 %v1166_v39, 256  ;;  %v5220_v39 = vpop.permute.xlu0 %2063 }
 0x157   :  { %1070 = vbcast.lane.b32.xlu1 %v1068_v41, 256  ;;  %7281 = vst [vmem:[#allocation56_spill] sm:$0xff] %v5220_v39  ;;  %v5228_v41 = vpop.permute.xlu1 %1580 }
 0x158   :  { %7282 = vst [vmem:[#allocation57_spill] sm:$0xff] %v5228_v41 }
 0x15a   :  { %1650 = vbcast.lane.b32.xlu0 %v1648_v31, 256  ;;  %v2229_v31 = vrot.slane %v4967_v25, %v4771_v46  ;;  %v5230_v20 = vpop.permute.xlu0 %2161 }
 0x15b   :  { %1552 = vbcast.lane.b32.xlu1 %v1550_v9, 256  ;;  %7283 = vst [vmem:[#allocation58_spill] sm:$0xff] %v5230_v20  ;;  %v273_v9 = vmul.f32 %v4792_v55, %v4673_v56  ;;  %v5243_v41 = vpop.permute.xlu1 %2154 }
 0x15c   :  { %7284 = vst [vmem:[#allocation59_spill] sm:$0xff] %v5243_v41 }
 0x15d   :  { %v5241_v39 = vmul.f32 %v4819_v57, %v273_v9 }
 0x15e   :  { %2133 = vbcast.lane.b32.xlu0 %v2131_v54, 256  ;;  %v2327_v54 = vrot.slane %v5216_v4, %v4743_v60 }
 0x15f   :  { %1748 = vbcast.lane.b32.xlu1 %v1746_v48, 256  ;;  %v1117_v48 = vrot.slane %v4980_v14, %v4771_v46  ;;  %v1215_v56 = vrot.slane %v5241_v39, %v4743_v60  ;;  %v5255_v9 = vpop.permute.xlu1 %958 }
 0x160   :  { %7286 = vst [vmem:[#allocation61_spill] sm:$0xff] %v5255_v9  ;;  %v2257_v9 = vrot.slane %v4967_v25, %v4814_v51 }
 0x162   :  { %2322 = vbcast.lane.b32.xlu0 %v2320_v62, 256  ;;  %v5245_v62 = vpop.permute.xlu0 %1056 }
 0x163   :  { %2231 = vbcast.lane.b32.xlu1 %v2229_v31, 256  ;;  %7285 = vst [vmem:[#allocation60_spill] sm:$0xff] %v5245_v62  ;;  %v1208_v31 = vrot.slane %v5241_v39, %v4740_v28  ;;  %v1501_v62 = vrot.slane %v4847_v63, %v4814_v51 }
 0x166   :  { %923 = vbcast.lane.b32.xlu0 %v921_v40, 256  ;;  %v281_v40 = vmul.f32 %v4829_v11, %v4725_v61  ;;  %v5257_v20 = vpop.permute.xlu0 %1636 }
 0x167   :  { %2329 = vbcast.lane.b32.xlu1 %v2327_v54, 256  ;;  %7287 = vst [vmem:[#allocation62_spill] sm:$0xff] %v5257_v20  ;;  %v1599_v54 = vrot.slane %v4903_v33, %v4799_v38 }
 0x16a   :  { %1119 = vbcast.lane.b32.xlu0 %v1117_v48, 256  ;;  %v5262_v48 = vmul.f32 %v4840_v49, %v281_v40  ;;  %v5270_v41 = vpop.permute.xlu0 %2210  ;;  %v2082_v40 = vrot.slane %v4872_v27, %v4774_v50 }
 0x16b   :  { %1021 = vbcast.lane.b32.xlu1 %v1019_v23, 256  ;;  %v5268_v23 = vpop.permute.xlu1 %1538  ;;  %7289 = vst [vmem:[#allocation64_spill] sm:$0xff] %v5270_v41  ;;  %v2278_v41 = vrot.slane %v5179_v17, %v4753_v19 }
 0x16c   :  { %v1788_v61 = vrot.slane %v5262_v48, %v4740_v28  ;;  %7288 = vst [vmem:[#allocation63_spill] sm:$0xff] %v5268_v23  ;;  %v1795_v63 = vrot.slane %v5262_v48, %v4743_v60  ;;  %v977_v23 = vrot.slane %v4825_v30, %v4814_v51 }
 0x16e   :  { %1217 = vbcast.lane.b32.xlu0 %v1215_v56, 256  ;;  %v1697_v56 = vrot.slane %v4993_v22, %v4771_v46 }
 0x16f   :  { %1210 = vbcast.lane.b32.xlu1 %v1208_v31, 256  ;;  %v5278_v31 = vpop.permute.xlu1 %2119 }
 0x170   :  { %7290 = vst [vmem:[#allocation65_spill] sm:$0xff] %v5278_v31 }
 0x172   :  { %1601 = vbcast.lane.b32.xlu0 %v1599_v54, 256  ;;  %v5280_v54 = vpop.permute.xlu0 %909 }
 0x173   :  { %1503 = vbcast.lane.b32.xlu1 %v1501_v62, 256  ;;  %7291 = vst [vmem:[#allocation66_spill] sm:$0xff] %v5280_v54  ;;  %v274_v62 = vmul.f32 %v4792_v55, %v4675_v59  ;;  %v5293_v31 = vpop.permute.xlu1 %2217  ;;  %v1173_v55 = vrot.slane %v5117_v24, %v4771_v46 }
 0x174   :  { %7292 = vst [vmem:[#allocation67_spill] sm:$0xff] %v5293_v31 }
 0x175   :  { %v5291_v20 = vmul.f32 %v4819_v57, %v274_v62  ;;  %v282_v62 = vmul.f32 %v4829_v11, %v4729_v6 }
 0x176   :  { %1790 = vbcast.lane.b32.xlu0 %v1788_v61, 256  ;;  %v2180_v61 = vrot.slane %v4950_v58, %v4756_v36 }
 0x177   :  { %1699 = vbcast.lane.b32.xlu1 %v1697_v56, 256  ;;  %v1075_v56 = vrot.slane %v4916_v15, %v4799_v38  ;;  %v1264_v59 = vrot.slane %v5291_v20, %v4740_v28  ;;  %v1271_v30 = vrot.slane %v5291_v20, %v4743_v60 }
 0x17a   :  { %2084 = vbcast.lane.b32.xlu0 %v2082_v40, 256  ;;  %v5295_v40 = vpop.permute.xlu0 %1098 }
 0x17b   :  { %1797 = vbcast.lane.b32.xlu1 %v1795_v63, 256  ;;  %7293 = vst [vmem:[#allocation68_spill] sm:$0xff] %v5295_v40  ;;  %v1557_v63 = vrot.slane %v4856_v16, %v4814_v51  ;;  %v1655_v16 = vrot.slane %v4929_v12, %v4799_v38 }
 0x17e   :  { %2280 = vbcast.lane.b32.xlu0 %v2278_v41, 256  ;;  %v5303_v41 = vpop.permute.xlu1 %1007  ;;  %v5305_v57 = vpop.permute.xlu0 %1489 }
 0x17f   :  { %2182 = vbcast.lane.b32.xlu1 %v2180_v61, 256  ;;  %7294 = vst [vmem:[#allocation69_spill] sm:$0xff] %v5303_v41  ;;  %7295 = vst [vmem:[#allocation70_spill] sm:$0xff] %v5305_v57  ;;  %v5316_v61 = vmul.f32 %v4840_v49, %v282_v62  ;;  %v2138_v62 = vrot.slane %v4881_v7, %v4774_v50 }
 0x181   :  { %v1851_v6 = vrot.slane %v5316_v61, %v4743_v60  ;;  %v1844_v11 = vrot.slane %v5316_v61, %v4740_v28 }
 0x182   :  { %1077 = vbcast.lane.b32.xlu0 %v1075_v56, 256  ;;  %v5318_v56 = vpop.permute.xlu1 %1105 }
 0x183   :  { %979 = vbcast.lane.b32.xlu1 %v977_v23, 256  ;;  %v1753_v23 = vrot.slane %v5134_v0, %v4771_v46  ;;  %7296 = vst [vmem:[#allocation71_spill] sm:$0xff] %v5318_v56 }
 0x186   :  { %1266 = vbcast.lane.b32.xlu0 %v1264_v59, 256  ;;  %v5320_v59 = vpop.permute.xlu0 %1678 }
 0x187   :  { %1175 = vbcast.lane.b32.xlu1 %v1173_v55, 256  ;;  %7297 = vst [vmem:[#allocation72_spill] sm:$0xff] %v5320_v59  ;;  %v5328_v55 = vpop.permute.xlu1 %1587  ;;  %v2334_v59 = vrot.slane %v5216_v4, %v4753_v19 }
 0x188   :  { %7298 = vst [vmem:[#allocation73_spill] sm:$0xff] %v5328_v55 }
 0x18a   :  { %1559 = vbcast.lane.b32.xlu0 %v1557_v63, 256  ;;  %v5330_v49 = vpop.permute.xlu0 %2070  ;;  %v2236_v63 = vrot.slane %v4967_v25, %v4756_v36 }
 0x18b   :  { %1273 = vbcast.lane.b32.xlu1 %v1271_v30, 256  ;;  %7299 = vst [vmem:[#allocation74_spill] sm:$0xff] %v5330_v49  ;;  %v2626_v49 = vld [vmem:[#allocation5 + $0x80] sm:$0xff] }
 0x18e   :  { %1755 = vbcast.lane.b32.xlu0 %v1753_v23, 256  ;;  %v1026_v23 = vrot.slane %v4894_v3, %v4774_v50 }
 0x18f   :  { %1657 = vbcast.lane.b32.xlu1 %v1655_v16, 256  ;;  %v5338_v16 = vpop.permute.xlu1 %1685 }
 0x190   :  { %7300 = vst [vmem:[#allocation75_spill] sm:$0xff] %v5338_v16 }
 0x192   :  { %1853 = vbcast.lane.b32.xlu0 %v1851_v6, 256 }
 0x193   :  { %1846 = vbcast.lane.b32.xlu1 %v1844_v11, 256  ;;  %v1222_v11 = vrot.slane %v5241_v39, %v4753_v19 }
 0x195   :  { %v434_v30 = vpop.xlane.xlu0 %433 }
 0x196   :  { %4217 = vrcp.f32 %v434_v30  ;;  %2238 = vbcast.lane.b32.xlu0 %v2236_v63, 256  ;;  %v1124_v63 = vrot.slane %v4980_v14, %v4756_v36 }
 0x197   :  { %2140 = vbcast.lane.b32.xlu1 %v2138_v62, 256  ;;  %v1704_v62 = vrot.slane %v4993_v22, %v4756_v36 }
 0x199   :  { %v440_v6 = vpop.xlane.xlu0 %439 }
 0x19a   :  { %1028 = vbcast.lane.b32.xlu0 %v1026_v23, 256  ;;  %4219 = vrcp.f32 %v440_v6  ;;  %v1606_v23 = vrot.slane %v4903_v33, %v4774_v50 }
 0x19b   :  { %v437_v56 = vpop.xlane.xlu1 %436  ;;  %2336 = vbcast.lane.b32.xlu1 %v2334_v59, 256 }
 0x19c   :  { %4221 = vrcp.f32 %v437_v56  ;;  %v2089_v56 = vrot.slane %v4872_v27, %v4814_v51 }
 0x19d   :  { %v446_v30 = vpop.xlane.xlu0 %445 }
 0x19e   :  { %1224 = vbcast.lane.b32.xlu0 %v1222_v11, 256  ;;  %4223 = vrcp.f32 %v446_v30  ;;  %v7301_v30 = vld [vmem:[#allocation15_spill] sm:$0xff] }
 0x19f   :  { %v443_v16 = vpop.xlane.xlu1 %442  ;;  %1126 = vbcast.lane.b32.xlu1 %v1124_v63, 256  ;;  %v289_v63 = vmul.f32 %v4858_v44, %v7301_v30 }
 0x1a0   :  { %v4218_v40 = vpop.eup %4217  ;;  %4225 = vrcp.f32 %v443_v16  ;;  %v7302_v16 = vmov 0.0  }
 0x1a1   :  { %v452_v6 = vpop.xlane.xlu0 %451  ;;  %v464_v59 = vmul.f32 %v4218_v40, %v5036_v18  ;;  %v1802_v18 = vrot.slane %v5262_v48, %v4753_v19  ;;  %v5366_v30 = vmul.f32 %v4865_v53, %v289_v63 }
 0x1a2   :  { %1706 = vbcast.lane.b32.xlu0 %v1704_v62, 256  ;;  %4227 = vrcp.f32 %v452_v6 }
 0x1a3   :  { %3643 = vmatmul.mubr.msk.f32.vlgmr.msra.gmra.mrb[0].mxu0 %vm383_vm0, %v464_v59  ;;  %3775 = vmatprep.mubr.msk.f32.mxu1 %vm383_vm0, %v464_v59  ;;  %v449_v11 = vpop.xlane.xlu1 %448  ;;  %v2285_v59 = vrot.slane %v5179_v17, %v4771_v46  ;;  %v2383_v63 = vrot.slane %v5366_v30, %v4743_v60 }
 0x1a4   :  { %4229 = vrcp.f32 %v449_v11  ;;  %592 = vmatprep.mubr.f32.mxu0 %v7302_v16  ;;  %1608 = vbcast.lane.b32.xlu1 %v1606_v23, 256  ;;  %v4220_v40 = vpop.eup %4219  ;;  %v2187_v11 = vrot.slane %v4950_v58, %v4799_v38 }
 0x1a5   :  { %v5360_v62 = vpop.permute.xlu0 %965  ;;  %v466_v23 = vmul.f32 %v4220_v40, %v5045_v26  ;;  %v2376_v40 = vrot.slane %v5366_v30, %v4740_v28 }
 0x1a6   :  { %7303 = vst [vmem:[#allocation15_spill] sm:$0xff] %v5360_v62  ;;  %v4222_v27 = vpop.eup %4221  ;;  %2091 = vbcast.lane.b32.xlu0 %v2089_v56, 256 }
 0x1a7   :  { %v455_v6 = vpop.xlane.xlu1 %454  ;;  %v465_v31 = vmul.f32 %v4222_v27, %v5047_v32 }
 0x1a8   :  { %4231 = vrcp.f32 %v455_v6  ;;  %1804 = vbcast.lane.b32.xlu1 %v1802_v18, 256  ;;  %v4224_v55 = vpop.eup %4223 }
 0x1a9   :  { %v5371_v41 = vpop.permute.xlu0 %1154  ;;  %3644 = vmatmul.mubr.msk.f32.gmra.mrb[2].mxu0 %vm383_vm0, %v465_v31  ;;  %3776 = vmatmul.mubr.msk.f32.vlgmr.msra.gmra.mrb[0].mxu1 %vm383_vm0, %v465_v31  ;;  %v468_v18 = vmul.f32 %v4224_v55, %v5051_v34  ;;  %v1180_v55 = vrot.slane %v5117_v24, %v4756_v36 }
 0x1aa   :  { %7304 = vst [vmem:[#allocation76_spill] sm:$0xff] %v5371_v41  ;;  %v4226_v32 = vpop.eup %4225  ;;  %3778 = vmatprep.mubr.msk.f32.mxu1 %vm383_vm0, %v466_v23  ;;  %598 = vmatprep.mubr.f32.mxu0 %v7302_v16 }
 0x1ab   :  { %v5377_v56 = vpop.permute.xlu1 %2168  ;;  %v467_v26 = vmul.f32 %v4226_v32, %v5059_v35  ;;  %2287 = vbcast.lane.b32.xlu0 %v2285_v59, 256 }
 0x1ac   :  { %7305 = vst [vmem:[#allocation77_spill] sm:$0xff] %v5377_v56  ;;  %2189 = vbcast.lane.b32.xlu1 %v2187_v11, 256  ;;  %v4228_v31 = vpop.eup %4227 }
 0x1ad   :  { %v5385_v27 = vpop.permute.xlu0 %1545  ;;  %3645 = vmatmul.mubr.msk.f32.gmra.mrb[4].mxu0 %vm383_vm0, %v466_v23  ;;  %3779 = vmatmul.mubr.msk.f32.gmra.mrb[2].mxu1 %vm383_vm0, %v467_v26  ;;  %v470_v59 = vmul.f32 %v4228_v31, %v5063_v37  ;;  %v1082_v23 = vrot.slane %v4916_v15, %v4774_v50  ;;  %v1662_v37 = vrot.slane %v4929_v12, %v4774_v50 }
 0x1ae   :  { %7306 = vst [vmem:[#allocation78_spill] sm:$0xff] %v5385_v27  ;;  %v4230_v6 = vpop.eup %4229  ;;  %3781 = vmatprep.mubr.msk.f32.mxu1 %vm383_vm0, %v468_v18  ;;  %604 = vmatprep.mubr.f32.mxu0 %v7302_v16 }
 0x1af   :  { %v5391_v35 = vpop.permute.xlu1 %1063  ;;  %v469_v34 = vmul.f32 %v4230_v6, %v5067_v43  ;;  %2385 = vbcast.lane.b32.xlu0 %v2383_v63, 256  ;;  %v7312_v6 = vld [vmem:[#allocation16_spill] sm:$0xff] }
 0x1b0   :  { %7307 = vst [vmem:[#allocation79_spill] sm:$0xff] %v5391_v35  ;;  %2378 = vbcast.lane.b32.xlu1 %v2376_v40, 256  ;;  %v1278_v40 = vrot.slane %v5291_v20, %v4753_v19 }
 0x1b1   :  { %v5399_v11 = vpop.permute.xlu0 %1734  ;;  %3646 = vmatmul.mubr.msk.f32.gmra.mrb[6].mxu0 %vm383_vm0, %v467_v26  ;;  %3782 = vmatmul.mubr.msk.f32.gmra.mrb[4].mxu1 %vm383_vm0, %v469_v34 }
 0x1b2   :  { %7308 = vst [vmem:[#allocation80_spill] sm:$0xff] %v5399_v11  ;;  %v4232_v32 = vpop.eup %4231  ;;  %3784 = vmatprep.mubr.msk.f32.mxu1 %vm383_vm0, %v470_v59  ;;  %610 = vmatprep.mubr.f32.mxu0 %v7302_v16 }
 0x1b3   :  { %v5405_v43 = vpop.permute.xlu1 %1161  ;;  %v471_v63 = vmul.f32 %v4232_v32, %v5077_v8  ;;  %1182 = vbcast.lane.b32.xlu0 %v1180_v55, 256  ;;  %v1858_v8 = vrot.slane %v5316_v61, %v4753_v19  ;;  %v290_v55 = vmul.f32 %v4858_v44, %v7312_v6  ;;  %v2145_v44 = vrot.slane %v4881_v7, %v4814_v51 }
 0x1b4   :  { %7309 = vst [vmem:[#allocation81_spill] sm:$0xff] %v5405_v43  ;;  %1084 = vbcast.lane.b32.xlu1 %v1082_v23, 256  ;;  %v1760_v23 = vrot.slane %v5134_v0, %v4756_v36 }
 0x1b5   :  { %v5412_v26 = vpop.permute.xlu0 %2126  ;;  %3647 = vmatmul.mubr.msk.f32.gmra.mrb[8].mxu0 %vm383_vm0, %v468_v18  ;;  %3785 = vmatmul.mubr.msk.f32.gmra.mrb[6].mxu1 %vm383_vm0, %v471_v63 }
 0x1b6   :  { %7310 = vst [vmem:[#allocation82_spill] sm:$0xff] %v5412_v26  ;;  %616 = vmatprep.mubr.f32.mxu0 %v7302_v16 }
 0x1b7   :  { %v5417_v31 = vpop.permute.xlu1 %1643  ;;  %1664 = vbcast.lane.b32.xlu0 %v1662_v37, 256  ;;  %v2243_v37 = vrot.slane %v4967_v25, %v4799_v38 }
 0x1b8   :  { %7311 = vst [vmem:[#allocation83_spill] sm:$0xff] %v5417_v31  ;;  %1280 = vbcast.lane.b32.xlu1 %v1278_v40, 256  ;;  %v5434_v31 = vmul.f32 %v4865_v53, %v290_v55  ;;  %v2341_v53 = vrot.slane %v5216_v4, %v4771_v46 }
 0x1b9   :  { %v5425_v32 = vpop.permute.xlu0 %916  ;;  %3648 = vmatmul.mubr.msk.f32.gmra.mrb[10].mxu0 %vm383_vm0, %v469_v34 }
 0x1ba   :  { %7313 = vst [vmem:[#allocation16_spill] sm:$0xff] %v5425_v32  ;;  %622 = vmatprep.mubr.f32.mxu0 %v7302_v16  ;;  %v2439_v55 = vrot.slane %v5434_v31, %v4743_v60 }
 0x1bb   :  { %v5429_v18 = vpop.permute.xlu1 %1741  ;;  %1860 = vbcast.lane.b32.xlu0 %v1858_v8, 256  ;;  %v2432_v8 = vrot.slane %v5434_v31, %v4740_v28 }
 0x1bc   :  { %7314 = vst [vmem:[#allocation84_spill] sm:$0xff] %v5429_v18  ;;  %1762 = vbcast.lane.b32.xlu1 %v1760_v23, 256 }
 0x1bd   :  { %v5438_v40 = vpop.permute.xlu0 %1112  ;;  %3649 = vmatmul.mubr.msk.f32.gmra.mrb[12].mxu0 %vm383_vm0, %v470_v59  ;;  %v1033_v59 = vrot.slane %v4894_v3, %v4814_v51  ;;  %v1711_v3 = vrot.slane %v4993_v22, %v4799_v38 }
 0x1be   :  { %7315 = vst [vmem:[#allocation85_spill] sm:$0xff] %v5438_v40  ;;  %628 = vmatprep.mubr.f32.mxu0 %v7302_v16 }
 0x1bf   :  { %v5442_v34 = vpop.permute.xlu1 %2224  ;;  %2245 = vbcast.lane.b32.xlu0 %v2243_v37, 256 }
 0x1c0   :  { %7316 = vst [vmem:[#allocation86_spill] sm:$0xff] %v5442_v34  ;;  %2147 = vbcast.lane.b32.xlu1 %v2145_v44, 256  ;;  %v1229_v44 = vrot.slane %v5241_v39, %v4771_v46 }
 0x1c1   :  { %v5448_v6 = vpop.permute.xlu0 %1594  ;;  %3650 = vmatmul.mubr.msk.f32.gmra.mrb[14].mxu0 %vm383_vm0, %v471_v63  ;;  %v1131_v63 = vrot.slane %v4980_v14, %v4799_v38 }
 0x1c2   :  { %7317 = vst [vmem:[#allocation87_spill] sm:$0xff] %v5448_v6 }
 0x1c3   :  { %v5451_v7 = vpop.permute.xlu1 %1014  ;;  %2434 = vbcast.lane.b32.xlu0 %v2432_v8, 256 }
 0x1c4   :  { %7318 = vst [vmem:[#allocation88_spill] sm:$0xff] %v5451_v7  ;;  %2343 = vbcast.lane.b32.xlu1 %v2341_v53, 256  ;;  %v1613_v53 = vrot.slane %v4903_v33, %v4814_v51  ;;  %v2390_v33 = vrot.slane %v5366_v30, %v4753_v19 }
 0x1c5   :  { %v5457_v23 = vpop.permute.xlu0 %2077 }
 0x1c6   :  { %7319 = vst [vmem:[#allocation89_spill] sm:$0xff] %v5457_v23 }
 0x1c7   :  { %v5459_v37 = vpop.permute.xlu1 %1496  ;;  %1035 = vbcast.lane.b32.xlu0 %v1033_v59, 256 }
 0x1c8   :  { %7320 = vst [vmem:[#allocation90_spill] sm:$0xff] %v5459_v37  ;;  %2441 = vbcast.lane.b32.xlu1 %v2439_v55, 256  ;;  %v2194_v55 = vrot.slane %v4950_v58, %v4774_v50 }
 0x1c9   :  { %v5465_v8 = vpop.permute.xlu0 %2266 }
 0x1ca   :  { %7321 = vst [vmem:[#allocation91_spill] sm:$0xff] %v5465_v8 }
 0x1cb   :  { %v5467_v16 = vpop.permute.xlu1 %1692  ;;  %1231 = vbcast.lane.b32.xlu0 %v1229_v44, 256 }
 0x1cc   :  { %7322 = vst [vmem:[#allocation92_spill] sm:$0xff] %v5467_v16  ;;  %1133 = vbcast.lane.b32.xlu1 %v1131_v63, 256  ;;  %v1809_v16 = vrot.slane %v5262_v48, %v4771_v46  ;;  %v2292_v63 = vrot.slane %v5179_v17, %v4756_v36 }
 0x1cd   :  { %v5473_v59 = vpop.permute.xlu0 %972 }
 0x1ce   :  { %7323 = vst [vmem:[#allocation93_spill] sm:$0xff] %v5473_v59 }
 0x1cf   :  { %v5475_v40 = vpop.permute.xlu1 %2175  ;;  %1713 = vbcast.lane.b32.xlu0 %v1711_v3, 256 }
 0x1d0   :  { %7324 = vst [vmem:[#allocation94_spill] sm:$0xff] %v5475_v40  ;;  %1615 = vbcast.lane.b32.xlu1 %v1613_v53, 256  ;;  %v1187_v53 = vrot.slane %v5117_v24, %v4799_v38  ;;  %v1089_v40 = vrot.slane %v4916_v15, %v4814_v51  ;;  %v1865_v15 = vrot.slane %v5316_v61, %v4771_v46 }
 0x1d1   :  { %v5481_v44 = vpop.permute.xlu0 %1168 }
 0x1d2   :  { %7325 = vst [vmem:[#allocation95_spill] sm:$0xff] %v5481_v44 }
 0x1d3   :  { %v5483_v34 = vpop.permute.xlu1 %2273  ;;  %2196 = vbcast.lane.b32.xlu0 %v2194_v55, 256 }
 0x1d4   :  { %7326 = vst [vmem:[#allocation96_spill] sm:$0xff] %v5483_v34  ;;  %1811 = vbcast.lane.b32.xlu1 %v1809_v16, 256  ;;  %v1669_v16 = vrot.slane %v4929_v12, %v4814_v51  ;;  %v2348_v12 = vrot.slane %v5216_v4, %v4756_v36 }
 0x1d5   :  { %v5489_v3 = vpop.permute.xlu0 %1650 }
 0x1d6   :  { %7327 = vst [vmem:[#allocation97_spill] sm:$0xff] %v5489_v3  ;;  %v1285_v3 = vrot.slane %v5291_v20, %v4771_v46 }
 0x1d7   :  { %v5491_v35 = vpop.permute.xlu1 %1070  ;;  %2392 = vbcast.lane.b32.xlu0 %v2390_v33, 256 }
 0x1d8   :  { %7328 = vst [vmem:[#allocation98_spill] sm:$0xff] %v5491_v35  ;;  %2294 = vbcast.lane.b32.xlu1 %v2292_v63, 256  ;;  %v1767_v63 = vrot.slane %v5134_v0, %v4799_v38 }
 0x1d9   :  { %v5497_v55 = vpop.permute.xlu0 %2133 }
 0x1da   :  { %7329 = vst [vmem:[#allocation99_spill] sm:$0xff] %v5497_v55 }
 0x1db   :  { %v5499_v56 = vpop.permute.xlu1 %1552  ;;  %1189 = vbcast.lane.b32.xlu0 %v1187_v53, 256 }
 0x1dc   :  { %7330 = vst [vmem:[#allocation100_spill] sm:$0xff] %v5499_v56  ;;  %1091 = vbcast.lane.b32.xlu1 %v1089_v40, 256  ;;  %v2250_v40 = vrot.slane %v4967_v25, %v4774_v50  ;;  %v1725_v25 = vrot.slane %v4993_v22, %v4814_v51 }
 0x1dd   :  { %v5505_v33 = vpop.permute.xlu0 %2322 }
 0x1de   :  { %7331 = vst [vmem:[#allocation101_spill] sm:$0xff] %v5505_v33 }
 0x1df   :  { %v5507_v35 = vpop.permute.xlu1 %1748  ;;  %1671 = vbcast.lane.b32.xlu0 %v1669_v16, 256 }
 0x1e0   :  { %7332 = vst [vmem:[#allocation102_spill] sm:$0xff] %v5507_v35  ;;  %1287 = vbcast.lane.b32.xlu1 %v1285_v3, 256  ;;  %v1138_v3 = vrot.slane %v4980_v14, %v4774_v50 }
 0x1e1   :  { %v5513_v53 = vpop.permute.xlu0 %923 }
 0x1e2   :  { %7333 = vst [vmem:[#allocation103_spill] sm:$0xff] %v5513_v53 }
 0x1e3   :  { %v5515_v6 = vpop.permute.xlu1 %2231  ;;  %1867 = vbcast.lane.b32.xlu0 %v1865_v15, 256 }
 0x1e4   :  { %7334 = vst [vmem:[#allocation104_spill] sm:$0xff] %v5515_v6  ;;  %1769 = vbcast.lane.b32.xlu1 %v1767_v63, 256  ;;  %v2446_v6 = vrot.slane %v5434_v31, %v4753_v19  ;;  %v1718_v63 = vrot.slane %v4993_v22, %v4774_v50  ;;  %v1201_v22 = vrot.slane %v5117_v24, %v4814_v51 }
 0x1e5   :  { %v5521_v16 = vpop.permute.xlu0 %1119 }
 0x1e6   :  { %7335 = vst [vmem:[#allocation105_spill] sm:$0xff] %v5521_v16  ;;  %v1236_v16 = vrot.slane %v5241_v39, %v4756_v36 }
 0x1e7   :  { %v5523_v7 = vpop.permute.xlu1 %2329  ;;  %2350 = vbcast.lane.b32.xlu0 %v2348_v12, 256 }
 0x1e8   :  { %7336 = vst [vmem:[#allocation106_spill] sm:$0xff] %v5523_v7  ;;  %2252 = vbcast.lane.b32.xlu1 %v2250_v40, 256  ;;  %v2201_v40 = vrot.slane %v4950_v58, %v4814_v51  ;;  %v1292_v58 = vrot.slane %v5291_v20, %v4756_v36 }
 0x1e9   :  { %v5529_v15 = vpop.permute.xlu0 %1217 }
 0x1ea   :  { %7337 = vst [vmem:[#allocation107_spill] sm:$0xff] %v5529_v15 }
 0x1eb   :  { %v5531_v55 = vpop.permute.xlu1 %1021  ;;  %1140 = vbcast.lane.b32.xlu0 %v1138_v3, 256 }
 0x1ec   :  { %7338 = vst [vmem:[#allocation108_spill] sm:$0xff] %v5531_v55  ;;  %2448 = vbcast.lane.b32.xlu1 %v2446_v6, 256  ;;  %v1816_v55 = vrot.slane %v5262_v48, %v4756_v36  ;;  %v2397_v6 = vrot.slane %v5366_v30, %v4771_v46 }
 0x1ed   :  { %v5537_v12 = vpop.permute.xlu0 %1601 }
 0x1ee   :  { %7339 = vst [vmem:[#allocation109_spill] sm:$0xff] %v5537_v12  ;;  %v2299_v12 = vrot.slane %v5179_v17, %v4799_v38 }
 0x1ef   :  { %v5539_v26 = vpop.permute.xlu1 %1210  ;;  %1720 = vbcast.lane.b32.xlu0 %v1718_v63, 256 }
 0x1f0   :  { %7340 = vst [vmem:[#allocation110_spill] sm:$0xff] %v5539_v26  ;;  %1238 = vbcast.lane.b32.xlu1 %v1236_v16, 256  ;;  %v1194_v16 = vrot.slane %v5117_v24, %v4774_v50  ;;  %v2362_v24 = vrot.slane %v5216_v4, %v4774_v50 }
 0x1f1   :  { %v5545_v3 = vpop.permute.xlu0 %1790 }
 0x1f2   :  { %7341 = vst [vmem:[#allocation111_spill] sm:$0xff] %v5545_v3 }
 0x1f3   :  { %v5547_v56 = vpop.permute.xlu1 %1503  ;;  %2203 = vbcast.lane.b32.xlu0 %v2201_v40, 256 }
 0x1f4   :  { %7342 = vst [vmem:[#allocation112_spill] sm:$0xff] %v5547_v56  ;;  %1818 = vbcast.lane.b32.xlu1 %v1816_v55, 256  ;;  %v1872_v55 = vrot.slane %v5316_v61, %v4756_v36  ;;  %v2627_v56 = vld [vmem:[#allocation5 + $0x88] sm:$0xff] }
 0x1f5   :  { %v5553_v63 = vpop.permute.xlu0 %2084 }
 0x1f6   :  { %7343 = vst [vmem:[#allocation113_spill] sm:$0xff] %v5553_v63 }
 0x1f7   :  { %v5555_v27 = vpop.permute.xlu1 %1699  ;;  %2399 = vbcast.lane.b32.xlu0 %v2397_v6, 256 }
 0x1f8   :  { %7344 = vst [vmem:[#allocation114_spill] sm:$0xff] %v5555_v27  ;;  %2301 = vbcast.lane.b32.xlu1 %v2299_v12, 256  ;;  %v1774_v27 = vrot.slane %v5134_v0, %v4774_v50  ;;  %v2355_v12 = vrot.slane %v5216_v4, %v4799_v38 }
 0x1f9   :  { %v5561_v40 = vpop.permute.xlu0 %2280 }
 0x1fa   :  { %7345 = vst [vmem:[#allocation115_spill] sm:$0xff] %v5561_v40  ;;  %v7427_v40 = vld [vmem:[#allocation20_spill] sm:$0xff] }
 0x1fb   :  { %v5563_v59 = vpop.permute.xlu1 %1797  ;;  %1294 = vbcast.lane.b32.xlu0 %v1292_v58, 256 }
 0x1fc   :  { %7346 = vst [vmem:[#allocation116_spill] sm:$0xff] %v5563_v59  ;;  %1196 = vbcast.lane.b32.xlu1 %v1194_v16, 256  ;;  %v1145_v16 = vrot.slane %v4980_v14, %v4814_v51  ;;  %v1823_v14 = vrot.slane %v5262_v48, %v4799_v38 }
 0x1fd   :  { %v5569_v6 = vpop.permute.xlu0 %1077 }
 0x1fe   :  { %7347 = vst [vmem:[#allocation117_spill] sm:$0xff] %v5569_v6  ;;  %v2453_v6 = vrot.slane %v5434_v31, %v4771_v46  ;;  %v2306_v46 = vrot.slane %v5179_v17, %v4774_v50 }
 0x1ff   :  { %v5571_v62 = vpop.permute.xlu1 %2182  ;;  %1874 = vbcast.lane.b32.xlu0 %v1872_v55, 256 }
 0x200   :  { %7348 = vst [vmem:[#allocation118_spill] sm:$0xff] %v5571_v62  ;;  %1776 = vbcast.lane.b32.xlu1 %v1774_v27, 256  ;;  %v1243_v27 = vrot.slane %v5241_v39, %v4799_v38 }
 0x201   :  { %v5577_v58 = vpop.permute.xlu0 %1266 }
 0x202   :  { %7349 = vst [vmem:[#allocation119_spill] sm:$0xff] %v5577_v58 }
 0x203   :  { %v5579_v63 = vpop.permute.xlu1 %979  ;;  %2357 = vbcast.lane.b32.xlu0 %v2355_v12, 256 }
 0x204   :  { %7350 = vst [vmem:[#allocation120_spill] sm:$0xff] %v5579_v63  ;;  %2259 = vbcast.lane.b32.xlu1 %v2257_v9, 256 }
 0x205   :  { %v5585_v55 = vpop.permute.xlu0 %1559 }
 0x206   :  { %7351 = vst [vmem:[#allocation121_spill] sm:$0xff] %v5585_v55 }
 0x207   :  { %v5587_v62 = vpop.permute.xlu1 %1175  ;;  %1147 = vbcast.lane.b32.xlu0 %v1145_v16, 256 }
 0x208   :  { %7352 = vst [vmem:[#allocation122_spill] sm:$0xff] %v5587_v62  ;;  %2455 = vbcast.lane.b32.xlu1 %v2453_v6, 256  ;;  %v2404_v6 = vrot.slane %v5366_v30, %v4756_v36 }
 0x209   :  { %v5593_v12 = vpop.permute.xlu0 %1755 }
 0x20a   :  { %7353 = vst [vmem:[#allocation123_spill] sm:$0xff] %v5593_v12 }
 0x20b   :  { %v5595_v63 = vpop.permute.xlu1 %1273  ;;  %1727 = vbcast.lane.b32.xlu0 %v1725_v25, 256 }
 0x20c   :  { %7354 = vst [vmem:[#allocation124_spill] sm:$0xff] %v5595_v63  ;;  %1245 = vbcast.lane.b32.xlu1 %v1243_v27, 256  ;;  %v1781_v27 = vrot.slane %v5134_v0, %v4814_v51  ;;  %v1250_v0 = vrot.slane %v5241_v39, %v4774_v50 }
 0x20d   :  { %v5601_v9 = vpop.permute.xlu0 %1853 }
 0x20e   :  { %7355 = vst [vmem:[#allocation125_spill] sm:$0xff] %v5601_v9 }
 0x20f   :  { %v5603_v16 = vpop.permute.xlu1 %1657  ;;  %2308 = vbcast.lane.b32.xlu0 %v2306_v46, 256 }
 0x210   :  { %7356 = vst [vmem:[#allocation126_spill] sm:$0xff] %v5603_v16  ;;  %1825 = vbcast.lane.b32.xlu1 %v1823_v14, 256  ;;  %v1299_v16 = vrot.slane %v5291_v20, %v4799_v38  ;;  %v1879_v14 = vrot.slane %v5316_v61, %v4799_v38 }
 0x211   :  { %v5609_v25 = vpop.permute.xlu0 %2238 }
 0x212   :  { %7357 = vst [vmem:[#allocation127_spill] sm:$0xff] %v5609_v25 }
 0x213   :  { %v5611_v55 = vpop.permute.xlu1 %1846  ;;  %1203 = vbcast.lane.b32.xlu0 %v1201_v22, 256 }
 0x214   :  { %7358 = vst [vmem:[#allocation128_spill] sm:$0xff] %v5611_v55  ;;  %2406 = vbcast.lane.b32.xlu1 %v2404_v6, 256  ;;  %v2460_v6 = vrot.slane %v5434_v31, %v4756_v36  ;;  %v1306_v36 = vrot.slane %v5291_v20, %v4774_v50 }
 0x215   :  { %v5617_v46 = vpop.permute.xlu0 %1028 }
 0x216   :  { %7359 = vst [vmem:[#allocation129_spill] sm:$0xff] %v5617_v46 }
 0x217   :  { %v5619_v23 = vpop.permute.xlu1 %2140  ;;  %1783 = vbcast.lane.b32.xlu0 %v1781_v27, 256 }
 0x218   :  { %7360 = vst [vmem:[#allocation130_spill] sm:$0xff] %v5619_v23  ;;  %1301 = vbcast.lane.b32.xlu1 %v1299_v16, 256  ;;  %v2313_v16 = vrot.slane %v5179_v17, %v4814_v51  ;;  %v1830_v23 = vrot.slane %v5262_v48, %v4774_v50 }
 0x219   :  { %v5625_v22 = vpop.permute.xlu0 %1224 }
 0x21a   :  { %7361 = vst [vmem:[#allocation131_spill] sm:$0xff] %v5625_v22 }
 0x21b   :  { %v5627_v25 = vpop.permute.xlu1 %2336  ;;  %2364 = vbcast.lane.b32.xlu0 %v2362_v24, 256 }
 0x21c   :  { %7362 = vst [vmem:[#allocation132_spill] sm:$0xff] %v5627_v25  ;;  %1881 = vbcast.lane.b32.xlu1 %v1879_v14, 256  ;;  %v3988_v14 = vpack.c.bf16 %v2627_v56, %v2626_v49  ;;  %v2369_v49 = vrot.slane %v5216_v4, %v4814_v51  ;;  %v1886_v56 = vrot.slane %v5316_v61, %v4774_v50 }
 0x21d   :  { %v5633_v27 = vpop.permute.xlu0 %1706 }
 0x21e   :  { %7363 = vst [vmem:[#allocation133_spill] sm:$0xff] %v5633_v27  ;;  %3989 = vmatprep.subr.bf16.mxu1 %v3988_v14  ;;  %v1257_v27 = vrot.slane %v5241_v39, %v4814_v51  ;;  %v1837_v39 = vrot.slane %v5262_v48, %v4814_v51  ;;  %v2425_v48 = vrot.slane %v5366_v30, %v4814_v51 }
 0x21f   :  { %v5635_v46 = vpop.permute.xlu1 %1126  ;;  %1252 = vbcast.lane.b32.xlu0 %v1250_v0, 256  ;;  %v2411_v0 = vrot.slane %v5366_v30, %v4799_v38  ;;  %3991 = vmatpush3.bf16.msra.mxu1 %v3988_v14  ;;  %v2629_v14 = vld [vmem:[#allocation5 + $0x98] sm:$0xff] }
 0x220   :  { %7364 = vst [vmem:[#allocation134_spill] sm:$0xff] %v5635_v46  ;;  %2462 = vbcast.lane.b32.xlu1 %v2460_v6, 256  ;;  %v2628_v46 = vld [vmem:[#allocation5 + $0x90] sm:$0xff] }
 0x221   :  { %v5641_v24 = vpop.permute.xlu0 %2091 }
 0x222   :  { %7365 = vst [vmem:[#allocation135_spill] sm:$0xff] %v5641_v24 }
 0x223   :  { %v5643_v37 = vpop.permute.xlu1 %1608  ;;  %2315 = vbcast.lane.b32.xlu0 %v2313_v16, 256 }
 0x224   :  { %7366 = vst [vmem:[#allocation136_spill] sm:$0xff] %v5643_v37  ;;  %1832 = vbcast.lane.b32.xlu1 %v1830_v23, 256  ;;  %v3992_v37 = vpack.c.bf16 %v2629_v14, %v2628_v46  ;;  %v1313_v46 = vrot.slane %v5291_v20, %v4814_v51  ;;  %v2631_v14 = vld [vmem:[#allocation5 + $0xa8] sm:$0xff]  ;;  %v2632_v20 = vld [vmem:[#allocation5 + $0xb0] sm:$0xff] }
 0x225   :  { %v5649_v17 = vpop.permute.xlu0 %2287 }
 0x226   :  { %7367 = vst [vmem:[#allocation137_spill] sm:$0xff] %v5649_v17  ;;  %3993 = vmatprep.subr.bf16.mxu1 %v3992_v37 }
 0x227   :  { %v5651_v6 = vpop.permute.xlu1 %1804  ;;  %1308 = vbcast.lane.b32.xlu0 %v1306_v36, 256  ;;  %v2467_v36 = vrot.slane %v5434_v31, %v4799_v38  ;;  %3995 = vmatpush3.bf16.msra.mxu1 %v3992_v37  ;;  %v1893_v38 = vrot.slane %v5316_v61, %v4814_v51  ;;  %v2474_v61 = vrot.slane %v5434_v31, %v4774_v50 }
 0x228   :  { %7368 = vst [vmem:[#allocation138_spill] sm:$0xff] %v5651_v6  ;;  %2413 = vbcast.lane.b32.xlu1 %v2411_v0, 256 }
 0x229   :  { %v5657_v16 = vpop.permute.xlu0 %2385 }
 0x22a   :  { %7369 = vst [vmem:[#allocation139_spill] sm:$0xff] %v5657_v16 }
 0x22b   :  { %v5659_v23 = vpop.permute.xlu1 %2189  ;;  %2371 = vbcast.lane.b32.xlu0 %v2369_v49, 256 }
 0x22c   :  { %7370 = vst [vmem:[#allocation140_spill] sm:$0xff] %v5659_v23  ;;  %1888 = vbcast.lane.b32.xlu1 %v1886_v56, 256  ;;  %v2418_v23 = vrot.slane %v5366_v30, %v4774_v50  ;;  %v2634_v30 = vld [vmem:[#allocation5 + $0xc0] sm:$0xff] }
 0x22d   :  { %v5665_v4 = vpop.permute.xlu0 %1182 }
 0x22e   :  { %7371 = vst [vmem:[#allocation141_spill] sm:$0xff] %v5665_v4 }
 0x22f   :  { %v5667_v0 = vpop.permute.xlu1 %2378  ;;  %1259 = vbcast.lane.b32.xlu0 %v1257_v27, 256  ;;  %v2630_v27 = vld [vmem:[#allocation5 + $0xa0] sm:$0xff] }
 0x230   :  { %7372 = vst [vmem:[#allocation142_spill] sm:$0xff] %v5667_v0  ;;  %2469 = vbcast.lane.b32.xlu1 %v2467_v36, 256  ;;  %v3996_v37 = vpack.c.bf16 %v2631_v14, %v2630_v27 }
 0x231   :  { %v5673_v49 = vpop.permute.xlu0 %1664 }
 0x232   :  { %7373 = vst [vmem:[#allocation143_spill] sm:$0xff] %v5673_v49  ;;  %3997 = vmatprep.subr.bf16.mxu1 %v3996_v37 }
 0x233   :  { %v5675_v56 = vpop.permute.xlu1 %1084  ;;  %2420 = vbcast.lane.b32.xlu0 %v2418_v23, 256  ;;  %3999 = vmatpush3.bf16.msra.mxu1 %v3996_v37 }
 0x234   :  { %7374 = vst [vmem:[#allocation144_spill] sm:$0xff] %v5675_v56  ;;  %1839 = vbcast.lane.b32.xlu1 %v1837_v39, 256  ;;  %v2633_v39 = vld [vmem:[#allocation5 + $0xb8] sm:$0xff] }
 0x235   :  { %v5681_v24 = vpop.permute.xlu0 %1860  ;;  %v4000_v27 = vpack.c.bf16 %v2633_v39, %v2632_v20  ;;  %v2637_v20 = vld [vmem:[#allocation5 + $0xd8] sm:$0xff] }
 0x236   :  { %7375 = vst [vmem:[#allocation145_spill] sm:$0xff] %v5681_v24 }
 0x237   :  { %v5683_v36 = vpop.permute.xlu1 %1280  ;;  %1895 = vbcast.lane.b32.xlu0 %v1893_v38, 256  ;;  %v2481_v38 = vrot.slane %v5434_v31, %v4814_v51  ;;  %4001 = vmatprep.subr.bf16.mxu1 %v4000_v27  ;;  %v2638_v51 = vld [vmem:[#allocation5 + $0xe0] sm:$0xff]  ;;  %v2639_v31 = vld [vmem:[#allocation5 + $0xe8] sm:$0xff] }
 0x238   :  { %7376 = vst [vmem:[#allocation146_spill] sm:$0xff] %v5683_v36  ;;  %1315 = vbcast.lane.b32.xlu1 %v1313_v46, 256  ;;  %4003 = vmatpush3.bf16.msra.mxu1 %v4000_v27  ;;  %v2635_v46 = vld [vmem:[#allocation5 + $0xc8] sm:$0xff]  ;;  %v4012_v27 = vpack.c.bf16 %v2639_v31, %v2638_v51 }
 0x239   :  { %v5689_v23 = vpop.permute.xlu0 %2245  ;;  %v4004_v37 = vpack.c.bf16 %v2635_v46, %v2634_v30  ;;  %v2641_v30 = vld [vmem:[#allocation5 + $0xf8] sm:$0xff] }
 0x23a   :  { %7377 = vst [vmem:[#allocation147_spill] sm:$0xff] %v5689_v23 }
 0x23b   :  { %v5691_v49 = vpop.permute.xlu1 %1762  ;;  %2427 = vbcast.lane.b32.xlu0 %v2425_v48, 256  ;;  %4005 = vmatprep.subr.bf16.mxu1 %v4004_v37  ;;  %v2636_v48 = vld [vmem:[#allocation5 + $0xd0] sm:$0xff] }
 0x23c   :  { %7378 = vst [vmem:[#allocation148_spill] sm:$0xff] %v5691_v49  ;;  %2476 = vbcast.lane.b32.xlu1 %v2474_v61, 256  ;;  %4007 = vmatpush3.bf16.msra.mxu1 %v4004_v37  ;;  %v4008_v39 = vpack.c.bf16 %v2637_v20, %v2636_v48 }
 0x23d   :  { %v5695_v14 = vpop.permute.xlu0 %2434 }
 0x23e   :  { %7379 = vst [vmem:[#allocation149_spill] sm:$0xff] %v5695_v14  ;;  %4009 = vmatprep.subr.bf16.mxu1 %v4008_v39 }
 0x23f   :  { %v5697_v50 = vpop.permute.xlu1 %2147 }
 0x240   :  { %7380 = vst [vmem:[#allocation150_spill] sm:$0xff] %v5697_v50  ;;  %2483 = vbcast.lane.b32.xlu1 %v2481_v38, 256  ;;  %4011 = vmatpush3.bf16.msra.mxu1 %v4008_v39  ;;  %v2640_v38 = vld [vmem:[#allocation5 + $0xf0] sm:$0xff] }
 0x241   :  { %v5699_v23 = vpop.permute.xlu0 %1035  ;;  %4013 = vmatprep.subr.bf16.mxu1 %v4012_v27  ;;  %v4016_v46 = vpack.c.bf16 %v2641_v30, %v2640_v38 }
 0x242   :  { %7381 = vst [vmem:[#allocation151_spill] sm:$0xff] %v5699_v23 }
 0x243   :  { %v5701_v61 = vpop.permute.xlu1 %2343 }
 0x244   :  { %7382 = vst [vmem:[#allocation152_spill] sm:$0xff] %v5701_v61  ;;  %4015 = vmatpush3.bf16.msra.mxu1 %v4012_v27 }
 0x245   :  { %v5703_v56 = vpop.permute.xlu0 %1231  ;;  %4017 = vmatprep.subr.bf16.mxu1 %v4016_v46 }
 0x246   :  { %7383 = vst [vmem:[#allocation153_spill] sm:$0xff] %v5703_v56 }
 0x247   :  { %v5705_v57 = vpop.permute.xlu1 %2441 }
 0x248   :  { %7384 = vst [vmem:[#allocation154_spill] sm:$0xff] %v5705_v57  ;;  %4019 = vmatpush3.bf16.msra.mxu1 %v4016_v46 }
 0x249   :  { %v5707_v23 = vpop.permute.xlu0 %1713 }
 0x24a   :  { %7385 = vst [vmem:[#allocation155_spill] sm:$0xff] %v5707_v23 }
 0x24b   :  { %v5709_v37 = vpop.permute.xlu1 %1133 }
 0x24c   :  { %7386 = vst [vmem:[#allocation156_spill] sm:$0xff] %v5709_v37 }
 0x24d   :  { %v5711_v48 = vpop.permute.xlu0 %2196 }
 0x24e   :  { %7387 = vst [vmem:[#allocation157_spill] sm:$0xff] %v5711_v48 }
 0x24f   :  { %v5713_v20 = vpop.permute.xlu1 %1615 }
 0x250   :  { %7388 = vst [vmem:[#allocation158_spill] sm:$0xff] %v5713_v20 }
 0x251   :  { %v5715_v50 = vpop.permute.xlu0 %2392 }
 0x252   :  { %7389 = vst [vmem:[#allocation159_spill] sm:$0xff] %v5715_v50 }
 0x253   :  { %v5717_v39 = vpop.permute.xlu1 %1811 }
 0x254   :  { %7390 = vst [vmem:[#allocation160_spill] sm:$0xff] %v5717_v39 }
 0x255   :  { %v5719_v51 = vpop.permute.xlu0 %1189 }
 0x256   :  { %7391 = vst [vmem:[#allocation161_spill] sm:$0xff] %v5719_v51 }
 0x257   :  { %v5721_v31 = vpop.permute.xlu1 %2294 }
 0x258   :  { %7392 = vst [vmem:[#allocation162_spill] sm:$0xff] %v5721_v31 }
 0x259   :  { %v5723_v38 = vpop.permute.xlu0 %1671 }
 0x25a   :  { %7393 = vst [vmem:[#allocation163_spill] sm:$0xff] %v5723_v38 }
 0x25b   :  { %v5725_v30 = vpop.permute.xlu1 %1091 }
 0x25c   :  { %7394 = vst [vmem:[#allocation164_spill] sm:$0xff] %v5725_v30 }
 0x25d   :  { %v5727_v27 = vpop.permute.xlu0 %1867 }
 0x25e   :  { %7395 = vst [vmem:[#allocation165_spill] sm:$0xff] %v5727_v27 }
 0x25f   :  { %v5729_v23 = vpop.permute.xlu1 %1287 }
 0x260   :  { %7396 = vst [vmem:[#allocation166_spill] sm:$0xff] %v5729_v23  ;;  %v7434_v23 = vld [vmem:[#allocation22_spill] sm:$0xff] }
 0x261   :  { %v5731_v37 = vpop.permute.xlu0 %2350 }
 0x262   :  { %7397 = vst [vmem:[#allocation167_spill] sm:$0xff] %v5731_v37 }
 0x263   :  { %v5733_v46 = vpop.permute.xlu1 %1769 }
 0x264   :  { %7398 = vst [vmem:[#allocation168_spill] sm:$0xff] %v5733_v46 }
 0x265   :  { %v5735_v48 = vpop.permute.xlu0 %1140 }
 0x266   :  { %7399 = vst [vmem:[#allocation169_spill] sm:$0xff] %v5735_v48 }
 0x267   :  { %v5737_v20 = vpop.permute.xlu1 %2252 }
 0x268   :  { %7400 = vst [vmem:[#allocation170_spill] sm:$0xff] %v5737_v20 }
 0x269   :  { %v5739_v45 = vpop.permute.xlu0 %1720 }
 0x26a   :  { %7401 = vst [vmem:[#allocation171_spill] sm:$0xff] %v5739_v45 }
 0x26b   :  { %v5741_v21 = vpop.permute.xlu1 %2448 }
 0x26c   :  { %7402 = vst [vmem:[#allocation172_spill] sm:$0xff] %v5741_v21 }
 0x26d   :  { %v5743_v1 = vpop.permute.xlu0 %2203 }
 0x26e   :  { %7403 = vst [vmem:[#allocation173_spill] sm:$0xff] %v5743_v1 }
 0x26f   :  { %v5745_v38 = vpop.permute.xlu1 %1238 }
 0x270   :  { %7404 = vst [vmem:[#allocation174_spill] sm:$0xff] %v5745_v38 }
 0x271   :  { %v5747_v30 = vpop.permute.xlu0 %2399 }
 0x272   :  { %7405 = vst [vmem:[#allocation175_spill] sm:$0xff] %v5747_v30 }
 0x273   :  { %v5749_v42 = vpop.permute.xlu1 %1818 }
 0x274   :  { %7406 = vst [vmem:[#allocation176_spill] sm:$0xff] %v5749_v42 }
 0x275   :  { %v5751_v13 = vpop.permute.xlu0 %1294 }
 0x276   :  { %7407 = vst [vmem:[#allocation177_spill] sm:$0xff] %v5751_v13  ;;  %v5753_v53 = vpop.f32.mrb[0].mxu0 }
 0x277   :  { %7408 = vst [vmem:[#allocation178_spill] sm:$0xff] %v5753_v53  ;;  %v5755_v32 = vpop.f32.mrb[1].mxu0  ;;  %v5757_v48 = vpop.permute.xlu1 %2301  ;;  %v800_v47 = vmul.f32 %v7414_v2, %v5753_v53 }
 0x278   :  { %7409 = vst [vmem:[#allocation179_spill] sm:$0xff] %v5755_v32  ;;  %7410 = vst [vmem:[#allocation180_spill] sm:$0xff] %v5757_v48 }
 0x279   :  { %v5759_v20 = vpop.permute.xlu0 %1874 }
 0x27a   :  { %7411 = vst [vmem:[#allocation181_spill] sm:$0xff] %v5759_v20  ;;  %v5778_v20 = vmul.f32 %v7414_v2, %v5755_v32 }
 0x27b   :  { %v5761_v45 = vpop.permute.xlu1 %1196 }
 0x27c   :  { %7412 = vst [vmem:[#allocation182_spill] sm:$0xff] %v5761_v45  ;;  %v5763_v54 = vpop.f32.mrb[2].mxu0  ;;  %v3777_v1 = vpop.f32.mrb[0].mxu1  ;;  %7418 = vst [vmem:[#allocation184_spill] sm:$0xff] %v5778_v20 }
 0x27d   :  { %7413 = vst [vmem:[#allocation183_spill] sm:$0xff] %v5763_v54  ;;  %v5767_v29 = vpop.permute.xlu0 %2357  ;;  %v801_v21 = vmul.f32 %v7416_v5, %v5763_v54  ;;  %v5772_v57 = vmul.f32 %v3777_v1, %v7416_v5  ;;  %v5774_v14 = vpop.f32.mrb[3].mxu0 }
 0x27e   :  { %7415 = vst [vmem:[#allocation18_spill] sm:$0xff] %v5767_v29  ;;  %7417 = vst [vmem:[#allocation17_spill] sm:$0xff] %v5774_v14  ;;  %v5782_v27 = vmul.f32 %v7416_v5, %v5774_v14  ;;  %v701_v24 = vpop.f32.mrb[1].mxu1 }
 0x27f   :  { %v808_v53 = vadd.f32 %v801_v21, %v800_v47  ;;  %v5785_v9 = vmul.f32 %v7414_v2, %v701_v24  ;;  %v5787_v55 = vpop.permute.xlu1 %1776 }
 0x280   :  { %7419 = vst [vmem:[#allocation185_spill] sm:$0xff] %v5782_v27  ;;  %7420 = vst [vmem:[#allocation186_spill] sm:$0xff] %v5787_v55  ;;  %v825_v1 = vadd.f32 %v5782_v27, %v5778_v20  ;;  %v5791_v54 = vpop.f32.mrb[4].mxu0  ;;  %v3780_v48 = vpop.f32.mrb[2].mxu1 }
 0x281   :  { %7421 = vst [vmem:[#allocation187_spill] sm:$0xff] %v5791_v54  ;;  %v851_v32 = vadd.f32 %v5772_v57, %v5785_v9  ;;  %v5795_v31 = vpop.permute.xlu0 %1147  ;;  %v802_v5 = vmul.f32 %v5009_v52, %v5791_v54  ;;  %v5799_v47 = vpop.f32.mrb[5].mxu0  ;;  %v846_v54 = vmul.f32 %v3780_v48, %v7427_v40 }
 0x282   :  { %7422 = vst [vmem:[#allocation188_spill] sm:$0xff] %v5795_v31  ;;  %7423 = vst [vmem:[#allocation189_spill] sm:$0xff] %v5799_v47  ;;  %v5803_v21 = vmul.f32 %v5009_v52, %v5799_v47  ;;  %v711_v2 = vpop.f32.mrb[3].mxu1 }
 0x283   :  { %v809_v24 = vadd.f32 %v808_v53, %v802_v5  ;;  %v5806_v14 = vmul.f32 %v5009_v52, %v711_v2  ;;  %v5808_v27 = vpop.permute.xlu1 %2259  ;;  %v7431_v2 = vld [vmem:[#allocation19_spill] sm:$0xff] }
 0x284   :  { %7424 = vst [vmem:[#allocation190_spill] sm:$0xff] %v5803_v21  ;;  %7425 = vst [vmem:[#allocation191_spill] sm:$0xff] %v5808_v27  ;;  %v826_v20 = vadd.f32 %v825_v1, %v5803_v21  ;;  %v5811_v17 = vpop.f32.mrb[6].mxu0  ;;  %v3783_v31 = vpop.f32.mrb[4].mxu1 }
 0x285   :  { %7426 = vst [vmem:[#allocation192_spill] sm:$0xff] %v5811_v17  ;;  %v852_v34 = vadd.f32 %v851_v32, %v5806_v14  ;;  %v5815_v13 = vpop.permute.xlu0 %1727  ;;  %v803_v47 = vmul.f32 %v7427_v40, %v5811_v17  ;;  %v5819_v53 = vpop.f32.mrb[7].mxu0  ;;  %v848_v17 = vmul.f32 %v3783_v31, %v7434_v23 }
 0x286   :  { %7428 = vst [vmem:[#allocation20_spill] sm:$0xff] %v5815_v13  ;;  %7429 = vst [vmem:[#allocation193_spill] sm:$0xff] %v5819_v53  ;;  %v5823_v52 = vmul.f32 %v7427_v40, %v5819_v53  ;;  %v721_v5 = vpop.f32.mrb[5].mxu1 }
 0x287   :  { %v810_v1 = vadd.f32 %v809_v24, %v803_v47  ;;  %v847_v21 = vmul.f32 %v7431_v2, %v721_v5  ;;  %v853_v27 = vadd.f32 %v852_v34, %v846_v54  ;;  %v5826_v8 = vpop.permute.xlu1 %2455 }
 0x288   :  { %7430 = vst [vmem:[#allocation194_spill] sm:$0xff] %v5823_v52  ;;  %7432 = vst [vmem:[#allocation19_spill] sm:$0xff] %v5826_v8  ;;  %v827_v32 = vadd.f32 %v826_v20, %v5823_v52  ;;  %v5829_v48 = vpop.f32.mrb[8].mxu0  ;;  %v3786_v13 = vpop.f32.mrb[6].mxu1  ;;  %v7438_v20 = vld [vmem:[#allocation21_spill] sm:$0xff] }
 0x289   :  { %7433 = vst [vmem:[#allocation195_spill] sm:$0xff] %v5829_v48  ;;  %v854_v36 = vadd.f32 %v853_v27, %v847_v21  ;;  %v5832_v63 = vpop.permute.xlu0 %2308  ;;  %v804_v40 = vmul.f32 %v7431_v2, %v5829_v48  ;;  %v5836_v53 = vpop.f32.mrb[9].mxu0 }
 0x28a   :  { %7435 = vst [vmem:[#allocation22_spill] sm:$0xff] %v5832_v63  ;;  %7436 = vst [vmem:[#allocation196_spill] sm:$0xff] %v5836_v53  ;;  %v5840_v34 = vmul.f32 %v7431_v2, %v5836_v53  ;;  %v731_v47 = vpop.f32.mrb[7].mxu1  ;;  %v850_v63 = vmul.f32 %v3786_v13, %v5025_v10 }
 0x28b   :  { %v811_v24 = vadd.f32 %v810_v1, %v804_v40  ;;  %v849_v5 = vmul.f32 %v7438_v20, %v731_v47  ;;  %v855_v52 = vadd.f32 %v854_v36, %v848_v17  ;;  %v5843_v8 = vpop.permute.xlu1 %1245 }
 0x28c   :  { %7437 = vst [vmem:[#allocation197_spill] sm:$0xff] %v5840_v34  ;;  %7439 = vst [vmem:[#allocation21_spill] sm:$0xff] %v5843_v8  ;;  %v828_v31 = vadd.f32 %v827_v32, %v5840_v34  ;;  %v5846_v27 = vpop.f32.mrb[10].mxu0 }
 0x28d   :  { %7440 = vst [vmem:[#allocation198_spill] sm:$0xff] %v5846_v27  ;;  %v856_v48 = vadd.f32 %v855_v52, %v849_v5  ;;  %v5849_v58 = vpop.permute.xlu0 %1203  ;;  %v805_v2 = vmul.f32 %v7434_v23, %v5846_v27  ;;  %v5853_v53 = vpop.f32.mrb[11].mxu0 }
 0x28e   :  { %7441 = vst [vmem:[#allocation199_spill] sm:$0xff] %v5849_v58  ;;  %7442 = vst [vmem:[#allocation200_spill] sm:$0xff] %v5853_v53  ;;  %v5857_v1 = vmul.f32 %v7434_v23, %v5853_v53 }
 0x28f   :  { %v5859_v36 = vadd.f32 %v856_v48, %v850_v63  ;;  %v812_v40 = vadd.f32 %v811_v24, %v805_v2  ;;  %v5861_v32 = vpop.permute.xlu1 %1825 }
 0x290   :  { %7443 = vst [vmem:[#allocation201_spill] sm:$0xff] %v5857_v1  ;;  %7445 = vst [vmem:[#allocation203_spill] sm:$0xff] %v5861_v32  ;;  %v829_v47 = vadd.f32 %v828_v31, %v5857_v1  ;;  %v5864_v13 = vpop.f32.mrb[12].mxu0 }
 0x291   :  { %7444 = vst [vmem:[#allocation202_spill] sm:$0xff] %v5859_v36  ;;  %7446 = vst [vmem:[#allocation204_spill] sm:$0xff] %v5864_v13  ;;  %4233 = vrcp.f32 %v5859_v36  ;;  %v5867_v52 = vpop.permute.xlu0 %1783  ;;  %v806_v27 = vmul.f32 %v7438_v20, %v5864_v13  ;;  %v5871_v34 = vpop.f32.mrb[13].mxu0 }
 0x292   :  { %7447 = vst [vmem:[#allocation205_spill] sm:$0xff] %v5867_v52  ;;  %7448 = vst [vmem:[#allocation206_spill] sm:$0xff] %v5871_v34  ;;  %v5875_v23 = vmul.f32 %v7438_v20, %v5871_v34 }
 0x293   :  { %v813_v48 = vadd.f32 %v812_v40, %v806_v27  ;;  %v5877_v24 = vpop.permute.xlu1 %2406 }
 0x294   :  { %7449 = vst [vmem:[#allocation207_spill] sm:$0xff] %v5875_v23  ;;  %7450 = vst [vmem:[#allocation208_spill] sm:$0xff] %v5877_v24  ;;  %v830_v31 = vadd.f32 %v829_v47, %v5875_v23  ;;  %v5880_v2 = vpop.f32.mrb[14].mxu0 }
 0x295   :  { %7451 = vst [vmem:[#allocation209_spill] sm:$0xff] %v5880_v2  ;;  %v5882_v53 = vpop.permute.xlu0 %2364  ;;  %v807_v36 = vmul.f32 %v5025_v10, %v5880_v2  ;;  %v5886_v1 = vpop.f32.mrb[15].mxu0 }
 0x296   :  { %7452 = vst [vmem:[#allocation210_spill] sm:$0xff] %v5882_v53  ;;  %7453 = vst [vmem:[#allocation211_spill] sm:$0xff] %v5886_v1  ;;  %v5890_v13 = vmul.f32 %v5025_v10, %v5886_v1 }
 0x297   :  { %v5892_v20 = vadd.f32 %v813_v48, %v807_v36  ;;  %v5894_v27 = vpop.permute.xlu1 %1301  ;;  %v741_v48 = vld [vmem:[%s7001_s6 + $0x4] sm:$0x7] }
 0x298   :  { %7455 = vst [vmem:[#allocation213_spill] sm:$0xff] %v5894_v27  ;;  %v5897_v40 = vadd.f32 %v830_v31, %v5890_v13 }
 0x299   :  { %7454 = vst [vmem:[#allocation212_spill] sm:$0xff] %v5892_v20  ;;  %v5899_v47 = vpop.permute.xlu0 %1252 }
 0x29a   :  { %7456 = vst [vmem:[#allocation214_spill] sm:$0xff] %v5899_v47  ;;  %4235 = vrcp.f32 %v5897_v40 }
 0x29b   :  { %v4234_v34 = vpop.eup %4233  ;;  %v5901_v23 = vpop.permute.xlu1 %1881  ;;  %4237 = vlog2.f32 %v5897_v40 }
 0x29c   :  { %7457 = vst [vmem:[#allocation215_spill] sm:$0xff] %v5901_v23  ;;  %v5904_v2 = vmul.f32 %v4234_v34, %v5785_v9  ;;  %v5907_v24 = vmul.f32 %v4234_v34, %v5772_v57  ;;  %v5910_v10 = vmul.f32 %v4234_v34, %v5806_v14  ;;  %v5912_v36 = vmul.f32 %v4234_v34, %v846_v54 }
 0x29d   :  { %v5917_v31 = vmul.f32 %v4234_v34, %v847_v21  ;;  %v5919_v20 = vmul.f32 %v4234_v34, %v848_v17  ;;  %v5921_v1 = vmul.f32 %v4234_v34, %v849_v5  ;;  %v5923_v9 = vmul.f32 %v4234_v34, %v850_v63  ;;  %v5925_v23 = vpop.permute.xlu0 %2315 }
 0x29e   :  { %7458 = vst [vmem:[#allocation216_spill] sm:$0xff] %v5925_v23  ;;  %v1357_v57 = vmul.f32 %v5371_v41, %v5904_v2  ;;  %v1358_v54 = vmul.f32 %v5405_v43, %v5907_v24  ;;  %v5932_v14 = vrot.slane %v741_v48, %v4740_v28  ;;  %v5935_v21 = vrot.slane %v741_v48, %v4743_v60 }
 0x29f   :  { %v5939_v17 = vrot.slane %v741_v48, %v4753_v19  ;;  %v1359_v63 = vmul.f32 %v5481_v44, %v5910_v10  ;;  %v1365_v5 = vmul.f32 %v5539_v26, %v5904_v2  ;;  %v1366_v43 = vmul.f32 %v5529_v15, %v5907_v24 }
 0x2a0   :  { %v1416_v34 = vadd.f32 %v1358_v54, %v1357_v57  ;;  %v1360_v41 = vmul.f32 %v5587_v62, %v5912_v36  ;;  %v1361_v28 = vmul.f32 %v5665_v4, %v5917_v31  ;;  %v1362_v48 = vmul.f32 %v5719_v51, %v5919_v20  ;;  %v5957_v57 = vpop.permute.xlu1 %2462 }
 0x2a1   :  { %v1367_v19 = vmul.f32 %v5625_v22, %v5910_v10  ;;  %v5955_v44 = vpop.permute.xlu0 %1308  ;;  %7460 = vst [vmem:[#allocation218_spill] sm:$0xff] %v5957_v57  ;;  %v1423_v26 = vadd.f32 %v1366_v43, %v1365_v5  ;;  %v1937_v15 = vmul.f32 %v5399_v11, %v5904_v2  ;;  %v1938_v62 = vmul.f32 %v5429_v18, %v5907_v24 }
 0x2a2   :  { %7459 = vst [vmem:[#allocation217_spill] sm:$0xff] %v5955_v44  ;;  %v1417_v54 = vadd.f32 %v1416_v34, %v1359_v63  ;;  %v1363_v4 = vmul.f32 %v5761_v45, %v5921_v1  ;;  %v1364_v51 = vmul.f32 %v5849_v58, %v5923_v9  ;;  %v1368_v22 = vmul.f32 %v5703_v56, %v5912_v36 }
 0x2a3   :  { %v1369_v60 = vmul.f32 %v5745_v38, %v5917_v31  ;;  %v1424_v43 = vadd.f32 %v1423_v26, %v1367_v19  ;;  %v1939_v34 = vmul.f32 %v5507_v35, %v5910_v10  ;;  %v1996_v5 = vadd.f32 %v1938_v62, %v1937_v15 }
 0x2a4   :  { %v1418_v63 = vadd.f32 %v1417_v54, %v1360_v41  ;;  %v1370_v18 = vmul.f32 %v5843_v8, %v5919_v20  ;;  %v1940_v45 = vmul.f32 %v5593_v12, %v5912_v36  ;;  %v1945_v58 = vmul.f32 %v5545_v3, %v5904_v2  ;;  %v5991_v3 = vpop.permute.xlu1 %1832 }
 0x2a5   :  { %v1946_v56 = vmul.f32 %v5563_v59, %v5907_v24  ;;  %v1425_v38 = vadd.f32 %v1424_v43, %v1368_v22  ;;  %v1941_v19 = vmul.f32 %v5691_v49, %v5917_v31  ;;  %v1997_v41 = vadd.f32 %v1996_v5, %v1939_v34  ;;  %v5989_v8 = vpop.permute.xlu0 %2371  ;;  %7462 = vst [vmem:[#allocation220_spill] sm:$0xff] %v5991_v3  ;;  %v5995_v34 = vpop.eup %4235  ;;  %v7486_v49 = vld [vmem:[#allocation149_spill] sm:$0xff] }
 0x2a6   :  { %v1419_v11 = vadd.f32 %v1418_v63, %v1361_v28  ;;  %v1942_v62 = vmul.f32 %v5733_v46, %v5919_v20  ;;  %v1947_v26 = vmul.f32 %v5651_v6, %v5910_v10  ;;  %v2525_v54 = vmul.f32 %v5505_v33, %v5904_v2  ;;  %7461 = vst [vmem:[#allocation219_spill] sm:$0xff] %v5989_v8  ;;  %v4238_v40 = vpop.eup %4237 }
 0x2a7   :  { %v2003_v15 = vadd.f32 %v1946_v56, %v1945_v58  ;;  %v1426_v22 = vadd.f32 %v1425_v38, %v1369_v60  ;;  %v1998_v63 = vadd.f32 %v1997_v41, %v1940_v45  ;;  %v2526_v43 = vmul.f32 %v5523_v7, %v5907_v24 }
 0x2a8   :  { %v1420_v28 = vadd.f32 %v1419_v11, %v1362_v48  ;;  %v1943_v5 = vmul.f32 %v5787_v55, %v5921_v1  ;;  %v1944_v58 = vmul.f32 %v5867_v52, %v5923_v9  ;;  %v1948_v56 = vmul.f32 %v5717_v39, %v5912_v36 }
 0x2a9   :  { %v2004_v6 = vadd.f32 %v2003_v15, %v1947_v26  ;;  %v1427_v46 = vadd.f32 %v1426_v22, %v1370_v18  ;;  %v1999_v11 = vadd.f32 %v1998_v63, %v1941_v19  ;;  %v1949_v60 = vmul.f32 %v5749_v42, %v5917_v31  ;;  %v6017_v15 = vpop.permute.xlu0 %1259 }
 0x2aa   :  { %v1421_v59 = vadd.f32 %v1420_v28, %v1363_v4  ;;  %v2527_v38 = vmul.f32 %v5627_v25, %v5910_v10  ;;  %v2584_v48 = vadd.f32 %v2526_v43, %v2525_v54  ;;  %v2533_v41 = vmul.f32 %v5667_v0, %v5904_v2  ;;  %7463 = vst [vmem:[#allocation221_spill] sm:$0xff] %v6017_v15  ;;  %v6019_v54 = vpop.permute.xlu1 %2413  ;;  %v7482_v0 = vld [vmem:[#allocation145_spill] sm:$0xff] }
 0x2ab   :  { %v2005_v45 = vadd.f32 %v2004_v6, %v1948_v56  ;;  %v2000_v52 = vadd.f32 %v1999_v11, %v1942_v62  ;;  %v1950_v39 = vmul.f32 %v5861_v32, %v5919_v20  ;;  %v2534_v18 = vmul.f32 %v5657_v16, %v5907_v24  ;;  %7464 = vst [vmem:[#allocation222_spill] sm:$0xff] %v6019_v54  ;;  %v7484_v25 = vld [vmem:[#allocation181_spill] sm:$0xff] }
 0x2ac   :  { %v1422_v55 = vadd.f32 %v1421_v59, %v1364_v51  ;;  %v2528_v19 = vmul.f32 %v5701_v61, %v5912_v36  ;;  %v2529_v6 = vmul.f32 %v5731_v37, %v5917_v31  ;;  %v2585_v26 = vadd.f32 %v2584_v48, %v2527_v38  ;;  %v7466_v48 = vld [vmem:[#allocation208_spill] sm:$0xff]  ;;  %v7483_v37 = vld [vmem:[#allocation165_spill] sm:$0xff] }
 0x2ad   :  { %v2006_v4 = vadd.f32 %v2005_v45, %v1949_v60  ;;  %v2001_v59 = vadd.f32 %v2000_v52, %v1943_v5  ;;  %v2530_v51 = vmul.f32 %v5767_v29, %v5919_v20  ;;  %v2535_v62 = vmul.f32 %v5715_v50, %v5910_v10  ;;  %v7465_v60 = vld [vmem:[#allocation119_spill] sm:$0xff]  ;;  %v7477_v50 = vld [vmem:[#allocation162_spill] sm:$0xff] }
 0x2ae   :  { %v2591_v28 = vadd.f32 %v2534_v18, %v2533_v41  ;;  %v2586_v63 = vadd.f32 %v2585_v26, %v2528_v19  ;;  %v2536_v43 = vmul.f32 %v5747_v30, %v5912_v36  ;;  %v6031_v56 = vmul.f32 %v5995_v34, %v5890_v13  ;;  %v7467_v18 = vld [vmem:[#allocation124_spill] sm:$0xff]  ;;  %v7468_v26 = vld [vmem:[#allocation146_spill] sm:$0xff]  ;;  %v7470_v30 = vld [vmem:[#allocation91_spill] sm:$0xff] }
 0x2af   :  { %v6025_v22 = vadd.f32 %v2006_v4, %v1950_v39  ;;  %v6033_v11 = vadd.f32 %v2001_v59, %v1944_v58  ;;  %v1371_v5 = vmul.f32 %v5899_v47, %v5921_v1  ;;  %v1373_v45 = vmul.f32 %v7465_v60, %v5904_v2  ;;  %v6056_v60 = vpop.permute.xlu1 %1888 }
 0x2b0   :  { %v2592_v52 = vadd.f32 %v2591_v28, %v2535_v62  ;;  %v2587_v38 = vadd.f32 %v2586_v63, %v2529_v6  ;;  %v2531_v39 = vmul.f32 %v5882_v53, %v5921_v1  ;;  %v2537_v41 = vmul.f32 %v7466_v48, %v5917_v31  ;;  %v7469_v6 = vld [vmem:[#allocation166_spill] sm:$0xff]  ;;  %v6054_v48 = vpop.permute.xlu0 %2420  ;;  %7472 = vst [vmem:[#allocation224_spill] sm:$0xff] %v6056_v60 }
 0x2b1   :  { %v1374_v13 = vmul.f32 %v7467_v18, %v5907_v24  ;;  %v6046_v58 = vmul.f32 %v5932_v14, %v1422_v55  ;;  %v1428_v19 = vadd.f32 %v1427_v46, %v1371_v5  ;;  %v1375_v59 = vmul.f32 %v7468_v26, %v5910_v10  ;;  %7471 = vst [vmem:[#allocation223_spill] sm:$0xff] %v6054_v48  ;;  %v7473_v55 = vld [vmem:[#allocation177_spill] sm:$0xff] }
 0x2b2   :  { %v2593_v4 = vadd.f32 %v2592_v52, %v2536_v43  ;;  %v2588_v62 = vadd.f32 %v2587_v38, %v2530_v51  ;;  %v1376_v28 = vmul.f32 %v7469_v6, %v5912_v36  ;;  %v2517_v32 = vmul.f32 %v7470_v30, %v5904_v2  ;;  %v7474_v51 = vld [vmem:[#allocation96_spill] sm:$0xff]  ;;  %v7476_v6 = vld [vmem:[#allocation137_spill] sm:$0xff] }
 0x2b3   :  { %v1430_v63 = vadd.f32 %v1374_v13, %v1373_v45  ;;  %v1377_v43 = vmul.f32 %v7473_v55, %v5917_v31  ;;  %v1378_v46 = vmul.f32 %v5894_v27, %v5919_v20  ;;  %v2518_v52 = vmul.f32 %v7474_v51, %v5907_v24  ;;  %v7475_v45 = vld [vmem:[#allocation115_spill] sm:$0xff]  ;;  %v7479_v27 = vld [vmem:[#allocation128_spill] sm:$0xff] }
 0x2b4   :  { %v2594_v18 = vadd.f32 %v2593_v4, %v2537_v41  ;;  %v2589_v5 = vadd.f32 %v2588_v62, %v2531_v39  ;;  %v2519_v13 = vmul.f32 %v7475_v45, %v5910_v10  ;;  %v2520_v26 = vmul.f32 %v7476_v6, %v5912_v36  ;;  %v7478_v4 = vld [vmem:[#allocation180_spill] sm:$0xff]  ;;  %v7480_v39 = vld [vmem:[#allocation22_spill] sm:$0xff]  ;;  %v7481_v62 = vld [vmem:[#allocation125_spill] sm:$0xff]  ;;  %v6090_v33 = vpop.permute.xlu0 %1895 }
 0x2b5   :  { %v1431_v38 = vadd.f32 %v1430_v63, %v1375_v59  ;;  %v2521_v41 = vmul.f32 %v7477_v50, %v5917_v31  ;;  %v2522_v55 = vmul.f32 %v7478_v4, %v5919_v20  ;;  %v2577_v42 = vadd.f32 %v2518_v52, %v2517_v32  ;;  %v7485_v52 = vld [vmem:[#allocation215_spill] sm:$0xff]  ;;  %7488 = vst [vmem:[#allocation225_spill] sm:$0xff] %v6090_v33  ;;  %v7512_v45 = vld [vmem:[#allocation44_spill] sm:$0xff] }
 0x2b6   :  { %v1953_v47 = vmul.f32 %v7479_v27, %v5904_v2  ;;  %v2523_v59 = vmul.f32 %v7480_v39, %v5921_v1  ;;  %v1954_v63 = vmul.f32 %v7481_v62, %v5907_v24  ;;  %v1955_v53 = vmul.f32 %v7482_v0, %v5910_v10  ;;  %v7487_v62 = vld [vmem:[#allocation154_spill] sm:$0xff]  ;;  %v7511_v4 = vld [vmem:[#allocation35_spill] sm:$0xff]  ;;  %v7513_v30 = vld [vmem:[#allocation56_spill] sm:$0xff] }
 0x2b7   :  { %v1432_v16 = vadd.f32 %v1431_v38, %v1376_v28  ;;  %v2578_v29 = vadd.f32 %v2577_v42, %v2519_v13  ;;  %v1956_v61 = vmul.f32 %v7483_v37, %v5912_v36  ;;  %v1957_v32 = vmul.f32 %v7484_v25, %v5917_v31  ;;  %v6092_v42 = vpop.permute.xlu1 %2469  ;;  %v7490_v25 = vld [vmem:[#allocation172_spill] sm:$0xff] }
 0x2b8   :  { %v1958_v27 = vmul.f32 %v7485_v52, %v5919_v20  ;;  %v2010_v38 = vadd.f32 %v1954_v63, %v1953_v47  ;;  %v2541_v12 = vmul.f32 %v7486_v49, %v5904_v2  ;;  %v2542_v7 = vmul.f32 %v7487_v62, %v5907_v24  ;;  %7489 = vst [vmem:[#allocation226_spill] sm:$0xff] %v6092_v42 }
 0x2b9   :  { %v1433_v28 = vadd.f32 %v1432_v16, %v1377_v43  ;;  %v2579_v13 = vadd.f32 %v2578_v29, %v2520_v26  ;;  %v1379_v37 = vmul.f32 %v5955_v44, %v5921_v1  ;;  %v2543_v0 = vmul.f32 %v7490_v25, %v5910_v10  ;;  %v7491_v16 = vld [vmem:[#allocation19_spill] sm:$0xff] }
 0x2ba   :  { %v2544_v47 = vmul.f32 %v7491_v16, %v5912_v36  ;;  %v2011_v63 = vadd.f32 %v2010_v38, %v1955_v53  ;;  %v2598_v52 = vadd.f32 %v2542_v7, %v2541_v12  ;;  %v2532_v62 = vmul.f32 %v5989_v8, %v5923_v9 }
 0x2bb   :  { %v1434_v43 = vadd.f32 %v1433_v28, %v1378_v46  ;;  %v2580_v49 = vadd.f32 %v2579_v13, %v2521_v41  ;;  %v1951_v35 = vmul.f32 %v5991_v3, %v5921_v1  ;;  %v1372_v29 = vmul.f32 %v6017_v15, %v5923_v9  ;;  %v6115_v15 = vpop.permute.xlu0 %2427 }
 0x2bc   :  { %v2538_v26 = vmul.f32 %v6019_v54, %v5919_v20  ;;  %v2012_v25 = vadd.f32 %v2011_v63, %v1956_v61  ;;  %v2599_v16 = vadd.f32 %v2598_v52, %v2543_v0  ;;  %v2590_v46 = vadd.f32 %v2589_v5, %v2532_v62  ;;  %7492 = vst [vmem:[#allocation227_spill] sm:$0xff] %v6115_v15  ;;  %v6117_v61 = vpop.permute.xlu1 %1839  ;;  %v7494_v62 = vld [vmem:[#allocation23_spill] sm:$0xff] }
 0x2bd   :  { %v6108_v44 = vadd.f32 %v1434_v43, %v1379_v37  ;;  %v2581_v53 = vadd.f32 %v2580_v49, %v2522_v55  ;;  %v2008_v7 = vadd.f32 %v6025_v22, %v1951_v35  ;;  %v1429_v12 = vadd.f32 %v1428_v19, %v1372_v29  ;;  %7493 = vst [vmem:[#allocation228_spill] sm:$0xff] %v6117_v61 }
 0x2be   :  { %v2595_v28 = vadd.f32 %v2594_v18, %v2538_v26  ;;  %v2013_v41 = vadd.f32 %v2012_v25, %v1957_v32  ;;  %v2545_v38 = vmul.f32 %v5957_v57, %v5917_v31  ;;  %v2600_v13 = vadd.f32 %v2599_v16, %v2544_v47  ;;  %v7495_v16 = vld [vmem:[#allocation25_spill] sm:$0xff] }
 0x2bf   :  { %v2539_v3 = vmul.f32 %v6054_v48, %v5921_v1  ;;  %v2582_v37 = vadd.f32 %v2581_v53, %v2523_v59  ;;  %v2524_v0 = vmul.f32 %v5925_v23, %v5923_v9  ;;  %v1959_v35 = vmul.f32 %v6056_v60, %v5921_v1 }
 0x2c0   :  { %v1960_v25 = vmul.f32 %v6090_v33, %v5923_v9  ;;  %v2014_v49 = vadd.f32 %v2013_v41, %v1958_v27  ;;  %v2601_v22 = vadd.f32 %v2600_v13, %v2545_v38  ;;  %v2546_v19 = vmul.f32 %v6092_v42, %v5919_v20  ;;  %v7498_v13 = vld [vmem:[#allocation52_spill] sm:$0xff]  ;;  %v7504_v33 = vld [vmem:[#allocation33_spill] sm:$0xff] }
 0x2c1   :  { %v2596_v18 = vadd.f32 %v2595_v28, %v2539_v3  ;;  %v6127_v55 = vadd.f32 %v2582_v37, %v2524_v0  ;;  %v2540_v5 = vmul.f32 %v6115_v15, %v5923_v9  ;;  %v1952_v59 = vmul.f32 %v6117_v61, %v5923_v9  ;;  %v7496_v28 = vld [vmem:[#allocation26_spill] sm:$0xff] }
 0x2c2   :  { %v1317_v32 = vmul.f32 %v7494_v62, %v5904_v2  ;;  %v6137_v52 = vmul.f32 %v5935_v21, %v6033_v11  ;;  %v2015_v27 = vadd.f32 %v2014_v49, %v1959_v35  ;;  %v6139_v3 = vadd.f32 %v2601_v22, %v2546_v19  ;;  %v7497_v11 = vld [vmem:[#allocation38_spill] sm:$0xff]  ;;  %v7501_v22 = vld [vmem:[#allocation103_spill] sm:$0xff] }
 0x2c3   :  { %v1318_v47 = vmul.f32 %v7495_v16, %v5907_v24  ;;  %v6144_v43 = vmul.f32 %v5939_v17, %v2590_v46  ;;  %v6147_v63 = vmul.f32 %v5932_v14, %v1429_v12  ;;  %v2597_v29 = vadd.f32 %v2596_v18, %v2540_v5  ;;  %v7499_v46 = vld [vmem:[#allocation66_spill] sm:$0xff]  ;;  %v7500_v12 = vld [vmem:[#allocation16_spill] sm:$0xff] }
 0x2c4   :  { %v2009_v26 = vadd.f32 %v2008_v7, %v1952_v59  ;;  %v2016_v53 = vadd.f32 %v2015_v27, %v1960_v25  ;;  %v1319_v41 = vmul.f32 %v7496_v28, %v5910_v10  ;;  %v1320_v38 = vmul.f32 %v7497_v11, %v5912_v36  ;;  %v7502_v19 = vld [vmem:[#allocation30_spill] sm:$0xff]  ;;  %v7503_v59 = vld [vmem:[#allocation29_spill] sm:$0xff] }
 0x2c5   :  { %v1321_v37 = vmul.f32 %v7498_v13, %v5917_v31  ;;  %v6156_v0 = vmul.f32 %v5939_v17, %v2597_v29  ;;  %v1322_v35 = vmul.f32 %v7499_v46, %v5919_v20  ;;  %v1323_v49 = vmul.f32 %v7500_v12, %v5921_v1  ;;  %v7507_v15 = vld [vmem:[#allocation70_spill] sm:$0xff] }
 0x2c6   :  { %v1381_v7 = vadd.f32 %v1318_v47, %v1317_v32  ;;  %v6163_v25 = vmul.f32 %v5935_v21, %v2009_v26  ;;  %v1324_v18 = vmul.f32 %v7501_v22, %v5923_v9  ;;  %v1897_v5 = vmul.f32 %v7502_v19, %v5904_v2  ;;  %v7505_v32 = vld [vmem:[#allocation43_spill] sm:$0xff]  ;;  %v7506_v26 = vld [vmem:[#allocation54_spill] sm:$0xff] }
 0x2c7   :  { %v1898_v27 = vmul.f32 %v7503_v59, %v5907_v24  ;;  %v6172_v29 = vmul.f32 %v5935_v21, %v2016_v53  ;;  %v1899_v57 = vmul.f32 %v7504_v33, %v5910_v10  ;;  %v1900_v47 = vmul.f32 %v7505_v32, %v5912_v36  ;;  %v7508_v61 = vld [vmem:[#allocation34_spill] sm:$0xff] }
 0x2c8   :  { %v1382_v42 = vadd.f32 %v1381_v7, %v1319_v41  ;;  %v1901_v60 = vmul.f32 %v7506_v26, %v5917_v31  ;;  %v1902_v48 = vmul.f32 %v7507_v15, %v5919_v20  ;;  %v2485_v8 = vmul.f32 %v7508_v61, %v5904_v2  ;;  %v7509_v53 = vld [vmem:[#allocation90_spill] sm:$0xff]  ;;  %v7510_v7 = vld [vmem:[#allocation112_spill] sm:$0xff] }
 0x2c9   :  { %v1961_v54 = vadd.f32 %v1898_v27, %v1897_v5  ;;  %v1903_v41 = vmul.f32 %v7509_v53, %v5921_v1  ;;  %v1904_v39 = vmul.f32 %v7510_v7, %v5923_v9  ;;  %v2486_v50 = vmul.f32 %v7511_v4, %v5907_v24  ;;  %v7514_v27 = vld [vmem:[#allocation74_spill] sm:$0xff]  ;;  %v7516_v7 = vld [vmem:[#allocation24_spill] sm:$0xff] }
 0x2ca   :  { %v1383_v23 = vadd.f32 %v1382_v42, %v1320_v38  ;;  %v2487_v51 = vmul.f32 %v7512_v45, %v5910_v10  ;;  %v2488_v5 = vmul.f32 %v7513_v30, %v5912_v36  ;;  %v2489_v15 = vmul.f32 %v7514_v27, %v5917_v31  ;;  %v7515_v38 = vld [vmem:[#allocation89_spill] sm:$0xff]  ;;  %v7518_v45 = vld [vmem:[#allocation135_spill] sm:$0xff] }
 0x2cb   :  { %v1962_v6 = vadd.f32 %v1961_v54, %v1899_v57  ;;  %v2490_v53 = vmul.f32 %v7515_v38, %v5919_v20  ;;  %v2549_v26 = vadd.f32 %v2486_v50, %v2485_v8  ;;  %v1325_v32 = vmul.f32 %v7516_v7, %v5904_v2  ;;  %v7517_v57 = vld [vmem:[#allocation113_spill] sm:$0xff]  ;;  %v7519_v30 = vld [vmem:[#allocation27_spill] sm:$0xff] }
 0x2cc   :  { %v1384_v42 = vadd.f32 %v1383_v23, %v1321_v37  ;;  %v2491_v54 = vmul.f32 %v7517_v57, %v5921_v1  ;;  %v2492_v4 = vmul.f32 %v7518_v45, %v5923_v9  ;;  %v1326_v61 = vmul.f32 %v7519_v30, %v5907_v24  ;;  %v7520_v23 = vld [vmem:[#allocation28_spill] sm:$0xff]  ;;  %v7521_v8 = vld [vmem:[#allocation47_spill] sm:$0xff] }
 0x2cd   :  { %v1963_v22 = vadd.f32 %v1962_v6, %v1900_v47  ;;  %v2550_v27 = vadd.f32 %v2549_v26, %v2487_v51  ;;  %v1327_v37 = vmul.f32 %v7520_v23, %v5910_v10  ;;  %v1328_v50 = vmul.f32 %v7521_v8, %v5912_v36  ;;  %v7522_v6 = vld [vmem:[#allocation61_spill] sm:$0xff]  ;;  %v7523_v57 = vld [vmem:[#allocation15_spill] sm:$0xff]  ;;  %v7524_v30 = vld [vmem:[#allocation32_spill] sm:$0xff] }
 0x2ce   :  { %v1385_v33 = vadd.f32 %v1384_v42, %v1322_v35  ;;  %v1329_v47 = vmul.f32 %v7522_v6, %v5917_v31  ;;  %v1330_v7 = vmul.f32 %v7523_v57, %v5919_v20  ;;  %v1388_v12 = vadd.f32 %v1326_v61, %v1325_v32  ;;  %v7525_v51 = vld [vmem:[#allocation31_spill] sm:$0xff]  ;;  %v7526_v23 = vld [vmem:[#allocation93_spill] sm:$0xff] }
 0x2cf   :  { %v1964_v38 = vadd.f32 %v1963_v22, %v1901_v60  ;;  %v2551_v46 = vadd.f32 %v2550_v27, %v2488_v5  ;;  %v1905_v35 = vmul.f32 %v7524_v30, %v5904_v2  ;;  %v1906_v26 = vmul.f32 %v7525_v51, %v5907_v24  ;;  %v7527_v60 = vld [vmem:[#allocation120_spill] sm:$0xff]  ;;  %v7528_v61 = vld [vmem:[#allocation37_spill] sm:$0xff]  ;;  %v7530_v57 = vld [vmem:[#allocation63_spill] sm:$0xff] }
 0x2d0   :  { %v1386_v45 = vadd.f32 %v1385_v33, %v1323_v49  ;;  %v1331_v8 = vmul.f32 %v7526_v23, %v5921_v1  ;;  %v1332_v22 = vmul.f32 %v7527_v60, %v5923_v9  ;;  %v1389_v6 = vadd.f32 %v1388_v12, %v1327_v37  ;;  %v7529_v49 = vld [vmem:[#allocation48_spill] sm:$0xff] }
 0x2d1   :  { %v1965_v42 = vadd.f32 %v1964_v38, %v1902_v48  ;;  %v2552_v59 = vadd.f32 %v2551_v46, %v2489_v15  ;;  %v1907_v33 = vmul.f32 %v7528_v61, %v5910_v10  ;;  %v1908_v32 = vmul.f32 %v7529_v49, %v5912_v36  ;;  %v7531_v38 = vld [vmem:[#allocation78_spill] sm:$0xff]  ;;  %v7532_v60 = vld [vmem:[#allocation100_spill] sm:$0xff] }
 0x2d2   :  { %v1387_v13 = vadd.f32 %v1386_v45, %v1324_v18  ;;  %v1390_v27 = vadd.f32 %v1389_v6, %v1328_v50  ;;  %v1909_v48 = vmul.f32 %v7530_v57, %v5917_v31  ;;  %v1910_v23 = vmul.f32 %v7531_v38, %v5919_v20  ;;  %v7533_v15 = vld [vmem:[#allocation36_spill] sm:$0xff] }
 0x2d3   :  { %v1966_v5 = vadd.f32 %v1965_v42, %v1903_v41  ;;  %v2553_v51 = vadd.f32 %v2552_v59, %v2490_v53  ;;  %v1911_v12 = vmul.f32 %v7532_v60, %v5921_v1  ;;  %v1968_v45 = vadd.f32 %v1906_v26, %v1905_v35  ;;  %v7534_v41 = vld [vmem:[#allocation39_spill] sm:$0xff]  ;;  %v7535_v42 = vld [vmem:[#allocation121_spill] sm:$0xff] }
 0x2d4   :  { %v2493_v46 = vmul.f32 %v7533_v15, %v5904_v2  ;;  %v1441_v18 = vmul.f32 %v5932_v14, %v1387_v13  ;;  %v1391_v49 = vadd.f32 %v1390_v27, %v1329_v47  ;;  %v2494_v50 = vmul.f32 %v7534_v41, %v5907_v24  ;;  %v7536_v59 = vld [vmem:[#allocation53_spill] sm:$0xff]  ;;  %v7542_v41 = vld [vmem:[#allocation130_spill] sm:$0xff] }
 0x2d5   :  { %v1967_v37 = vadd.f32 %v1966_v5, %v1904_v39  ;;  %v2554_v6 = vadd.f32 %v2553_v51, %v2491_v54  ;;  %v1912_v57 = vmul.f32 %v7535_v42, %v5923_v9  ;;  %v1969_v38 = vadd.f32 %v1968_v45, %v1907_v33  ;;  %v7537_v60 = vld [vmem:[#allocation65_spill] sm:$0xff]  ;;  %v7538_v39 = vld [vmem:[#allocation82_spill] sm:$0xff]  ;;  %v7539_v54 = vld [vmem:[#allocation99_spill] sm:$0xff] }
 0x2d6   :  { %v2495_v53 = vmul.f32 %v7536_v59, %v5910_v10  ;;  %v1392_v26 = vadd.f32 %v1391_v49, %v1330_v7  ;;  %v2496_v15 = vmul.f32 %v7537_v60, %v5912_v36  ;;  %v2497_v13 = vmul.f32 %v7538_v39, %v5917_v31  ;;  %v7540_v45 = vld [vmem:[#allocation41_spill] sm:$0xff] }
 0x2d7   :  { %v2021_v35 = vmul.f32 %v5935_v21, %v1967_v37  ;;  %v2555_v47 = vadd.f32 %v2554_v6, %v2492_v4  ;;  %v1970_v5 = vadd.f32 %v1969_v38, %v1908_v32  ;;  %v2498_v51 = vmul.f32 %v7539_v54, %v5919_v20  ;;  %v7541_v37 = vld [vmem:[#allocation40_spill] sm:$0xff]  ;;  %v7543_v38 = vld [vmem:[#allocation150_spill] sm:$0xff] }
 0x2d8   :  { %v2556_v27 = vadd.f32 %v2494_v50, %v2493_v46  ;;  %v1393_v33 = vadd.f32 %v1392_v26, %v1331_v8  ;;  %v1333_v59 = vmul.f32 %v7540_v45, %v5904_v2  ;;  %v1334_v7 = vmul.f32 %v7541_v37, %v5907_v24  ;;  %v7544_v46 = vld [vmem:[#allocation55_spill] sm:$0xff] }
 0x2d9   :  { %v2029_v42 = vadd.f32 %v2021_v35, %v1441_v18  ;;  %v2609_v49 = vmul.f32 %v5939_v17, %v2555_v47  ;;  %v1971_v60 = vadd.f32 %v1970_v5, %v1909_v48  ;;  %v2499_v39 = vmul.f32 %v7542_v41, %v5921_v1  ;;  %v7545_v18 = vld [vmem:[#allocation69_spill] sm:$0xff]  ;;  %v7546_v47 = vld [vmem:[#allocation88_spill] sm:$0xff] }
 0x2da   :  { %v2557_v4 = vadd.f32 %v2556_v27, %v2495_v53  ;;  %v1394_v32 = vadd.f32 %v1393_v33, %v1332_v22  ;;  %v2500_v6 = vmul.f32 %v7543_v38, %v5923_v9  ;;  %v1335_v8 = vmul.f32 %v7544_v46, %v5910_v10  ;;  %v7547_v5 = vld [vmem:[#allocation108_spill] sm:$0xff]  ;;  %v7548_v22 = vld [vmem:[#allocation129_spill] sm:$0xff]  ;;  %v7549_v33 = vld [vmem:[#allocation42_spill] sm:$0xff] }
 0x2db   :  { %v1336_v50 = vmul.f32 %v7545_v18, %v5912_v36  ;;  %v2617_v35 = vadd.f32 %v2609_v49, %v2029_v42  ;;  %v1972_v26 = vadd.f32 %v1971_v60, %v1910_v23  ;;  %v1337_v48 = vmul.f32 %v7546_v47, %v5917_v31  ;;  %v7550_v23 = vld [vmem:[#allocation45_spill] sm:$0xff] }
 0x2dc   :  { %v2558_v54 = vadd.f32 %v2557_v4, %v2496_v15  ;;  %v1338_v41 = vmul.f32 %v7547_v5, %v5919_v20  ;;  %v1339_v53 = vmul.f32 %v7548_v22, %v5921_v1  ;;  %v1395_v27 = vadd.f32 %v1334_v7, %v1333_v59  ;;  %v7551_v15 = vld [vmem:[#allocation151_spill] sm:$0xff]  ;;  %v7552_v5 = vld [vmem:[#allocation57_spill] sm:$0xff] }
 0x2dd   :  { %v1913_v38 = vmul.f32 %v7549_v33, %v5904_v2  ;;  %3819 = vmatprep.mubr.f32.mxu1 %v2617_v35  ;;  %v1442_v46 = vmul.f32 %v5932_v14, %v1394_v32  ;;  %v1973_v18 = vadd.f32 %v1972_v26, %v1911_v12  ;;  %v1914_v60 = vmul.f32 %v7550_v23, %v5907_v24  ;;  %v7553_v59 = vld [vmem:[#allocation73_spill] sm:$0xff]  ;;  %v7554_v35 = vld [vmem:[#allocation87_spill] sm:$0xff] }
 0x2de   :  { %v2559_v42 = vadd.f32 %v2558_v54, %v2497_v13  ;;  %v1340_v49 = vmul.f32 %v7551_v15, %v5923_v9  ;;  %v1396_v4 = vadd.f32 %v1395_v27, %v1335_v8  ;;  %v1915_v47 = vmul.f32 %v7552_v5, %v5910_v10  ;;  %v7555_v12 = vld [vmem:[#allocation109_spill] sm:$0xff]  ;;  %v7556_v23 = vld [vmem:[#allocation59_spill] sm:$0xff]  ;;  %v7557_v8 = vld [vmem:[#allocation58_spill] sm:$0xff] }
 0x2df   :  { %v1916_v7 = vmul.f32 %v7553_v59, %v5912_v36  ;;  %v1974_v22 = vadd.f32 %v1973_v18, %v1912_v57  ;;  %v1917_v32 = vmul.f32 %v7554_v35, %v5917_v31  ;;  %v1918_v13 = vmul.f32 %v7555_v12, %v5919_v20  ;;  %v7558_v57 = vld [vmem:[#allocation136_spill] sm:$0xff]  ;;  %v7559_v18 = vld [vmem:[#allocation158_spill] sm:$0xff]  ;;  %v6291_v35 = vpop.permute.xlu1 %1315 }
 0x2e0   :  { %v2560_v33 = vadd.f32 %v2559_v42, %v2498_v51  ;;  %v1397_v54 = vadd.f32 %v1396_v4, %v1336_v50  ;;  %v1975_v26 = vadd.f32 %v1914_v60, %v1913_v38  ;;  %v2501_v15 = vmul.f32 %v7556_v23, %v5904_v2  ;;  %7560 = vst [vmem:[#allocation23_spill] sm:$0xff] %v6291_v35  ;;  %v7561_v38 = vld [vmem:[#allocation77_spill] sm:$0xff]  ;;  %v7562_v4 = vld [vmem:[#allocation94_spill] sm:$0xff] }
 0x2e1   :  { %v2502_v27 = vmul.f32 %v7557_v8, %v5907_v24  ;;  %v2022_v5 = vmul.f32 %v5935_v21, %v1974_v22  ;;  %v1919_v51 = vmul.f32 %v7558_v57, %v5921_v1  ;;  %v1920_v42 = vmul.f32 %v7559_v18, %v5923_v9 }
 0x2e2   :  { %v2561_v37 = vadd.f32 %v2560_v33, %v2499_v39  ;;  %v1398_v12 = vadd.f32 %v1397_v54, %v1337_v48  ;;  %v1976_v50 = vadd.f32 %v1975_v26, %v1915_v47  ;;  %v2503_v60 = vmul.f32 %v7561_v38, %v5910_v10  ;;  %v7563_v39 = vld [vmem:[#allocation118_spill] sm:$0xff]  ;;  %v7564_v33 = vld [vmem:[#allocation140_spill] sm:$0xff]  ;;  %v7565_v54 = vld [vmem:[#allocation157_spill] sm:$0xff] }
 0x2e3   :  { %v2504_v59 = vmul.f32 %v7562_v4, %v5912_v36  ;;  %v2030_v8 = vadd.f32 %v2022_v5, %v1442_v46  ;;  %v2505_v22 = vmul.f32 %v7563_v39, %v5917_v31  ;;  %v2506_v57 = vmul.f32 %v7564_v33, %v5919_v20  ;;  %v7566_v46 = vld [vmem:[#allocation46_spill] sm:$0xff] }
 0x2e4   :  { %v2562_v23 = vadd.f32 %v2561_v37, %v2500_v6  ;;  %v1399_v45 = vadd.f32 %v1398_v12, %v1338_v41  ;;  %v1977_v18 = vadd.f32 %v1976_v50, %v1916_v7  ;;  %v2563_v61 = vadd.f32 %v2502_v27, %v2501_v15  ;;  %v7567_v6 = vld [vmem:[#allocation49_spill] sm:$0xff]  ;;  %v7570_v50 = vld [vmem:[#allocation79_spill] sm:$0xff] }
 0x2e5   :  { %v1380_v47 = vmul.f32 %v6291_v35, %v5923_v9  ;;  %v2507_v26 = vmul.f32 %v7565_v54, %v5921_v1  ;;  %v1341_v37 = vmul.f32 %v7566_v46, %v5904_v2  ;;  %v1342_v5 = vmul.f32 %v7567_v6, %v5907_v24  ;;  %v7568_v7 = vld [vmem:[#allocation173_spill] sm:$0xff]  ;;  %v7571_v6 = vld [vmem:[#allocation98_spill] sm:$0xff] }
 0x2e6   :  { %v2610_v48 = vmul.f32 %v5939_v17, %v2562_v23  ;;  %v1400_v39 = vadd.f32 %v1399_v45, %v1339_v53  ;;  %v1978_v4 = vadd.f32 %v1977_v18, %v1917_v32  ;;  %v2564_v33 = vadd.f32 %v2563_v61, %v2503_v60  ;;  %v7569_v23 = vld [vmem:[#allocation60_spill] sm:$0xff] }
 0x2e7   :  { %v1436_v41 = vadd.f32 %v6108_v44, %v1380_v47  ;;  %v2508_v12 = vmul.f32 %v7568_v7, %v5923_v9  ;;  %v1343_v27 = vmul.f32 %v7569_v23, %v5910_v10  ;;  %v1344_v35 = vmul.f32 %v7570_v50, %v5912_v36  ;;  %v7572_v44 = vld [vmem:[#allocation117_spill] sm:$0xff]  ;;  %v7581_v7 = vld [vmem:[#allocation64_spill] sm:$0xff] }
 0x2e8   :  { %v2618_v15 = vadd.f32 %v2610_v48, %v2030_v8  ;;  %v1401_v54 = vadd.f32 %v1400_v39, %v1340_v49  ;;  %v1979_v46 = vadd.f32 %v1978_v4, %v1918_v13  ;;  %v2565_v38 = vadd.f32 %v2564_v33, %v2504_v59  ;;  %v7573_v8 = vld [vmem:[#allocation51_spill] sm:$0xff]  ;;  %v7574_v49 = vld [vmem:[#allocation144_spill] sm:$0xff]  ;;  %v7575_v59 = vld [vmem:[#allocation50_spill] sm:$0xff] }
 0x2e9   :  { %v1345_v45 = vmul.f32 %v7571_v6, %v5917_v31  ;;  %v6320_v61 = vmul.f32 %v5932_v14, %v1436_v41  ;;  %v1346_v53 = vmul.f32 %v7572_v44, %v5919_v20  ;;  %v1402_v32 = vadd.f32 %v1342_v5, %v1341_v37  ;;  %v7576_v33 = vld [vmem:[#allocation164_spill] sm:$0xff]  ;;  %v7580_v6 = vld [vmem:[#allocation126_spill] sm:$0xff] }
 0x2ea   :  { %3820 = vmatmul.mubr.f32.vlgmr.msra.gmra.mrb[8].mxu1 %v2618_v15  ;;  %v1921_v18 = vmul.f32 %v7573_v8, %v5904_v2  ;;  %v1980_v60 = vadd.f32 %v1979_v46, %v1919_v51  ;;  %v2566_v47 = vadd.f32 %v2565_v38, %v2505_v22  ;;  %v1347_v13 = vmul.f32 %v7574_v49, %v5921_v1  ;;  %v7577_v15 = vld [vmem:[#allocation62_spill] sm:$0xff]  ;;  %v7578_v51 = vld [vmem:[#allocation83_spill] sm:$0xff]  ;;  %v7579_v22 = vld [vmem:[#allocation97_spill] sm:$0xff] }
 0x2eb   :  { %v1922_v4 = vmul.f32 %v7575_v59, %v5907_v24  ;;  %v1443_v39 = vmul.f32 %v5932_v14, %v1401_v54  ;;  %v1348_v48 = vmul.f32 %v7576_v33, %v5923_v9  ;;  %v1403_v41 = vadd.f32 %v1402_v32, %v1343_v27 }
 0x2ec   :  { %v1923_v37 = vmul.f32 %v7577_v15, %v5910_v10  ;;  %v1981_v5 = vadd.f32 %v1980_v60, %v1920_v42  ;;  %v2567_v44 = vadd.f32 %v2566_v47, %v2506_v57  ;;  %v1924_v38 = vmul.f32 %v7578_v51, %v5912_v36  ;;  %v7582_v42 = vld [vmem:[#allocation143_spill] sm:$0xff] }
 0x2ed   :  { %v1925_v46 = vmul.f32 %v7579_v22, %v5917_v31  ;;  %v1404_v49 = vadd.f32 %v1403_v41, %v1344_v35  ;;  %v1926_v50 = vmul.f32 %v7580_v6, %v5919_v20  ;;  %v1982_v54 = vadd.f32 %v1922_v4, %v1921_v18  ;;  %v7583_v60 = vld [vmem:[#allocation67_spill] sm:$0xff]  ;;  %v7585_v6 = vld [vmem:[#allocation86_spill] sm:$0xff] }
 0x2ee   :  { %v2509_v33 = vmul.f32 %v7581_v7, %v5904_v2  ;;  %v2023_v27 = vmul.f32 %v5935_v21, %v1981_v5  ;;  %v2568_v32 = vadd.f32 %v2567_v44, %v2507_v26  ;;  %v1927_v57 = vmul.f32 %v7582_v42, %v5921_v1  ;;  %v7584_v22 = vld [vmem:[#allocation163_spill] sm:$0xff]  ;;  %v7586_v7 = vld [vmem:[#allocation104_spill] sm:$0xff] }
 0x2ef   :  { %v2510_v47 = vmul.f32 %v7583_v60, %v5907_v24  ;;  %v1405_v51 = vadd.f32 %v1404_v49, %v1345_v45  ;;  %v1928_v35 = vmul.f32 %v7584_v22, %v5923_v9  ;;  %v1983_v41 = vadd.f32 %v1982_v54, %v1923_v37  ;;  %v7587_v26 = vld [vmem:[#allocation127_spill] sm:$0xff]  ;;  %v7589_v37 = vld [vmem:[#allocation170_spill] sm:$0xff] }
 0x2f0   :  { %v2511_v18 = vmul.f32 %v7585_v6, %v5910_v10  ;;  %v2031_v4 = vadd.f32 %v2023_v27, %v1443_v39  ;;  %v2569_v15 = vadd.f32 %v2568_v32, %v2508_v12  ;;  %v2512_v5 = vmul.f32 %v7586_v7, %v5912_v36  ;;  %v7588_v60 = vld [vmem:[#allocation147_spill] sm:$0xff]  ;;  %v7590_v39 = vld [vmem:[#allocation68_spill] sm:$0xff]  ;;  %v6365_v7 = vpop.permute.xlu1 %2476 }
 0x2f1   :  { %v2513_v44 = vmul.f32 %v7587_v26, %v5917_v31  ;;  %v1406_v42 = vadd.f32 %v1405_v51, %v1346_v53  ;;  %v1984_v59 = vadd.f32 %v1983_v41, %v1924_v38  ;;  %v2514_v45 = vmul.f32 %v7588_v60, %v5919_v20  ;;  %v7591_v27 = vld [vmem:[#allocation71_spill] sm:$0xff] }
 0x2f2   :  { %v2570_v49 = vadd.f32 %v2510_v47, %v2509_v33  ;;  %v2611_v22 = vmul.f32 %v5939_v17, %v2569_v15  ;;  %v2515_v54 = vmul.f32 %v7589_v37, %v5921_v1  ;;  %v1349_v12 = vmul.f32 %v7590_v39, %v5904_v2  ;;  %v7592_v51 = vld [vmem:[#allocation191_spill] sm:$0xff]  ;;  %v7593_v15 = vld [vmem:[#allocation85_spill] sm:$0xff]  ;;  %v7595_v39 = vld [vmem:[#allocation134_spill] sm:$0xff] }
 0x2f3   :  { %v1350_v32 = vmul.f32 %v7591_v27, %v5907_v24  ;;  %v1407_v26 = vadd.f32 %v1406_v42, %v1347_v13  ;;  %v1985_v53 = vadd.f32 %v1984_v59, %v1925_v46  ;;  %v2516_v38 = vmul.f32 %v7592_v51, %v5923_v9  ;;  %v7594_v37 = vld [vmem:[#allocation105_spill] sm:$0xff]  ;;  %v7596_v13 = vld [vmem:[#allocation156_spill] sm:$0xff] }
 0x2f4   :  { %v2571_v41 = vadd.f32 %v2570_v49, %v2511_v18  ;;  %v2619_v33 = vadd.f32 %v2611_v22, %v2031_v4  ;;  %v1351_v47 = vmul.f32 %v7593_v15, %v5910_v10  ;;  %v1352_v60 = vmul.f32 %v7594_v37, %v5912_v36  ;;  %v7597_v46 = vld [vmem:[#allocation169_spill] sm:$0xff]  ;;  %v7598_v18 = vld [vmem:[#allocation72_spill] sm:$0xff]  ;;  %v7599_v49 = vld [vmem:[#allocation75_spill] sm:$0xff] }
 0x2f5   :  { %v1353_v6 = vmul.f32 %v7595_v39, %v5917_v31  ;;  %v1408_v8 = vadd.f32 %v1407_v26, %v1348_v48  ;;  %v1986_v27 = vadd.f32 %v1985_v53, %v1926_v50  ;;  %v1354_v59 = vmul.f32 %v7596_v13, %v5919_v20  ;;  %v7600_v48 = vld [vmem:[#allocation188_spill] sm:$0xff] }
 0x2f6   :  { %v2572_v23 = vadd.f32 %v2571_v41, %v2512_v5  ;;  %3822 = vmatprep.mubr.f32.mxu1 %v2619_v33  ;;  %v1355_v42 = vmul.f32 %v7597_v46, %v5921_v1  ;;  %v1409_v22 = vadd.f32 %v1350_v32, %v1349_v12  ;;  %v1929_v4 = vmul.f32 %v7598_v18, %v5904_v2  ;;  %v7601_v5 = vld [vmem:[#allocation92_spill] sm:$0xff]  ;;  %v7602_v33 = vld [vmem:[#allocation114_spill] sm:$0xff]  ;;  %v7603_v32 = vld [vmem:[#allocation133_spill] sm:$0xff]  ;;  %v6392_v46 = vpop.permute.xlu1 %2483 }
 0x2f7   :  { %v1930_v51 = vmul.f32 %v7599_v49, %v5907_v24  ;;  %v1987_v37 = vadd.f32 %v1986_v27, %v1927_v57  ;;  %v1356_v50 = vmul.f32 %v7600_v48, %v5923_v9  ;;  %v1931_v26 = vmul.f32 %v7601_v5, %v5910_v10 }
 0x2f8   :  { %v2573_v15 = vadd.f32 %v2572_v23, %v2513_v44  ;;  %v1444_v53 = vmul.f32 %v5932_v14, %v1408_v8  ;;  %v1410_v41 = vadd.f32 %v1409_v22, %v1351_v47  ;;  %v1932_v12 = vmul.f32 %v7602_v33, %v5912_v36  ;;  %v7604_v23 = vld [vmem:[#allocation155_spill] sm:$0xff] }
 0x2f9   :  { %v1933_v2 = vmul.f32 %v7603_v32, %v5917_v31  ;;  %v1988_v24 = vadd.f32 %v1987_v37, %v1928_v35  ;;  %v1934_v44 = vmul.f32 %v7604_v23, %v5919_v20  ;;  %v1989_v27 = vadd.f32 %v1930_v51, %v1929_v4 }
 0x2fa   :  { %v2574_v57 = vadd.f32 %v2573_v15, %v2514_v45  ;;  %v1411_v48 = vadd.f32 %v1410_v41, %v1352_v60  ;;  %v2547_v10 = vmul.f32 %v6365_v7, %v5921_v1  ;;  %v2034_v8 = vadd.f32 %v6137_v52, %v6046_v58 }
 0x2fb   :  { %v2035_v36 = vadd.f32 %v6163_v25, %v6147_v63  ;;  %v2024_v31 = vmul.f32 %v5935_v21, %v1988_v24  ;;  %v1990_v22 = vadd.f32 %v1989_v27, %v1931_v26  ;;  %v2548_v35 = vmul.f32 %v6392_v46, %v5923_v9  ;;  %v7606_v26 = vld [vmem:[#allocation185_spill] sm:$0xff] }
 0x2fc   :  { %v2575_v47 = vadd.f32 %v2574_v57, %v2515_v54  ;;  %v1412_v45 = vadd.f32 %v1411_v48, %v1353_v6  ;;  %v2603_v20 = vadd.f32 %v6139_v3, %v2547_v10  ;;  %v2622_v60 = vadd.f32 %v6144_v43, %v2034_v8  ;;  %v7605_v54 = vld [vmem:[#allocation184_spill] sm:$0xff]  ;;  %v7608_v48 = vld [vmem:[#allocation194_spill] sm:$0xff]  ;;  %v7611_v57 = vld [vmem:[#allocation171_spill] sm:$0xff] }
 0x2fd   :  { %v2623_v37 = vadd.f32 %v6156_v0, %v2035_v36  ;;  %v2032_v51 = vadd.f32 %v2024_v31, %v1444_v53  ;;  %v1991_v58 = vadd.f32 %v1990_v22, %v1932_v12  ;;  %v2036_v52 = vadd.f32 %v6172_v29, %v6320_v61  ;;  %v7607_v0 = vld [vmem:[#allocation190_spill] sm:$0xff]  ;;  %v7609_v53 = vld [vmem:[#allocation197_spill] sm:$0xff]  ;;  %v7612_v8 = vld [vmem:[#allocation207_spill] sm:$0xff] }
 0x2fe   :  { %v2576_v15 = vadd.f32 %v2575_v47, %v2516_v38  ;;  %v1413_v63 = vadd.f32 %v1412_v45, %v1354_v59  ;;  %v2604_v25 = vadd.f32 %v2603_v20, %v2548_v35  ;;  %v6412_v4 = vmul.f32 %v5995_v34, %v7605_v54  ;;  %v7610_v12 = vld [vmem:[#allocation201_spill] sm:$0xff]  ;;  %v7613_v47 = vld [vmem:[#allocation20_spill] sm:$0xff]  ;;  %v3384_v54 = vld [vmem:[#allocation7 + $0xc0] sm:$0xff] }
 0x2ff   :  { %v6416_v6 = vmul.f32 %v5995_v34, %v7606_v26  ;;  %v1992_v43 = vadd.f32 %v1991_v58, %v1933_v2  ;;  %v6421_v38 = vmul.f32 %v5995_v34, %v7607_v0  ;;  %v6425_v29 = vmul.f32 %v5995_v34, %v7608_v48  ;;  %v3378_v58 = vld [vmem:[#allocation7 + $0x90] sm:$0xff]  ;;  %v3385_v26 = vld [vmem:[#allocation7 + $0xc8] sm:$0xff]  ;;  %v3387_v0 = vld [vmem:[#allocation7 + $0xd8] sm:$0xff] }
 0x300   :  { %v2612_v3 = vmul.f32 %v5939_v17, %v2576_v15  ;;  %v1414_v61 = vadd.f32 %v1413_v63, %v1355_v42  ;;  %v2616_v59 = vmul.f32 %v5939_v17, %v2604_v25  ;;  %v6430_v41 = vmul.f32 %v5995_v34, %v7609_v53  ;;  %v3201_v48 = vld [vmem:[#allocation5] sm:$0xff] }
 0x301   :  { %v6434_v24 = vmul.f32 %v5995_v34, %v7610_v12  ;;  %v1935_v27 = vmul.f32 %v7611_v57, %v5921_v1  ;;  %v1993_v10 = vadd.f32 %v1992_v43, %v1934_v44  ;;  %v6440_v36 = vmul.f32 %v5995_v34, %v7612_v8  ;;  %v3376_v34 = vld [vmem:[#allocation7 + $0x80] sm:$0xff]  ;;  %v3386_v43 = vld [vmem:[#allocation7 + $0xd0] sm:$0xff]  ;;  %v3389_v8 = vld [vmem:[#allocation7 + $0xe8] sm:$0xff] }
 0x302   :  { %v2620_v2 = vadd.f32 %v2612_v3, %v2032_v51  ;;  %v1415_v42 = vadd.f32 %v1414_v61, %v1356_v50  ;;  %v2624_v31 = vadd.f32 %v2616_v59, %v2036_v52  ;;  %v1936_v22 = vmul.f32 %v7613_v47, %v5923_v9  ;;  %v3377_v50 = vld [vmem:[#allocation7 + $0x88] sm:$0xff] }
 0x303   :  { %v1994_v35 = vadd.f32 %v1993_v10, %v1935_v27  ;;  %v2613_v1 = vmul.f32 %v5939_v17, %v6127_v55  ;;  %v4350_v52 = vmov 0.0|0.0   ;;  %v4053_v9 = vpack.c.bf16 %v3377_v50, %v3376_v34  ;;  %v3381_v17 = vld [vmem:[#allocation7 + $0xa8] sm:$0xff]  ;;  %v3203_v27 = vld [vmem:[#allocation5 + $0x10] sm:$0xff]  ;;  %v3204_v10 = vld [vmem:[#allocation5 + $0x18] sm:$0xff] }
 0x304   :  { %3823 = vmatmul.mubr.f32.gmra.mrb[10].mxu1 %v2620_v2  ;;  %v1445_v45 = vmul.f32 %v5932_v14, %v1415_v42  ;;  %4052 = vmatprep.subr.bf16.mxu0 %v4350_v52  ;;  %v3379_v14 = vld [vmem:[#allocation7 + $0x98] sm:$0xff]  ;;  %v4065_v3 = vpack.c.bf16 %v3385_v26, %v3384_v54  ;;  %v3202_v61 = vld [vmem:[#allocation5 + $0x8] sm:$0xff]  ;;  %v7614_v59 = vmov 0.0   ;;  %v4068_v53 = vpack.c.bf16 %v3387_v0, %v3386_v43  ;;  %v3388_v2 = vld [vmem:[#allocation7 + $0xe0] sm:$0xff] }
 0x305   :  { %v1995_v20 = vadd.f32 %v1994_v35, %v1936_v22  ;;  %4054 = vmatpush3.bf16.msra.mxu0 %v4053_v9  ;;  %v4056_v63 = vpack.c.bf16 %v3379_v14, %v3378_v58  ;;  %3907 = vmatprep.mubr.msk.f32.mxu0 %vm4351_vm3, %v7614_v59  ;;  %v4020_v12 = vpack.c.bf16 %v3202_v61, %v3201_v48  ;;  %v3206_v22 = vld [vmem:[#allocation5 + $0x28] sm:$0xff]  ;;  %v3209_v50 = vld [vmem:[#allocation5 + $0x40] sm:$0xff]  ;;  %v3211_v14 = vld [vmem:[#allocation5 + $0x50] sm:$0xff] }
 0x306   :  { %4055 = vmatprep.subr.bf16.mxu0 %v4350_v52  ;;  %v4024_v42 = vpack.c.bf16 %v3204_v10, %v3203_v27  ;;  %v4071_v35 = vpack.c.bf16 %v3389_v8, %v3388_v2  ;;  %v3210_v58 = vld [vmem:[#allocation5 + $0x48] sm:$0xff]  ;;  %v7616_v48 = vld [vmem:[#allocation179_spill] sm:$0xff]  ;;  %v7617_v2 = vld [vmem:[#allocation193_spill] sm:$0xff] }
 0x307   :  { %v2025_v51 = vmul.f32 %v5935_v21, %v1995_v20  ;;  %v3380_v21 = vld [vmem:[#allocation7 + $0xa0] sm:$0xff]  ;;  %4021 = vmatprep.subr.bf16.mxu1 %v4020_v12  ;;  %v4036_v9 = vpack.c.bf16 %v3210_v58, %v3209_v50  ;;  %v7618_v8 = vld [vmem:[#allocation189_spill] sm:$0xff] }
 0x308   :  { %v4059_v55 = vpack.c.bf16 %v3381_v17, %v3380_v21  ;;  %4023 = vmatpush3.bf16.msra.mxu1 %v4020_v12  ;;  %v3213_v17 = vld [vmem:[#allocation5 + $0x60] sm:$0xff] }
 0x309   :  { %v2033_v44 = vadd.f32 %v2025_v51, %v1445_v45  ;;  %4057 = vmatpush3.bf16.msra.mxu0 %v4056_v63  ;;  %4025 = vmatprep.subr.bf16.mxu1 %v4024_v42  ;;  %v3390_v45 = vld [vmem:[#allocation7 + $0xf0] sm:$0xff]  ;;  %v3391_v51 = vld [vmem:[#allocation7 + $0xf8] sm:$0xff]  ;;  %v7621_v50 = vld [vmem:[#allocation211_spill] sm:$0xff] }
 0x30a   :  { %4058 = vmatprep.subr.bf16.mxu0 %v4350_v52  ;;  %v3212_v63 = vld [vmem:[#allocation5 + $0x58] sm:$0xff] }
 0x30b   :  { %v2621_v15 = vadd.f32 %v2613_v1, %v2033_v44  ;;  %v3207_v1 = vld [vmem:[#allocation5 + $0x30] sm:$0xff]  ;;  %v3208_v44 = vld [vmem:[#allocation5 + $0x38] sm:$0xff]  ;;  %v4040_v21 = vpack.c.bf16 %v3212_v63, %v3211_v14 }
 0x30c   :  { %4027 = vmatpush3.bf16.msra.mxu1 %v4024_v42  ;;  %v4032_v34 = vpack.c.bf16 %v3208_v44, %v3207_v1  ;;  %v7620_v1 = vld [vmem:[#allocation196_spill] sm:$0xff]  ;;  %v7622_v14 = vld [vmem:[#allocation206_spill] sm:$0xff] }
 0x30d   :  { %3825 = vmatprep.mubr.f32.mxu1 %v2621_v15  ;;  %4060 = vmatpush3.bf16.msra.mxu0 %v4059_v55  ;;  %v4074_v15 = vpack.c.bf16 %v3391_v51, %v3390_v45  ;;  %v3214_v55 = vld [vmem:[#allocation5 + $0x68] sm:$0xff] }
 0x30e   :  { %3826 = vmatmul.mubr.f32.gmra.mrb[12].mxu1 %v2622_v60  ;;  %4061 = vmatprep.subr.bf16.mxu0 %v4350_v52  ;;  %v3382_v60 = vld [vmem:[#allocation7 + $0xb0] sm:$0xff]  ;;  %v7619_v45 = vld [vmem:[#allocation200_spill] sm:$0xff] }
 0x30f   :  { %3828 = vmatprep.mubr.f32.mxu1 %v2623_v37  ;;  %v3383_v37 = vld [vmem:[#allocation7 + $0xb8] sm:$0xff] }
 0x310   :  { %v4062_v25 = vpack.c.bf16 %v3383_v37, %v3382_v60  ;;  %v4044_v60 = vpack.c.bf16 %v3214_v55, %v3213_v17  ;;  %v3215_v37 = vld [vmem:[#allocation5 + $0x70] sm:$0xff]  ;;  %v742_v55 = vld [vmem:[%s7002_s7] sm:$0x3] }
 0x311   :  { %vm2771_vm4 = vcmp.ne.f32.partialorder %v742_v55, 0.0  ;;  %v7629_v55 = vld [vmem:[#allocation52_spill] sm:$0xff] }
 0x312   :  { %3829 = vmatmul.mubr.f32.gmra.mrb[14].mxu1 %v2624_v31  ;;  %4063 = vmatpush3.bf16.msra.mxu0 %v4062_v25  ;;  %v3205_v31 = vld [vmem:[#allocation5 + $0x20] sm:$0xff]  ;;  %v3216_v25 = vld [vmem:[#allocation5 + $0x78] sm:$0xff] }
 0x313   :  { %4064 = vmatprep.subr.bf16.mxu0 %v4350_v52  ;;  %v4028_v20 = vpack.c.bf16 %v3206_v22, %v3205_v31  ;;  %v4048_v54 = vpack.c.bf16 %v3216_v25, %v3215_v37  ;;  %v743_v37 = vld [vmem:[%s7003_s8] sm:$0x7]  ;;  %v4352_v25 = vmov 0  }
 0x314   :  { %vm3345_vm5 = vcmp.ne.f32.partialorder %v743_v37, 0.0 }
 0x315   :  { %4029 = vmatprep.subr.bf16.mxu1 %v4028_v20 }
 0x316   :  { %4066 = vmatpush3.bf16.msra.mxu0 %v4065_v3  ;;  %4031 = vmatpush3.bf16.msra.mxu1 %v4028_v20  ;;  %v7615_v3 = vld [vmem:[#allocation17_spill] sm:$0xff] }
 0x317   :  { %4067 = vmatprep.subr.bf16.mxu0 %v4350_v52  ;;  %4033 = vmatprep.subr.bf16.mxu1 %v4032_v34 }
 0x31a   :  { %4069 = vmatpush3.bf16.msra.mxu0 %v4068_v53  ;;  %4035 = vmatpush3.bf16.msra.mxu1 %v4032_v34 }
 0x31b   :  { %4070 = vmatprep.subr.bf16.mxu0 %v4350_v52  ;;  %4037 = vmatprep.subr.bf16.mxu1 %v4036_v9 }
 0x31e   :  { %4072 = vmatpush3.bf16.msra.mxu0 %v4071_v35  ;;  %4039 = vmatpush3.bf16.msra.mxu1 %v4036_v9 }
 0x31f   :  { %4073 = vmatprep.subr.bf16.mxu0 %v4350_v52  ;;  %4041 = vmatprep.subr.bf16.mxu1 %v4040_v21 }
 0x322   :  { %4075 = vmatpush3.bf16.msra.mxu0 %v4074_v15  ;;  %4043 = vmatpush3.bf16.msra.mxu1 %v4040_v21 }
 0x323   :  { %4076 = vmatprep.subr.bf16.mxu0 %v4350_v52  ;;  %4045 = vmatprep.subr.bf16.mxu1 %v4044_v60 }
 0x326   :  { %4047 = vmatpush3.bf16.msra.mxu1 %v4044_v60 }
 0x327   :  { %4049 = vmatprep.subr.bf16.mxu1 %v4048_v54 }
 0x32a   :  { %4051 = vmatpush3.bf16.msra.mxu1 %v4048_v54  ;;  %v6474_v54 = vsel %vm2771_vm4, 1, %v4352_v25 }
 0x3bd   :  { %v3821_v26 = vpop.f32.mrb[8].mxu1 }
 0x3be   :  { %v2748_v43 = vmul.f32 %v3821_v26, %v7615_v3  ;;  %v2708_v0 = vpop.f32.mrb[9].mxu1  ;;  %v7623_v26 = vld [vmem:[#allocation13_spill] sm:$0xff] }
 0x3bf   :  { %v2747_v61 = vmul.f32 %v2708_v0, %v7616_v48  ;;  %v2776_v3 = vrot.slane %v6474_v54, %v7623_v26  ;;  %v6478_v0 = vsel %vm3345_vm5, 1, %v4352_v25 }
 0x3c1   :  { %v2755_v53 = vadd.f32 %v2748_v43, %v2747_v61  ;;  %vm6480_vm6 = vcmp.eq.s32.totalorder %v2776_v3, 1 }
 0x3d7   :  { %v3824_v12 = vpop.f32.mrb[10].mxu1 }
 0x3d8   :  { %v2750_v27 = vmul.f32 %v3824_v12, %v7617_v2  ;;  %v2718_v10 = vpop.f32.mrb[11].mxu1  ;;  %v3372_v2 = vrot.slane %v6478_v0, %v7623_v26  ;;  %v7634_v12 = vld [vmem:[#allocation35_spill] sm:$0xff] }
 0x3d9   :  { %v2749_v42 = vmul.f32 %v2718_v10, %v7618_v8 }
 0x3da   :  { %vm3373_vm7 = vcmp.eq.s32.totalorder %v3372_v2, 1 }
 0x3db   :  { %v2756_v31 = vadd.f32 %v2755_v53, %v2749_v42  ;;  %v842_v53 = vmul.f32 0.6931472, %v4238_v40 }
 0x3dd   :  { %v2757_v22 = vadd.f32 %v2756_v31, %v2750_v27 }
 0x3e1   :  { %v3827_v35 = vpop.f32.mrb[12].mxu1 }
 0x3e2   :  { %v2752_v20 = vmul.f32 %v3827_v35, %v7619_v45  ;;  %v2728_v51 = vpop.f32.mrb[13].mxu1 }
 0x3e3   :  { %v2751_v44 = vmul.f32 %v2728_v51, %v7620_v1 }
 0x3e5   :  { %v2758_v15 = vadd.f32 %v2757_v22, %v2751_v44  ;;  %v3830_v34 = vpop.f32.mrb[14].mxu1 }
 0x3e6   :  { %v2754_v58 = vmul.f32 %v3830_v34, %v7621_v50  ;;  %v2738_v9 = vpop.f32.mrb[15].mxu1 }
 0x3e7   :  { %v2753_v63 = vmul.f32 %v2738_v9, %v7622_v14  ;;  %v2759_v21 = vadd.f32 %v2758_v15, %v2752_v20  ;;  %v7627_v14 = vld [vmem:[#allocation29_spill] sm:$0xff] }
 0x3e9   :  { %v2760_v17 = vadd.f32 %v2759_v21, %v2753_v63  ;;  %v7628_v21 = vld [vmem:[#allocation14_spill] sm:$0xff] }
 0x3eb   :  { %v2761_v60 = vadd.f32 %v2760_v17, %v2754_v58 }
 0x3ed   :  { %4239 = vrcp.f32 %v2761_v60 }
 0x3ee   :  { %4241 = vlog2.f32 %v2761_v60  ;;  %v7630_v60 = vld [vmem:[#allocation66_spill] sm:$0xff] }
 0x3f7   :  { %v4240_v48 = vpop.eup %4239 }
 0x3f8   :  { %v2763_v10 = vmul.f32 %v4240_v48, %v2747_v61  ;;  %v2764_v8 = vmul.f32 %v4240_v48, %v2748_v43  ;;  %v2765_v31 = vmul.f32 %v4240_v48, %v2749_v42  ;;  %v2766_v22 = vmul.f32 %v4240_v48, %v2750_v27  ;;  %v4242_v35 = vpop.eup %4241 }
 0x3f9   :  { %v2767_v45 = vmul.f32 %v4240_v48, %v2751_v44  ;;  %v2768_v51 = vmul.f32 %v4240_v48, %v2752_v20  ;;  %v2769_v1 = vmul.f32 %v4240_v48, %v2753_v63  ;;  %v2770_v15 = vmul.f32 %v4240_v48, %v2754_v58  ;;  %v7633_v48 = vld [vmem:[#allocation34_spill] sm:$0xff] }
 0x3fa   :  { %v6489_v34 = vsel %vm6480_vm6, %v2763_v10, %v6412_v4  ;;  %v6494_v50 = vsel %vm6480_vm6, %v2764_v8, %v6416_v6  ;;  %v6499_v43 = vsel %vm6480_vm6, %v2765_v31, %v6421_v38  ;;  %v6504_v61 = vsel %vm6480_vm6, %v2766_v22, %v6425_v29  ;;  %v740_v4 = vld [vmem:[%s7001_s6] sm:$0x7]  ;;  %s4353_s6 = smov [#allocation8]  }
 0x3fb   :  { %v6512_v27 = vsel %vm6480_vm6, %v2767_v45, %v6430_v41  ;;  %v6517_v6 = vsel %vm6480_vm6, %v2768_v51, %v6434_v24  ;;  %v6522_v38 = vsel %vm6480_vm6, %v2769_v1, %v6440_v36  ;;  %v6527_v29 = vsel %vm6480_vm6, %v2770_v15, %v6031_v56  ;;  %v7626_v24 = vld [vmem:[#allocation12_spill] sm:$0xff]  ;;  %v7635_v10 = vld [vmem:[#allocation103_spill] sm:$0xff]  ;;  %v7637_v45 = vld [vmem:[#allocation54_spill] sm:$0xff]  ;;  %s3633_s19 = sshll.u32 %s4353_s6, 4  ;;  %s3634_s19 = int_to_ptr.vmem [resolvable:$true] %s3633_s19 }
 0x3fc   :  { %v2787_v42 = vmul.f32 0.6931472, %v4242_v35  ;;  %v2789_v41 = vmul.f32 %v6489_v34, %v7494_v62  ;;  %v2790_v20 = vmul.f32 %v6494_v50, %v7495_v16  ;;  %v6534_v44 = vrot.slane %v740_v4, %v7626_v24  ;;  %v7636_v22 = vld [vmem:[#allocation43_spill] sm:$0xff]  ;;  %v7638_v1 = vld [vmem:[#allocation70_spill] sm:$0xff]  ;;  %s4315_s20 = scalar_lea.vmem %s3634_s19, 128  ;;  %p4320_p11 = scmp.lt.s32.totalorder %s3634_s19, %s3634_s19 }
 0x3fd   :  { %v2791_v58 = vmul.f32 %v6499_v43, %v7496_v28  ;;  %v2921_v56 = vmul.f32 %v6489_v34, %v7502_v19  ;;  %v2792_v62 = vmul.f32 %v6504_v61, %v7497_v11  ;;  %v2922_v16 = vmul.f32 %v6494_v50, %v7627_v14  ;;  %v7631_v19 = vld [vmem:[#allocation16_spill] sm:$0xff]  ;;  %v7632_v11 = vld [vmem:[#allocation33_spill] sm:$0xff]  ;;  %v7642_v14 = vld [vmem:[#allocation27_spill] sm:$0xff]  ;;  %p4316_p10 = scmp.ne.s32.totalorder %s3634_s19, %s4315_s20  ;;  %p4321_p12 = scmp.lt.s32.totalorder %s4315_s20, %s4315_s20 }
 0x3fe   :  { %v2788_v36 = vsel %vm6480_vm6, %v2787_v42, %v842_v53  ;;  %v2853_v9 = vadd.f32 %v2790_v20, %v2789_v41  ;;  %v6547_v63 = vrot.slane %v740_v4, %v7623_v26  ;;  %v6550_v17 = vrot.slane %v740_v4, %v7628_v21  ;;  %v7639_v42 = vld [vmem:[#allocation44_spill] sm:$0xff] }
 0x3ff   :  { %3908 = vmatmul.mubr.msk.f32.vlgmr.msra.gmra.mrb[16].mxu0 %vm3373_vm7, %v2788_v36  ;;  %v2793_v28 = vmul.f32 %v6512_v27, %v7629_v55  ;;  %v2794_v37 = vmul.f32 %v6517_v6, %v7630_v60  ;;  %v2795_v25 = vmul.f32 %v6522_v38, %v7631_v19  ;;  %v2923_v26 = vmul.f32 %v6499_v43, %v7632_v11  ;;  %v7643_v55 = vld [vmem:[#allocation112_spill] sm:$0xff]  ;;  %p4322_p13 = por %p4321_p12, %p4320_p11 }
 0x400   :  { %v2854_v3 = vadd.f32 %v2853_v9, %v2791_v58  ;;  %3942 = vmatprep.mubr.msk.f32.mxu0 %vm4351_vm3, %v7614_v59  ;;  %v2985_v40 = vadd.f32 %v2922_v16, %v2921_v56  ;;  %v3061_v53 = vmul.f32 %v6489_v34, %v7633_v48  ;;  %v3062_v2 = vmul.f32 %v6494_v50, %v7634_v12  ;;  %v7640_v58 = vld [vmem:[#allocation90_spill] sm:$0xff]  ;;  %v7641_v56 = vld [vmem:[#allocation24_spill] sm:$0xff] }
 0x401   :  { %v2796_v8 = vmul.f32 %v6527_v29, %v7635_v10  ;;  %v2924_v35 = vmul.f32 %v6504_v61, %v7636_v22  ;;  %v2925_v51 = vmul.f32 %v6512_v27, %v7637_v45  ;;  %v2926_v15 = vmul.f32 %v6517_v6, %v7638_v1  ;;  %v7645_v48 = vld [vmem:[#allocation74_spill] sm:$0xff]  ;;  %p4323_p0 = pnand %p4322_p13, %p4316_p10 }
 0x402   :  { %v2855_v31 = vadd.f32 %v2854_v3, %v2792_v62  ;;  %v2986_v4 = vadd.f32 %v2985_v40, %v2923_v26  ;;  %v3063_v41 = vmul.f32 %v6499_v43, %v7639_v42  ;;  %v3125_v20 = vadd.f32 %v3062_v2, %v3061_v53  ;;  %v7644_v3 = vld [vmem:[#allocation56_spill] sm:$0xff]  ;;  %v7646_v53 = vld [vmem:[#allocation89_spill] sm:$0xff] }
 0x403   :  { %v2927_v9 = vmul.f32 %v6522_v38, %v7640_v58  ;;  %v2797_v62 = vmul.f32 %v6489_v34, %v7641_v56  ;;  %v2798_v16 = vmul.f32 %v6494_v50, %v7642_v14  ;;  %v2928_v60 = vmul.f32 %v6527_v29, %v7643_v55  ;;  %v7647_v2 = vld [vmem:[#allocation28_spill] sm:$0xff]  ;;  %v7651_v14 = vld [vmem:[#allocation47_spill] sm:$0xff] }
 0x404   :  { %v2856_v36 = vadd.f32 %v2855_v31, %v2793_v28  ;;  %v2987_v19 = vadd.f32 %v2986_v4, %v2924_v35  ;;  %v3064_v11 = vmul.f32 %v6504_v61, %v7644_v3  ;;  %v3126_v26 = vadd.f32 %v3125_v20, %v3063_v41  ;;  %v7648_v4 = vld [vmem:[#allocation113_spill] sm:$0xff]  ;;  %v7650_v20 = vld [vmem:[#allocation31_spill] sm:$0xff] }
 0x405   :  { %v3065_v28 = vmul.f32 %v6512_v27, %v7645_v48  ;;  %v3066_v12 = vmul.f32 %v6517_v6, %v7646_v53  ;;  %v2799_v10 = vmul.f32 %v6499_v43, %v7647_v2  ;;  %v2860_v45 = vadd.f32 %v2798_v16, %v2797_v62  ;;  %v7652_v16 = vld [vmem:[#allocation61_spill] sm:$0xff] }
 0x406   :  { %v2857_v40 = vadd.f32 %v2856_v36, %v2794_v37  ;;  %v2988_v31 = vadd.f32 %v2987_v19, %v2925_v51  ;;  %v3127_v22 = vadd.f32 %v3126_v26, %v3064_v11  ;;  %v2929_v35 = vmul.f32 %v6489_v34, %v7524_v30  ;;  %v7649_v37 = vld [vmem:[#allocation135_spill] sm:$0xff]  ;;  %v7654_v3 = vld [vmem:[#allocation37_spill] sm:$0xff] }
 0x407   :  { %v3067_v42 = vmul.f32 %v6522_v38, %v7648_v4  ;;  %v3068_v41 = vmul.f32 %v6527_v29, %v7649_v37  ;;  %v2930_v36 = vmul.f32 %v6494_v50, %v7650_v20  ;;  %v2800_v51 = vmul.f32 %v6504_v61, %v7651_v14  ;;  %v7658_v20 = vld [vmem:[#allocation93_spill] sm:$0xff] }
 0x408   :  { %v2858_v1 = vadd.f32 %v2857_v40, %v2795_v25  ;;  %v2989_v58 = vadd.f32 %v2988_v31, %v2926_v15  ;;  %v3128_v56 = vadd.f32 %v3127_v22, %v3065_v28  ;;  %v2861_v55 = vadd.f32 %v2860_v45, %v2799_v10  ;;  %v7653_v25 = vld [vmem:[#allocation15_spill] sm:$0xff]  ;;  %v7655_v28 = vld [vmem:[#allocation48_spill] sm:$0xff] }
 0x409   :  { %v2801_v30 = vmul.f32 %v6512_v27, %v7652_v16  ;;  %v2802_v19 = vmul.f32 %v6517_v6, %v7653_v25  ;;  %v2931_v11 = vmul.f32 %v6499_v43, %v7654_v3  ;;  %v2992_v53 = vadd.f32 %v2930_v36, %v2929_v35  ;;  %v7656_v10 = vld [vmem:[#allocation36_spill] sm:$0xff]  ;;  %v7657_v31 = vld [vmem:[#allocation39_spill] sm:$0xff]  ;;  %v7663_v25 = vld [vmem:[#allocation41_spill] sm:$0xff] }
 0x40a   :  { %v2859_v62 = vadd.f32 %v2858_v1, %v2796_v8  ;;  %v2990_v26 = vadd.f32 %v2989_v58, %v2927_v9  ;;  %v3129_v40 = vadd.f32 %v3128_v56, %v3066_v12  ;;  %v2862_v48 = vadd.f32 %v2861_v55, %v2800_v51  ;;  %v7659_v12 = vld [vmem:[#allocation120_spill] sm:$0xff]  ;;  %v7660_v36 = vld [vmem:[#allocation63_spill] sm:$0xff]  ;;  %v7661_v56 = vld [vmem:[#allocation78_spill] sm:$0xff] }
 0x40b   :  { %v2932_v2 = vmul.f32 %v6504_v61, %v7655_v28  ;;  %v3069_v8 = vmul.f32 %v6489_v34, %v7656_v10  ;;  %v3070_v22 = vmul.f32 %v6494_v50, %v7657_v31  ;;  %v2993_v37 = vadd.f32 %v2992_v53, %v2931_v11  ;;  %v7664_v11 = vld [vmem:[#allocation40_spill] sm:$0xff] }
 0x40c   :  { %v2913_v15 = vmul.f32 %v6534_v44, %v2859_v62  ;;  %v2991_v45 = vadd.f32 %v2990_v26, %v2928_v60  ;;  %v3130_v1 = vadd.f32 %v3129_v40, %v3067_v42  ;;  %v2863_v4 = vadd.f32 %v2862_v48, %v2801_v30  ;;  %v7662_v42 = vld [vmem:[#allocation53_spill] sm:$0xff]  ;;  %v7665_v10 = vld [vmem:[#allocation100_spill] sm:$0xff] }
 0x40d   :  { %v2803_v9 = vmul.f32 %v6522_v38, %v7658_v20  ;;  %v2804_v35 = vmul.f32 %v6527_v29, %v7659_v12  ;;  %v2933_v58 = vmul.f32 %v6512_v27, %v7660_v36  ;;  %v2934_v14 = vmul.f32 %v6517_v6, %v7661_v56  ;;  %v7669_v12 = vld [vmem:[#allocation55_spill] sm:$0xff] }
 0x40e   :  { %v3045_v51 = vmul.f32 %v6547_v63, %v2991_v45  ;;  %v3131_v55 = vadd.f32 %v3130_v1, %v3068_v41  ;;  %v2864_v62 = vadd.f32 %v2863_v4, %v2802_v19  ;;  %v2994_v60 = vadd.f32 %v2993_v37, %v2932_v2  ;;  %v7666_v19 = vld [vmem:[#allocation65_spill] sm:$0xff]  ;;  %v7668_v37 = vld [vmem:[#allocation82_spill] sm:$0xff]  ;;  %v7670_v56 = vld [vmem:[#allocation99_spill] sm:$0xff] }
 0x40f   :  { %v3071_v16 = vmul.f32 %v6499_v43, %v7662_v42  ;;  %v3132_v30 = vadd.f32 %v3070_v22, %v3069_v8  ;;  %v2805_v3 = vmul.f32 %v6489_v34, %v7663_v25  ;;  %v2806_v26 = vmul.f32 %v6494_v50, %v7664_v11  ;;  %v7667_v22 = vld [vmem:[#allocation121_spill] sm:$0xff] }
 0x410   :  { %v3053_v40 = vadd.f32 %v3045_v51, %v2913_v15  ;;  %v3185_v48 = vmul.f32 %v6550_v17, %v3131_v55  ;;  %v2865_v53 = vadd.f32 %v2864_v62, %v2803_v9  ;;  %v2995_v28 = vadd.f32 %v2994_v60, %v2933_v58  ;;  %v7671_v55 = vld [vmem:[#allocation42_spill] sm:$0xff]  ;;  %v7672_v62 = vld [vmem:[#allocation45_spill] sm:$0xff] }
 0x411   :  { %v2935_v41 = vmul.f32 %v6522_v38, %v7665_v10  ;;  %v3072_v2 = vmul.f32 %v6504_v61, %v7666_v19  ;;  %v3133_v31 = vadd.f32 %v3132_v30, %v3071_v16  ;;  %v2936_v1 = vmul.f32 %v6527_v29, %v7667_v22  ;;  %v7674_v30 = vld [vmem:[#allocation69_spill] sm:$0xff]  ;;  %v7678_v22 = vld [vmem:[#allocation108_spill] sm:$0xff] }
 0x412   :  { %v3193_v45 = vadd.f32 %v3185_v48, %v3053_v40  ;;  %v2866_v8 = vadd.f32 %v2865_v53, %v2804_v35  ;;  %v2996_v4 = vadd.f32 %v2995_v28, %v2934_v14  ;;  %v3073_v15 = vmul.f32 %v6512_v27, %v7668_v37  ;;  %v7673_v14 = vld [vmem:[#allocation130_spill] sm:$0xff]  ;;  %v7676_v53 = vld [vmem:[#allocation88_spill] sm:$0xff]  ;;  %v7677_v19 = vld [vmem:[#allocation57_spill] sm:$0xff] }
 0x413   :  { %v3134_v20 = vadd.f32 %v3133_v31, %v3072_v2  ;;  %v2807_v9 = vmul.f32 %v6499_v43, %v7669_v12  ;;  %v2867_v36 = vadd.f32 %v2806_v26, %v2805_v3  ;;  %v3074_v51 = vmul.f32 %v6517_v6, %v7670_v56  ;;  %v7675_v40 = vld [vmem:[#allocation150_spill] sm:$0xff]  ;;  %v7679_v37 = vld [vmem:[#allocation59_spill] sm:$0xff]  ;;  %v7682_v56 = vld [vmem:[#allocation129_spill] sm:$0xff] }
 0x414   :  { %3863 = vmatprep.mubr.f32.mxu1 %v3193_v45  ;;  %v2997_v58 = vadd.f32 %v2996_v4, %v2935_v41  ;;  %v2937_v35 = vmul.f32 %v6489_v34, %v7671_v55  ;;  %v2938_v60 = vmul.f32 %v6494_v50, %v7672_v62  ;;  %v3075_v42 = vmul.f32 %v6522_v38, %v7673_v14  ;;  %v7683_v55 = vld [vmem:[#allocation151_spill] sm:$0xff]  ;;  %v7685_v14 = vld [vmem:[#allocation109_spill] sm:$0xff] }
 0x415   :  { %v3135_v16 = vadd.f32 %v3134_v20, %v3073_v15  ;;  %v2808_v25 = vmul.f32 %v6504_v61, %v7674_v30  ;;  %v2868_v11 = vadd.f32 %v2867_v36, %v2807_v9  ;;  %v2914_v3 = vmul.f32 %v6534_v44, %v2866_v8  ;;  %v7681_v9 = vld [vmem:[#allocation73_spill] sm:$0xff]  ;;  %v7684_v62 = vld [vmem:[#allocation87_spill] sm:$0xff] }
 0x416   :  { %v2998_v26 = vadd.f32 %v2997_v58, %v2936_v1  ;;  %v3076_v48 = vmul.f32 %v6527_v29, %v7675_v40  ;;  %v2809_v28 = vmul.f32 %v6512_v27, %v7676_v53  ;;  %v2939_v2 = vmul.f32 %v6499_v43, %v7677_v19  ;;  %v7680_v1 = vld [vmem:[#allocation58_spill] sm:$0xff] }
 0x417   :  { %v3136_v10 = vadd.f32 %v3135_v16, %v3074_v51  ;;  %v2869_v41 = vadd.f32 %v2868_v11, %v2808_v25  ;;  %v2999_v31 = vadd.f32 %v2938_v60, %v2937_v35  ;;  %v2810_v4 = vmul.f32 %v6517_v6, %v7678_v22  ;;  %v7689_v22 = vld [vmem:[#allocation136_spill] sm:$0xff] }
 0x418   :  { %v3046_v45 = vmul.f32 %v6547_v63, %v2998_v26  ;;  %v3077_v8 = vmul.f32 %v6489_v34, %v7679_v37  ;;  %v3078_v15 = vmul.f32 %v6494_v50, %v7680_v1  ;;  %v2940_v36 = vmul.f32 %v6504_v61, %v7681_v9  ;;  %v7686_v26 = vld [vmem:[#allocation77_spill] sm:$0xff] }
 0x419   :  { %v3137_v20 = vadd.f32 %v3136_v10, %v3075_v42  ;;  %v2870_v12 = vadd.f32 %v2869_v41, %v2809_v28  ;;  %v3000_v58 = vadd.f32 %v2999_v31, %v2939_v2  ;;  %v2811_v51 = vmul.f32 %v6522_v38, %v7682_v56  ;;  %v7687_v28 = vld [vmem:[#allocation46_spill] sm:$0xff]  ;;  %v7688_v41 = vld [vmem:[#allocation49_spill] sm:$0xff] }
 0x41a   :  { %v2812_v35 = vmul.f32 %v6527_v29, %v7683_v55  ;;  %v2941_v60 = vmul.f32 %v6512_v27, %v7684_v62  ;;  %v2942_v16 = vmul.f32 %v6517_v6, %v7685_v14  ;;  %v3054_v30 = vadd.f32 %v3046_v45, %v2914_v3  ;;  %v7694_v62 = vld [vmem:[#allocation51_spill] sm:$0xff]  ;;  %v7695_v14 = vld [vmem:[#allocation50_spill] sm:$0xff] }
 0x41b   :  { %v3138_v25 = vadd.f32 %v3137_v20, %v3076_v48  ;;  %v2871_v42 = vadd.f32 %v2870_v12, %v2810_v4  ;;  %v3001_v11 = vadd.f32 %v3000_v58, %v2940_v36  ;;  %v3079_v40 = vmul.f32 %v6499_v43, %v7686_v26  ;;  %v7690_v48 = vld [vmem:[#allocation158_spill] sm:$0xff]  ;;  %v7693_v58 = vld [vmem:[#allocation60_spill] sm:$0xff] }
 0x41c   :  { %v3139_v53 = vadd.f32 %v3078_v15, %v3077_v8  ;;  %v2813_v10 = vmul.f32 %v6489_v34, %v7687_v28  ;;  %v2814_v19 = vmul.f32 %v6494_v50, %v7688_v41  ;;  %v2943_v37 = vmul.f32 %v6522_v38, %v7689_v22  ;;  %v7691_v4 = vld [vmem:[#allocation94_spill] sm:$0xff]  ;;  %v7699_v28 = vld [vmem:[#allocation79_spill] sm:$0xff] }
 0x41d   :  { %v3186_v2 = vmul.f32 %v6550_v17, %v3138_v25  ;;  %v2872_v31 = vadd.f32 %v2871_v42, %v2811_v51  ;;  %v3002_v3 = vadd.f32 %v3001_v11, %v2941_v60  ;;  %v2944_v45 = vmul.f32 %v6527_v29, %v7690_v48  ;;  %v7692_v8 = vld [vmem:[#allocation118_spill] sm:$0xff]  ;;  %v7696_v11 = vld [vmem:[#allocation140_spill] sm:$0xff] }
 0x41e   :  { %v3080_v1 = vmul.f32 %v6504_v61, %v7691_v4  ;;  %v3081_v15 = vmul.f32 %v6512_v27, %v7692_v8  ;;  %v3140_v20 = vadd.f32 %v3139_v53, %v3079_v40  ;;  %v2815_v56 = vmul.f32 %v6499_v43, %v7693_v58  ;;  %v7697_v40 = vld [vmem:[#allocation157_spill] sm:$0xff]  ;;  %v7700_v41 = vld [vmem:[#allocation98_spill] sm:$0xff]  ;;  %v7702_v8 = vld [vmem:[#allocation64_spill] sm:$0xff] }
 0x41f   :  { %v3194_v12 = vadd.f32 %v3186_v2, %v3054_v30  ;;  %v2873_v9 = vadd.f32 %v2872_v31, %v2812_v35  ;;  %v3003_v36 = vadd.f32 %v3002_v3, %v2942_v16  ;;  %v2874_v55 = vadd.f32 %v2814_v19, %v2813_v10  ;;  %v7698_v16 = vld [vmem:[#allocation173_spill] sm:$0xff] }
 0x420   :  { %v3141_v51 = vadd.f32 %v3140_v20, %v3080_v1  ;;  %v2945_v60 = vmul.f32 %v6489_v34, %v7694_v62  ;;  %v2946_v25 = vmul.f32 %v6494_v50, %v7695_v14  ;;  %v3082_v26 = vmul.f32 %v6517_v6, %v7696_v11  ;;  %v7704_v58 = vld [vmem:[#allocation117_spill] sm:$0xff]  ;;  %v7706_v62 = vld [vmem:[#allocation144_spill] sm:$0xff] }
 0x421   :  { %3864 = vmatmul.mubr.f32.vlgmr.msra.gmra.mrb[16].mxu1 %v3194_v12  ;;  %v3004_v42 = vadd.f32 %v3003_v36, %v2943_v37  ;;  %v3083_v35 = vmul.f32 %v6522_v38, %v7697_v40  ;;  %v3084_v30 = vmul.f32 %v6527_v29, %v7698_v16  ;;  %v2816_v10 = vmul.f32 %v6504_v61, %v7699_v28  ;;  %v7701_v37 = vld [vmem:[#allocation62_spill] sm:$0xff]  ;;  %v7707_v14 = vld [vmem:[#allocation164_spill] sm:$0xff] }
 0x422   :  { %v3142_v53 = vadd.f32 %v3141_v51, %v3081_v15  ;;  %v2817_v19 = vmul.f32 %v6512_v27, %v7700_v41  ;;  %v2875_v2 = vadd.f32 %v2874_v55, %v2815_v56  ;;  %v2915_v31 = vmul.f32 %v6534_v44, %v2873_v9  ;;  %v7703_v15 = vld [vmem:[#allocation67_spill] sm:$0xff] }
 0x423   :  { %v3005_v22 = vadd.f32 %v3004_v42, %v2944_v45  ;;  %v2947_v3 = vmul.f32 %v6499_v43, %v7701_v37  ;;  %v3006_v48 = vadd.f32 %v2946_v25, %v2945_v60  ;;  %v3085_v20 = vmul.f32 %v6489_v34, %v7702_v8  ;;  %v7705_v51 = vld [vmem:[#allocation83_spill] sm:$0xff]  ;;  %v7711_v37 = vld [vmem:[#allocation126_spill] sm:$0xff] }
 0x424   :  { %v3143_v4 = vadd.f32 %v3142_v53, %v3082_v26  ;;  %v2876_v1 = vadd.f32 %v2875_v2, %v2816_v10  ;;  %v3086_v12 = vmul.f32 %v6494_v50, %v7703_v15  ;;  %v2818_v56 = vmul.f32 %v6517_v6, %v7704_v58  ;;  %v7708_v26 = vld [vmem:[#allocation97_spill] sm:$0xff]  ;;  %v7709_v53 = vld [vmem:[#allocation86_spill] sm:$0xff] }
 0x425   :  { %v3047_v36 = vmul.f32 %v6547_v63, %v3005_v22  ;;  %v2948_v45 = vmul.f32 %v6504_v61, %v7705_v51  ;;  %v3007_v9 = vadd.f32 %v3006_v48, %v2947_v3  ;;  %v2819_v60 = vmul.f32 %v6522_v38, %v7706_v62  ;;  %v7710_v22 = vld [vmem:[#allocation68_spill] sm:$0xff]  ;;  %v7712_v48 = vld [vmem:[#allocation143_spill] sm:$0xff] }
 0x426   :  { %v3144_v55 = vadd.f32 %v3143_v4, %v3083_v35  ;;  %v2820_v25 = vmul.f32 %v6527_v29, %v7707_v14  ;;  %v2877_v42 = vadd.f32 %v2876_v1, %v2817_v19  ;;  %v2949_v40 = vmul.f32 %v6512_v27, %v7708_v26  ;;  %v7713_v4 = vld [vmem:[#allocation71_spill] sm:$0xff] }
 0x427   :  { %v3055_v11 = vadd.f32 %v3047_v36, %v2915_v31  ;;  %v3008_v16 = vadd.f32 %v3007_v9, %v2948_v45  ;;  %v3087_v28 = vmul.f32 %v6499_v43, %v7709_v53  ;;  %v3146_v2 = vadd.f32 %v3086_v12, %v3085_v20  ;;  %v7714_v36 = vld [vmem:[#allocation104_spill] sm:$0xff]  ;;  %v7715_v12 = vld [vmem:[#allocation163_spill] sm:$0xff]  ;;  %v7717_v9 = vld [vmem:[#allocation85_spill] sm:$0xff] }
 0x428   :  { %v3145_v10 = vadd.f32 %v3144_v55, %v3084_v30  ;;  %v2878_v41 = vadd.f32 %v2877_v42, %v2818_v56  ;;  %v2821_v35 = vmul.f32 %v6489_v34, %v7710_v22  ;;  %v2950_v3 = vmul.f32 %v6517_v6, %v7711_v37  ;;  %v7716_v51 = vld [vmem:[#allocation127_spill] sm:$0xff]  ;;  %v7720_v22 = vld [vmem:[#allocation105_spill] sm:$0xff] }
 0x429   :  { %v2951_v19 = vmul.f32 %v6522_v38, %v7712_v48  ;;  %v3009_v31 = vadd.f32 %v3008_v16, %v2949_v40  ;;  %v2822_v1 = vmul.f32 %v6494_v50, %v7713_v4  ;;  %v3088_v30 = vmul.f32 %v6504_v61, %v7714_v36  ;;  %v7721_v37 = vld [vmem:[#allocation191_spill] sm:$0xff] }
 0x42a   :  { %v3187_v8 = vmul.f32 %v6550_v17, %v3145_v10  ;;  %v2879_v15 = vadd.f32 %v2878_v41, %v2819_v60  ;;  %v3147_v20 = vadd.f32 %v3146_v2, %v3087_v28  ;;  %v2952_v58 = vmul.f32 %v6527_v29, %v7715_v12  ;;  %v7718_v60 = vld [vmem:[#allocation147_spill] sm:$0xff]  ;;  %v7719_v10 = vld [vmem:[#allocation170_spill] sm:$0xff] }
 0x42b   :  { %v3010_v56 = vadd.f32 %v3009_v31, %v2950_v3  ;;  %v3089_v45 = vmul.f32 %v6512_v27, %v7716_v51  ;;  %v2823_v55 = vmul.f32 %v6499_v43, %v7717_v9  ;;  %v2881_v26 = vadd.f32 %v2822_v1, %v2821_v35 }
 0x42c   :  { %v3195_v62 = vadd.f32 %v3187_v8, %v3055_v11  ;;  %v2880_v14 = vadd.f32 %v2879_v15, %v2820_v25  ;;  %v3148_v42 = vadd.f32 %v3147_v20, %v3088_v30  ;;  %v3090_v16 = vmul.f32 %v6517_v6, %v7718_v60  ;;  %v7722_v15 = vld [vmem:[#allocation91_spill] sm:$0xff]  ;;  %v7723_v30 = vld [vmem:[#allocation96_spill] sm:$0xff] }
 0x42d   :  { %v3011_v40 = vadd.f32 %v3010_v56, %v2951_v19  ;;  %v2953_v53 = vmul.f32 %v6489_v34, %v7598_v18  ;;  %v2954_v28 = vmul.f32 %v6494_v50, %v7599_v49  ;;  %v3091_v41 = vmul.f32 %v6522_v38, %v7719_v10  ;;  %v7724_v56 = vld [vmem:[#allocation169_spill] sm:$0xff] }
 0x42e   :  { %3866 = vmatprep.mubr.f32.mxu1 %v3195_v62  ;;  %v3149_v2 = vadd.f32 %v3148_v42, %v3089_v45  ;;  %v2824_v25 = vmul.f32 %v6504_v61, %v7720_v22  ;;  %v2882_v11 = vadd.f32 %v2881_v26, %v2823_v55  ;;  %v3092_v3 = vmul.f32 %v6527_v29, %v7721_v37  ;;  %v7725_v45 = vld [vmem:[#allocation188_spill] sm:$0xff] }
 0x42f   :  { %v3012_v35 = vadd.f32 %v3011_v40, %v2952_v58  ;;  %v2825_v48 = vmul.f32 %v6512_v27, %v7595_v39  ;;  %v2955_v18 = vmul.f32 %v6499_v43, %v7601_v5  ;;  %v2916_v49 = vmul.f32 %v6534_v44, %v2880_v14  ;;  %v7726_v40 = vld [vmem:[#allocation115_spill] sm:$0xff] }
 0x430   :  { %v3150_v19 = vadd.f32 %v3149_v2, %v3090_v16  ;;  %v2883_v31 = vadd.f32 %v2882_v11, %v2824_v25  ;;  %v3013_v4 = vadd.f32 %v2954_v28, %v2953_v53  ;;  %v2826_v8 = vmul.f32 %v6517_v6, %v7596_v13  ;;  %v7727_v16 = vld [vmem:[#allocation76_spill] sm:$0xff]  ;;  %v7728_v28 = vld [vmem:[#allocation81_spill] sm:$0xff] }
 0x431   :  { %v3048_v1 = vmul.f32 %v6547_v63, %v3012_v35  ;;  %v3093_v36 = vmul.f32 %v6489_v34, %v7722_v15  ;;  %v3094_v20 = vmul.f32 %v6494_v50, %v7723_v30  ;;  %v2956_v5 = vmul.f32 %v6504_v61, %v7602_v33  ;;  %v7729_v25 = vld [vmem:[#allocation137_spill] sm:$0xff]  ;;  %v7730_v35 = vld [vmem:[#allocation162_spill] sm:$0xff]  ;;  %v7733_v15 = vld [vmem:[#allocation84_spill] sm:$0xff] }
 0x432   :  { %v3151_v39 = vadd.f32 %v3150_v19, %v3091_v41  ;;  %v2884_v12 = vadd.f32 %v2883_v31, %v2825_v48  ;;  %v3014_v58 = vadd.f32 %v3013_v4, %v2955_v18  ;;  %v2827_v51 = vmul.f32 %v6522_v38, %v7724_v56  ;;  %v7731_v19 = vld [vmem:[#allocation95_spill] sm:$0xff]  ;;  %v7734_v30 = vld [vmem:[#allocation180_spill] sm:$0xff] }
 0x433   :  { %v2828_v9 = vmul.f32 %v6527_v29, %v7725_v45  ;;  %v2957_v13 = vmul.f32 %v6512_v27, %v7603_v32  ;;  %v2958_v55 = vmul.f32 %v6517_v6, %v7604_v23  ;;  %v3056_v62 = vadd.f32 %v3048_v1, %v2916_v49 }
 0x434   :  { %v3152_v14 = vadd.f32 %v3151_v39, %v3092_v3  ;;  %v2885_v42 = vadd.f32 %v2884_v12, %v2826_v8  ;;  %v3015_v26 = vadd.f32 %v3014_v58, %v2956_v5  ;;  %v3095_v33 = vmul.f32 %v6499_v43, %v7726_v40  ;;  %v7735_v39 = vld [vmem:[#allocation22_spill] sm:$0xff]  ;;  %v7736_v5 = vld [vmem:[#allocation216_spill] sm:$0xff] }
 0x435   :  { %v3153_v60 = vadd.f32 %v3094_v20, %v3093_v36  ;;  %v2829_v53 = vmul.f32 %v6489_v34, %v7727_v16  ;;  %v2830_v10 = vmul.f32 %v6494_v50, %v7728_v28  ;;  %v2959_v23 = vmul.f32 %v6522_v38, %v7611_v57  ;;  %v7732_v57 = vld [vmem:[#allocation80_spill] sm:$0xff]  ;;  %v7740_v16 = vld [vmem:[#allocation101_spill] sm:$0xff]  ;;  %v7741_v28 = vld [vmem:[#allocation106_spill] sm:$0xff] }
 0x436   :  { %v3188_v41 = vmul.f32 %v6550_v17, %v3152_v14  ;;  %v2886_v32 = vadd.f32 %v2885_v42, %v2827_v51  ;;  %v3016_v2 = vadd.f32 %v3015_v26, %v2957_v13  ;;  %v2960_v22 = vmul.f32 %v6527_v29, %v7613_v47  ;;  %v7737_v51 = vld [vmem:[#allocation122_spill] sm:$0xff] }
 0x437   :  { %v3096_v11 = vmul.f32 %v6504_v61, %v7729_v25  ;;  %v3097_v37 = vmul.f32 %v6512_v27, %v7730_v35  ;;  %v3154_v3 = vadd.f32 %v3153_v60, %v3095_v33  ;;  %v2831_v31 = vmul.f32 %v6499_v43, %v7731_v19  ;;  %v7739_v42 = vld [vmem:[#allocation102_spill] sm:$0xff]  ;;  %v7746_v19 = vld [vmem:[#allocation148_spill] sm:$0xff] }
 0x438   :  { %v3196_v48 = vadd.f32 %v3188_v41, %v3056_v62  ;;  %v2887_v18 = vadd.f32 %v2886_v32, %v2828_v9  ;;  %v3017_v49 = vadd.f32 %v3016_v2, %v2958_v55  ;;  %v2888_v1 = vadd.f32 %v2830_v10, %v2829_v53  ;;  %v7738_v9 = vld [vmem:[#allocation141_spill] sm:$0xff]  ;;  %v7743_v2 = vld [vmem:[#allocation123_spill] sm:$0xff]  ;;  %v7744_v35 = vld [vmem:[#allocation182_spill] sm:$0xff] }
 0x439   :  { %v3155_v4 = vadd.f32 %v3154_v3, %v3096_v11  ;;  %v2961_v8 = vmul.f32 %v6489_v34, %v7732_v57  ;;  %v2962_v47 = vmul.f32 %v6494_v50, %v7733_v15  ;;  %v3098_v20 = vmul.f32 %v6517_v6, %v7734_v30  ;;  %v7742_v32 = vld [vmem:[#allocation161_spill] sm:$0xff]  ;;  %v7745_v3 = vld [vmem:[#allocation199_spill] sm:$0xff] }
 0x43a   :  { %3867 = vmatmul.mubr.f32.gmra.mrb[18].mxu1 %v3196_v48  ;;  %v3018_v36 = vadd.f32 %v3017_v49, %v2959_v23  ;;  %v3099_v12 = vmul.f32 %v6522_v38, %v7735_v39  ;;  %v3100_v58 = vmul.f32 %v6527_v29, %v7736_v5  ;;  %v2832_v45 = vmul.f32 %v6504_v61, %v7737_v51  ;;  %v7751_v51 = vld [vmem:[#allocation107_spill] sm:$0xff] }
 0x43b   :  { %v3156_v56 = vadd.f32 %v3155_v4, %v3097_v37  ;;  %v2833_v13 = vmul.f32 %v6512_v27, %v7738_v9  ;;  %v2889_v55 = vadd.f32 %v2888_v1, %v2831_v31  ;;  %v2917_v62 = vmul.f32 %v6534_v44, %v2887_v18  ;;  %v7747_v1 = vld [vmem:[#allocation132_spill] sm:$0xff] }
 0x43c   :  { %v3019_v14 = vadd.f32 %v3018_v36, %v2960_v22  ;;  %v2963_v26 = vmul.f32 %v6499_v43, %v7739_v42  ;;  %v3020_v40 = vadd.f32 %v2962_v47, %v2961_v8  ;;  %v3101_v53 = vmul.f32 %v6489_v34, %v7740_v16  ;;  %v7748_v36 = vld [vmem:[#allocation110_spill] sm:$0xff] }
 0x43d   :  { %v3157_v33 = vadd.f32 %v3156_v56, %v3098_v20  ;;  %v2890_v60 = vadd.f32 %v2889_v55, %v2832_v45  ;;  %v3102_v10 = vmul.f32 %v6494_v50, %v7741_v28  ;;  %v2834_v23 = vmul.f32 %v6517_v6, %v7742_v32  ;;  %v7749_v20 = vld [vmem:[#allocation168_spill] sm:$0xff] }
 0x43e   :  { %v3049_v41 = vmul.f32 %v6547_v63, %v3019_v14  ;;  %v2964_v22 = vmul.f32 %v6504_v61, %v7743_v2  ;;  %v3021_v25 = vadd.f32 %v3020_v40, %v2963_v26  ;;  %v2835_v37 = vmul.f32 %v6522_v38, %v7744_v35  ;;  %v7752_v55 = vld [vmem:[#allocation152_spill] sm:$0xff]  ;;  %v7753_v14 = vld [vmem:[#allocation205_spill] sm:$0xff]  ;;  %v7754_v40 = vld [vmem:[#allocation167_spill] sm:$0xff] }
 0x43f   :  { %v3158_v11 = vadd.f32 %v3157_v33, %v3099_v12  ;;  %v2836_v48 = vmul.f32 %v6527_v29, %v7745_v3  ;;  %v2891_v18 = vadd.f32 %v2890_v60, %v2833_v13  ;;  %v2965_v31 = vmul.f32 %v6512_v27, %v7746_v19  ;;  %v7750_v12 = vld [vmem:[#allocation186_spill] sm:$0xff]  ;;  %v7755_v60 = vld [vmem:[#allocation131_spill] sm:$0xff]  ;;  %v7760_v19 = vld [vmem:[#allocation153_spill] sm:$0xff] }
 0x440   :  { %v3057_v49 = vadd.f32 %v3049_v41, %v2917_v62  ;;  %v3022_v4 = vadd.f32 %v3021_v25, %v2964_v22  ;;  %v3103_v57 = vmul.f32 %v6499_v43, %v7747_v1  ;;  %v3160_v47 = vadd.f32 %v3102_v10, %v3101_v53  ;;  %v7757_v22 = vld [vmem:[#allocation111_spill] sm:$0xff] }
 0x441   :  { %v3159_v8 = vadd.f32 %v3158_v11, %v3100_v58  ;;  %v2892_v15 = vadd.f32 %v2891_v18, %v2834_v23  ;;  %v2837_v30 = vmul.f32 %v6489_v34, %v7748_v36  ;;  %v2966_v39 = vmul.f32 %v6517_v6, %v7749_v20  ;;  %v7756_v23 = vld [vmem:[#allocation18_spill] sm:$0xff]  ;;  %v7758_v11 = vld [vmem:[#allocation116_spill] sm:$0xff] }
 0x442   :  { %v2967_v5 = vmul.f32 %v6522_v38, %v7750_v12  ;;  %v3023_v56 = vadd.f32 %v3022_v4, %v2965_v31  ;;  %v2838_v45 = vmul.f32 %v6494_v50, %v7751_v51  ;;  %v3104_v58 = vmul.f32 %v6504_v61, %v7752_v55  ;;  %v7761_v4 = vld [vmem:[#allocation219_spill] sm:$0xff]  ;;  %v7765_v51 = vld [vmem:[#allocation142_spill] sm:$0xff] }
 0x443   :  { %v3189_v9 = vmul.f32 %v6550_v17, %v3159_v8  ;;  %v2893_v13 = vadd.f32 %v2892_v15, %v2835_v37  ;;  %v3161_v62 = vadd.f32 %v3160_v47, %v3103_v57  ;;  %v2968_v42 = vmul.f32 %v6527_v29, %v7753_v14  ;;  %v7759_v37 = vld [vmem:[#allocation210_spill] sm:$0xff] }
 0x444   :  { %v3024_v26 = vadd.f32 %v3023_v56, %v2966_v39  ;;  %v3105_v33 = vmul.f32 %v6512_v27, %v7754_v40  ;;  %v2839_v16 = vmul.f32 %v6499_v43, %v7755_v60  ;;  %v2895_v41 = vadd.f32 %v2838_v45, %v2837_v30  ;;  %v7762_v57 = vld [vmem:[#allocation174_spill] sm:$0xff] }
 0x445   :  { %v3197_v53 = vadd.f32 %v3189_v9, %v3057_v49  ;;  %v2894_v28 = vadd.f32 %v2893_v13, %v2836_v48  ;;  %v3162_v10 = vadd.f32 %v3161_v62, %v3104_v58  ;;  %v3106_v2 = vmul.f32 %v6517_v6, %v7756_v23  ;;  %v7763_v15 = vld [vmem:[#allocation138_spill] sm:$0xff]  ;;  %v7766_v9 = vld [vmem:[#allocation139_spill] sm:$0xff]  ;;  %v7767_v62 = vld [vmem:[#allocation160_spill] sm:$0xff] }
 0x446   :  { %v3025_v32 = vadd.f32 %v3024_v26, %v2967_v5  ;;  %v2969_v25 = vmul.f32 %v6489_v34, %v7757_v22  ;;  %v2970_v35 = vmul.f32 %v6494_v50, %v7758_v11  ;;  %v3107_v3 = vmul.f32 %v6522_v38, %v7759_v37  ;;  %v7764_v5 = vld [vmem:[#allocation21_spill] sm:$0xff]  ;;  %v7768_v26 = vld [vmem:[#allocation214_spill] sm:$0xff]  ;;  %v7771_v23 = vld [vmem:[#allocation159_spill] sm:$0xff] }
 0x447   :  { %3869 = vmatprep.mubr.f32.mxu1 %v3197_v53  ;;  %v3163_v18 = vadd.f32 %v3162_v10, %v3105_v33  ;;  %v2840_v48 = vmul.f32 %v6504_v61, %v7760_v19  ;;  %v2896_v49 = vadd.f32 %v2895_v41, %v2839_v16  ;;  %v3108_v1 = vmul.f32 %v6527_v29, %v7761_v4  ;;  %v7769_v33 = vld [vmem:[#allocation221_spill] sm:$0xff]  ;;  %v7770_v16 = vld [vmem:[#allocation176_spill] sm:$0xff]  ;;  %v7774_v19 = vld [vmem:[#allocation203_spill] sm:$0xff] }
 0x448   :  { %v3026_v31 = vadd.f32 %v3025_v32, %v2968_v42  ;;  %v2841_v8 = vmul.f32 %v6512_v27, %v7762_v57  ;;  %v2971_v47 = vmul.f32 %v6499_v43, %v7763_v15  ;;  %v2918_v36 = vmul.f32 %v6534_v44, %v2894_v28 }
 0x449   :  { %v3164_v30 = vadd.f32 %v3163_v18, %v3106_v2  ;;  %v2897_v20 = vadd.f32 %v2896_v49, %v2840_v48  ;;  %v3027_v39 = vadd.f32 %v2970_v35, %v2969_v25  ;;  %v2842_v56 = vmul.f32 %v6517_v6, %v7764_v5  ;;  %v7772_v25 = vld [vmem:[#allocation119_spill] sm:$0xff]  ;;  %v7773_v35 = vld [vmem:[#allocation124_spill] sm:$0xff] }
 0x44a   :  { %v3050_v12 = vmul.f32 %v6547_v63, %v3026_v31  ;;  %v3109_v45 = vmul.f32 %v6489_v34, %v7765_v51  ;;  %v3110_v13 = vmul.f32 %v6494_v50, %v7766_v9  ;;  %v2972_v14 = vmul.f32 %v6504_v61, %v7767_v62  ;;  %v7775_v31 = vld [vmem:[#allocation220_spill] sm:$0xff]  ;;  %v7780_v9 = vld [vmem:[#allocation125_spill] sm:$0xff] }
 0x44b   :  { %v3165_v55 = vadd.f32 %v3164_v30, %v3107_v3  ;;  %v2898_v58 = vadd.f32 %v2897_v20, %v2841_v8  ;;  %v3028_v42 = vadd.f32 %v3027_v39, %v2971_v47  ;;  %v2843_v40 = vmul.f32 %v6522_v38, %v7768_v26  ;;  %v7777_v8 = vld [vmem:[#allocation208_spill] sm:$0xff]  ;;  %v7778_v39 = vld [vmem:[#allocation146_spill] sm:$0xff]  ;;  %v7783_v26 = vld [vmem:[#allocation223_spill] sm:$0xff] }
 0x44c   :  { %v2844_v60 = vmul.f32 %v6527_v29, %v7769_v33  ;;  %v2973_v53 = vmul.f32 %v6512_v27, %v7770_v16  ;;  %v3058_v28 = vadd.f32 %v3050_v12, %v2918_v36  ;;  %v3111_v2 = vmul.f32 %v6499_v43, %v7771_v23  ;;  %v7779_v51 = vld [vmem:[#allocation128_spill] sm:$0xff]  ;;  %v7786_v23 = vld [vmem:[#allocation145_spill] sm:$0xff] }
 0x44d   :  { %v3166_v10 = vadd.f32 %v3165_v55, %v3108_v1  ;;  %v2899_v41 = vadd.f32 %v2898_v58, %v2842_v56  ;;  %v3029_v32 = vadd.f32 %v3028_v42, %v2972_v14  ;;  %v3167_v22 = vadd.f32 %v3110_v13, %v3109_v45  ;;  %v7776_v1 = vld [vmem:[#allocation175_spill] sm:$0xff]  ;;  %v7781_v55 = vld [vmem:[#allocation228_spill] sm:$0xff]  ;;  %v7782_v14 = vld [vmem:[#allocation222_spill] sm:$0xff] }
 0x44e   :  { %v2845_v11 = vmul.f32 %v6489_v34, %v7772_v25  ;;  %v2846_v37 = vmul.f32 %v6494_v50, %v7773_v35  ;;  %v2974_v48 = vmul.f32 %v6517_v6, %v7774_v19  ;;  %v2975_v4 = vmul.f32 %v6522_v38, %v7775_v31  ;;  %v7787_v35 = vld [vmem:[#allocation149_spill] sm:$0xff] }
 0x44f   :  { %v3190_v3 = vmul.f32 %v6550_v17, %v3166_v10  ;;  %v2900_v18 = vadd.f32 %v2899_v41, %v2843_v40  ;;  %v3030_v49 = vadd.f32 %v3029_v32, %v2973_v53  ;;  %v3112_v57 = vmul.f32 %v6504_v61, %v7776_v1  ;;  %v7785_v53 = vld [vmem:[#allocation177_spill] sm:$0xff] }
 0x450   :  { %v3113_v15 = vmul.f32 %v6512_v27, %v7777_v8  ;;  %v3168_v47 = vadd.f32 %v3167_v22, %v3111_v2  ;;  %v2847_v12 = vmul.f32 %v6499_v43, %v7778_v39  ;;  %v2902_v56 = vadd.f32 %v2846_v37, %v2845_v11  ;;  %v7791_v8 = vld [vmem:[#allocation213_spill] sm:$0xff]  ;;  %v7794_v39 = vld [vmem:[#allocation172_spill] sm:$0xff] }
 0x451   :  { %v3198_v36 = vadd.f32 %v3190_v3, %v3058_v28  ;;  %v2901_v30 = vadd.f32 %v2900_v18, %v2844_v60  ;;  %v3031_v20 = vadd.f32 %v3030_v49, %v2974_v48  ;;  %v2977_v45 = vmul.f32 %v6489_v34, %v7779_v51  ;;  %v7784_v60 = vld [vmem:[#allocation166_spill] sm:$0xff]  ;;  %v7789_v48 = vld [vmem:[#allocation165_spill] sm:$0xff] }
 0x452   :  { %v3169_v5 = vadd.f32 %v3168_v47, %v3112_v57  ;;  %v2978_v13 = vmul.f32 %v6494_v50, %v7780_v9  ;;  %v2976_v58 = vmul.f32 %v6527_v29, %v7781_v55  ;;  %v3114_v42 = vmul.f32 %v6517_v6, %v7782_v14  ;;  %v7788_v3 = vld [vmem:[#allocation154_spill] sm:$0xff]  ;;  %v7795_v9 = vld [vmem:[#allocation23_spill] sm:$0xff] }
 0x453   :  { %3870 = vmatmul.mubr.f32.gmra.mrb[20].mxu1 %v3198_v36  ;;  %v3032_v62 = vadd.f32 %v3031_v20, %v2975_v4  ;;  %v3115_v40 = vmul.f32 %v6522_v38, %v7783_v26  ;;  %v2848_v16 = vmul.f32 %v6504_v61, %v7784_v60  ;;  %v2849_v28 = vmul.f32 %v6512_v27, %v7785_v53  ;;  %v7790_v4 = vld [vmem:[#allocation227_spill] sm:$0xff]  ;;  %v7792_v36 = vld [vmem:[#allocation217_spill] sm:$0xff]  ;;  %v7798_v60 = vld [vmem:[#allocation224_spill] sm:$0xff] }
 0x454   :  { %v3170_v33 = vadd.f32 %v3169_v5, %v3113_v15  ;;  %v2903_v10 = vadd.f32 %v2902_v56, %v2847_v12  ;;  %v2919_v41 = vmul.f32 %v6534_v44, %v2901_v30  ;;  %v2979_v2 = vmul.f32 %v6499_v43, %v7786_v23  ;;  %v7793_v30 = vld [vmem:[#allocation181_spill] sm:$0xff]  ;;  %v7796_v55 = vld [vmem:[#allocation215_spill] sm:$0xff] }
 0x455   :  { %v3033_v32 = vadd.f32 %v3032_v62, %v2976_v58  ;;  %v3034_v22 = vadd.f32 %v2978_v13, %v2977_v45  ;;  %v3117_v37 = vmul.f32 %v6489_v34, %v7787_v35  ;;  %v3118_v18 = vmul.f32 %v6494_v50, %v7788_v3  ;;  %v7797_v26 = vld [vmem:[#allocation19_spill] sm:$0xff]  ;;  %v7800_v23 = vld [vmem:[#allocation225_spill] sm:$0xff] }
 0x456   :  { %v3171_v25 = vadd.f32 %v3170_v33, %v3114_v42  ;;  %v2904_v11 = vadd.f32 %v2903_v10, %v2848_v16  ;;  %v2980_v49 = vmul.f32 %v6504_v61, %v7789_v48  ;;  %v3116_v1 = vmul.f32 %v6527_v29, %v7790_v4  ;;  %v7799_v10 = vld [vmem:[#allocation218_spill] sm:$0xff] }
 0x457   :  { %v3051_v19 = vmul.f32 %v6547_v63, %v3033_v32  ;;  %v3035_v31 = vadd.f32 %v3034_v22, %v2979_v2  ;;  %v2850_v15 = vmul.f32 %v6517_v6, %v7791_v8  ;;  %v2851_v34 = vmul.f32 %v6522_v38, %v7792_v36  ;;  %v3361_v36 = vld [vmem:[#allocation7 + $0x40] sm:$0xff] }
 0x458   :  { %v3172_v57 = vadd.f32 %v3171_v25, %v3115_v40  ;;  %v2905_v47 = vadd.f32 %v2904_v11, %v2849_v28  ;;  %v2981_v50 = vmul.f32 %v6512_v27, %v7793_v30  ;;  %v3119_v12 = vmul.f32 %v6499_v43, %v7794_v39  ;;  %v7801_v25 = vld [vmem:[#allocation226_spill] sm:$0xff]  ;;  %v3363_v30 = vld [vmem:[#allocation7 + $0x50] sm:$0xff] }
 0x459   :  { %v3036_v20 = vadd.f32 %v3035_v31, %v2980_v49  ;;  %v3059_v5 = vadd.f32 %v3051_v19, %v2919_v41  ;;  %v3174_v45 = vadd.f32 %v3118_v18, %v3117_v37  ;;  %v2852_v13 = vmul.f32 %v6527_v29, %v7795_v9 }
 0x45a   :  { %v3173_v56 = vadd.f32 %v3172_v57, %v3116_v1  ;;  %v2906_v51 = vadd.f32 %v2905_v47, %v2850_v15  ;;  %v2982_v58 = vmul.f32 %v6517_v6, %v7796_v55  ;;  %v3120_v40 = vmul.f32 %v6504_v61, %v7797_v26  ;;  %v3354_v57 = vld [vmem:[#allocation7 + $0x8] sm:$0xff]  ;;  %v3360_v15 = vld [vmem:[#allocation7 + $0x38] sm:$0xff]  ;;  %v7802_v55 = vld [vmem:[#allocation183_spill] sm:$0xff] }
 0x45b   :  { %v3037_v62 = vadd.f32 %v3036_v20, %v2981_v50  ;;  %v3175_v33 = vadd.f32 %v3174_v45, %v3119_v12  ;;  %v2983_v43 = vmul.f32 %v6522_v38, %v7798_v60  ;;  %v3121_v41 = vmul.f32 %v6512_v27, %v7799_v10  ;;  %v3364_v20 = vld [vmem:[#allocation7 + $0x58] sm:$0xff]  ;;  %v3365_v12 = vld [vmem:[#allocation7 + $0x60] sm:$0xff] }
 0x45c   :  { %v3191_v14 = vmul.f32 %v6550_v17, %v3173_v56  ;;  %v2907_v42 = vadd.f32 %v2906_v51, %v2851_v34  ;;  %v2984_v2 = vmul.f32 %v6527_v29, %v7800_v23  ;;  %v3122_v11 = vmul.f32 %v6517_v6, %v7801_v25  ;;  %v3353_v6 = vld [vmem:[#allocation7] sm:$0xff]  ;;  %v3362_v34 = vld [vmem:[#allocation7 + $0x48] sm:$0xff]  ;;  %v3367_v51 = vld [vmem:[#allocation7 + $0x70] sm:$0xff] }
 0x45d   :  { %v3038_v16 = vadd.f32 %v3037_v62, %v2982_v58  ;;  %v3176_v32 = vadd.f32 %v3175_v33, %v3120_v40  ;;  %v3123_v3 = vmul.f32 %v6522_v38, %v6365_v7  ;;  %v3124_v27 = vmul.f32 %v6527_v29, %v6392_v46  ;;  %v3355_v7 = vld [vmem:[#allocation7 + $0x10] sm:$0xff]  ;;  %v3356_v38 = vld [vmem:[#allocation7 + $0x18] sm:$0xff]  ;;  %v3357_v46 = vld [vmem:[#allocation7 + $0x20] sm:$0xff] }
 0x45e   :  { %v3199_v53 = vadd.f32 %v3191_v14, %v3059_v5  ;;  %v2908_v28 = vadd.f32 %v2907_v42, %v2852_v13  ;;  %v4077_v8 = vpack.c.bf16 %v3354_v57, %v3353_v6  ;;  %v3358_v29 = vld [vmem:[#allocation7 + $0x28] sm:$0xff]  ;;  %v4089_v50 = vpack.c.bf16 %v3362_v34, %v3361_v36  ;;  %v3368_v45 = vld [vmem:[#allocation7 + $0x78] sm:$0xff]  ;;  %v3539_v57 = vld [vmem:[#allocation7 + $0x100] sm:$0xff] }
 0x45f   :  { %v3039_v22 = vadd.f32 %v3038_v16, %v2983_v43  ;;  %v3177_v61 = vadd.f32 %v3176_v32, %v3121_v41  ;;  %v4092_v39 = vpack.c.bf16 %v3364_v20, %v3363_v30  ;;  %v3366_v5 = vld [vmem:[#allocation7 + $0x68] sm:$0xff]  ;;  %v4098_v9 = vpack.c.bf16 %v3368_v45, %v3367_v51  ;;  %v7803_v14 = vld [vmem:[#allocation178_spill] sm:$0xff]  ;;  %v7805_v16 = vld [vmem:[#allocation187_spill] sm:$0xff] }
 0x460   :  { %3872 = vmatprep.mubr.f32.mxu1 %v3199_v53  ;;  %v2920_v37 = vmul.f32 %v6534_v44, %v2908_v28  ;;  %4078 = vmatpush3.bf16.msra.mxu0 %v4077_v8  ;;  %v4080_v44 = vpack.c.bf16 %v3356_v38, %v3355_v7  ;;  %v4095_v56 = vpack.c.bf16 %v3366_v5, %v3365_v12  ;;  %v7804_v33 = vld [vmem:[#allocation192_spill] sm:$0xff]  ;;  %v7806_v32 = vld [vmem:[#allocation198_spill] sm:$0xff]  ;;  %v3545_v36 = vld [vmem:[#allocation7 + $0x130] sm:$0xff] }
 0x461   :  { %v3040_v35 = vadd.f32 %v3039_v22, %v2984_v2  ;;  %v3178_v18 = vadd.f32 %v3177_v61, %v3122_v11  ;;  %4079 = vmatprep.subr.bf16.mxu0 %v4350_v52  ;;  %v7807_v22 = vld [vmem:[#allocation195_spill] sm:$0xff]  ;;  %v3540_v8 = vld [vmem:[#allocation7 + $0x108] sm:$0xff]  ;;  %v3546_v34 = vld [vmem:[#allocation7 + $0x138] sm:$0xff] }
 0x462   :  { %v4110_v30 = vpack.c.bf16 %v3546_v34, %v3545_v36  ;;  %v3548_v20 = vld [vmem:[#allocation7 + $0x148] sm:$0xff]  ;;  %v3550_v12 = vld [vmem:[#allocation7 + $0x158] sm:$0xff]  ;;  %v3551_v51 = vld [vmem:[#allocation7 + $0x160] sm:$0xff] }
 0x463   :  { %v3052_v19 = vmul.f32 %v6547_v63, %v3040_v35  ;;  %v3179_v48 = vadd.f32 %v3178_v18, %v3123_v3  ;;  %v4083_v63 = vpack.c.bf16 %v3358_v29, %v3357_v46  ;;  %v4101_v46 = vpack.c.bf16 %v3540_v8, %v3539_v57  ;;  %v3541_v29 = vld [vmem:[#allocation7 + $0x110] sm:$0xff]  ;;  %v7811_v5 = vld [vmem:[#allocation202_spill] sm:$0xff]  ;;  %v3552_v45 = vld [vmem:[#allocation7 + $0x168] sm:$0xff] }
 0x464   :  { %4081 = vmatpush3.bf16.msra.mxu0 %v4080_v44 }
 0x465   :  { %v3060_v49 = vadd.f32 %v3052_v19, %v2920_v37  ;;  %v3180_v31 = vadd.f32 %v3179_v48, %v3124_v27  ;;  %4082 = vmatprep.subr.bf16.mxu0 %v4350_v52  ;;  %v7808_v37 = vld [vmem:[#allocation209_spill] sm:$0xff]  ;;  %v7809_v19 = vld [vmem:[#allocation204_spill] sm:$0xff] }
 0x467   :  { %v3192_v4 = vmul.f32 %v6550_v17, %v3180_v31  ;;  %v3359_v17 = vld [vmem:[#allocation7 + $0x30] sm:$0xff] }
 0x468   :  { %4084 = vmatpush3.bf16.msra.mxu0 %v4083_v63  ;;  %v4086_v47 = vpack.c.bf16 %v3360_v15, %v3359_v17  ;;  %v3542_v63 = vld [vmem:[#allocation7 + $0x118] sm:$0xff] }
 0x469   :  { %v3200_v1 = vadd.f32 %v3192_v4, %v3060_v49  ;;  %4085 = vmatprep.subr.bf16.mxu0 %v4350_v52  ;;  %v7810_v49 = vld [vmem:[#allocation212_spill] sm:$0xff]  ;;  %v3342_v4 = vrot.slane %v6474_v54, %v7626_v24  ;;  %v4104_v15 = vpack.c.bf16 %v3542_v63, %v3541_v29  ;;  %v3543_v54 = vld [vmem:[#allocation7 + $0x120] sm:$0xff] }
 0x46a   :  { %4243 = vlog2.f32 %v7810_v49 }
 0x46b   :  { %3873 = vmatmul.mubr.f32.gmra.mrb[22].mxu1 %v3200_v1  ;;  %v3350_v1 = vrot.slane %v6478_v0, %v7626_v24  ;;  %vm3343_vm8 = vcmp.eq.s32.totalorder %v3342_v4, 1  ;;  %v3544_v24 = vld [vmem:[#allocation7 + $0x128] sm:$0xff] }
 0x46c   :  { %4087 = vmatpush3.bf16.msra.mxu0 %v4086_v47  ;;  %v4107_v47 = vpack.c.bf16 %v3544_v24, %v3543_v54 }
 0x46d   :  { %4088 = vmatprep.subr.bf16.mxu0 %v4350_v52  ;;  %vm3351_vm9 = vcmp.eq.s32.totalorder %v3350_v1, 1 }
 0x470   :  { %4090 = vmatpush3.bf16.msra.mxu0 %v4089_v50  ;;  %v3547_v50 = vld [vmem:[#allocation7 + $0x140] sm:$0xff] }
 0x471   :  { %4091 = vmatprep.subr.bf16.mxu0 %v4350_v52 }
 0x474   :  { %4093 = vmatpush3.bf16.msra.mxu0 %v4092_v39  ;;  %v4244_v6 = vpop.eup %4243  ;;  %v4113_v39 = vpack.c.bf16 %v3548_v20, %v3547_v50 }
 0x475   :  { %4094 = vmatprep.subr.bf16.mxu0 %v4350_v52  ;;  %v816_v38 = vmul.f32 0.6931472, %v4244_v6 }
 0x478   :  { %4096 = vmatpush3.bf16.msra.mxu0 %v4095_v56 }
 0x479   :  { %4097 = vmatprep.subr.bf16.mxu0 %v4350_v52 }
 0x47c   :  { %4099 = vmatpush3.bf16.msra.mxu0 %v4098_v9  ;;  %v4119_v9 = vpack.c.bf16 %v3552_v45, %v3551_v51 }
 0x47d   :  { %4100 = vmatprep.subr.bf16.mxu0 %v4350_v52 }
 0x4f4   :  { %v3865_v13 = vpop.f32.mrb[16].mxu1 }
 0x4f5   :  { %v3323_v58 = vmul.f32 %v3865_v13, %v7802_v55  ;;  %v3283_v62 = vpop.f32.mrb[17].mxu1  ;;  %v3553_v13 = vld [vmem:[#allocation7 + $0x170] sm:$0xff]  ;;  %v3554_v55 = vld [vmem:[#allocation7 + $0x178] sm:$0xff] }
 0x4f6   :  { %v3322_v42 = vmul.f32 %v3283_v62, %v7803_v14  ;;  %v3535_v62 = vrot.slane %v6478_v0, %v7628_v21 }
 0x4f8   :  { %v3330_v26 = vadd.f32 %v3323_v58, %v3322_v42  ;;  %v4122_v58 = vpack.c.bf16 %v3554_v55, %v3553_v13  ;;  %vm3536_vm10 = vcmp.eq.s32.totalorder %v3535_v62, 1 }
 0x50d   :  { %v3868_v40 = vpop.f32.mrb[18].mxu1 }
 0x50e   :  { %v3325_v60 = vmul.f32 %v3868_v40, %v7804_v33  ;;  %v3293_v43 = vpop.f32.mrb[19].mxu1 }
 0x50f   :  { %v3324_v53 = vmul.f32 %v3293_v43, %v7805_v16 }
 0x511   :  { %v3331_v28 = vadd.f32 %v3330_v26, %v3324_v53 }
 0x513   :  { %v3332_v10 = vadd.f32 %v3331_v28, %v3325_v60 }
 0x526   :  { %v3871_v41 = vpop.f32.mrb[20].mxu1 }
 0x527   :  { %v3327_v23 = vmul.f32 %v3871_v41, %v7806_v32  ;;  %v3303_v2 = vpop.f32.mrb[21].mxu1 }
 0x528   :  { %v3326_v25 = vmul.f32 %v3303_v2, %v7807_v22 }
 0x52a   :  { %v3333_v11 = vadd.f32 %v3332_v10, %v3326_v25 }
 0x52c   :  { %v3334_v61 = vadd.f32 %v3333_v11, %v3327_v23 }
 0x53e   :  { %v3874_v35 = vpop.f32.mrb[22].mxu1 }
 0x53f   :  { %v3329_v3 = vmul.f32 %v3874_v35, %v7808_v37  ;;  %v3313_v18 = vpop.f32.mrb[23].mxu1 }
 0x540   :  { %v3328_v27 = vmul.f32 %v3313_v18, %v7809_v19 }
 0x542   :  { %v3335_v48 = vadd.f32 %v3334_v61, %v3328_v27 }
 0x544   :  { %v3336_v31 = vadd.f32 %v3335_v48, %v3329_v3 }
 0x546   :  { %4245 = vlog2.f32 %v3336_v31 }
 0x547   :  { %4247 = vlog2.f32 %v7811_v5 }
 0x550   :  { %v4246_v7 = vpop.eup %4245 }
 0x551   :  { %v3338_v44 = vmul.f32 0.6931472, %v4246_v7  ;;  %v4248_v14 = vpop.eup %4247 }
 0x552   :  { %v868_v42 = vmul.f32 0.6931472, %v4248_v14 }
 0x553   :  { %v3344_v17 = vsel %vm3343_vm8, %v3338_v44, %v816_v38 }
 0x554   :  { %3943 = vmatmul.mubr.msk.f32.vlgmr.msra.gmra.mrb[16].mxu0 %vm3351_vm9, %v3344_v17 }
 0x555   :  { %4102 = vmatpush3.bf16.msra.mxu0 %v4101_v46  ;;  %3977 = vmatprep.mubr.msk.f32.mxu0 %vm4351_vm3, %v7614_v59  ;;  %v3549_v59 = vld [vmem:[#allocation7 + $0x150] sm:$0xff] }
 0x556   :  { %4103 = vmatprep.subr.bf16.mxu0 %v4350_v52  ;;  %v4116_v56 = vpack.c.bf16 %v3550_v12, %v3549_v59 }
 0x559   :  { %4105 = vmatpush3.bf16.msra.mxu0 %v4104_v15 }
 0x55a   :  { %4106 = vmatprep.subr.bf16.mxu0 %v4350_v52 }
 0x55d   :  { %4108 = vmatpush3.bf16.msra.mxu0 %v4107_v47 }
 0x55e   :  { %4109 = vmatprep.subr.bf16.mxu0 %v4350_v52 }
 0x561   :  { %4111 = vmatpush3.bf16.msra.mxu0 %v4110_v30 }
 0x562   :  { %4112 = vmatprep.subr.bf16.mxu0 %v4350_v52 }
 0x565   :  { %4114 = vmatpush3.bf16.msra.mxu0 %v4113_v39 }
 0x566   :  { %4115 = vmatprep.subr.bf16.mxu0 %v4350_v52 }
 0x569   :  { %4117 = vmatpush3.bf16.msra.mxu0 %v4116_v56 }
 0x56a   :  { %4118 = vmatprep.subr.bf16.mxu0 %v4350_v52 }
 0x56d   :  { %4120 = vmatpush3.bf16.msra.mxu0 %v4119_v9 }
 0x56e   :  { %4121 = vmatprep.subr.bf16.mxu0 %v4350_v52 }
 0x571   :  { %4123 = vmatpush3.bf16.msra.mxu0 %v4122_v58 }
 0x574   :  { %3978 = vmatmul.mubr.msk.f32.vlgmr.msra.gmra.mrb[16].mxu0 %vm3536_vm10, %v868_v42 }
 0x647   :  { %v3621_v26 = vpop.f32.mrb[16].mxu0 }
 0x648   :  { %3626 = vst [vmem:[#allocation8] sm:$0xff] %v3621_v26  ;;  %v3979_v40 = vpop.f32.mrb[17].mxu0 }
 0x649   :  { %4326 = shalt.err (!%p4323_p0)
}
 0x64a   :  { %s4327_s22 = scalar_lea.hbm %s7005_s10, 128 }
 0x64b   :  { %p4328_p1 = scmp.ne.s32.totalorder %s7005_s10, %s4327_s22  ;;  %p4331_p2 = scmp.lt.u32.totalorder %s4327_s22, %s7005_s10 }
 0x64d   :  { %p4333_p3 = pnand %p4331_p2, %p4328_p1 }
 0x64f   :  { %4336 = shalt.err (!%p4333_p3)
}
 0x650   :  { %3636 = dma.vmem_to_hbm [thread:$0]  %s3634_s19, 128, %s7005_s10, [#allocation4]  }
 0x651   :  { %4341 = dma.done.wait [#allocation4], 128  }
 0x652   :  { %4342 = vsyncadd [#allocation4], 4294967168 }
 0x653   :  { %3640 = vsyncpa [#allocation3], 1 }
 0x654   :  { %3641 = vsyncpa [#allocation6], 1 }
 0x655   :  { %3642 = vsyncpa [#allocation4], 1 }

</bundles_post_ra>
